<compile_context>
chip_gen: v6e
topology: v6e:2x2x1
jax: 0.10.0
libtpu: 0.0.40
codegen_flags: <defaults>
</compile_context>

<pallas_src>
import jax
import jax.numpy as jnp
from jax import lax
from jax.experimental import pallas as pl
from jax.experimental.pallas import tpu as pltpu

_VMEM_LIMIT = 32 << 20  # total resident footprint is ~1 MiB; plenty of headroom


def _round_up(x, m):
    return ((x + m - 1) // m) * m


# --------------------------------------------------------------------------
# Fused whole-network kernel (one image per grid step)
# --------------------------------------------------------------------------

def _lenet_kernel(x_ref, w1b_ref, bt1_ref, w2b_ref, bt2_ref,
                  wf1p_ref, bf1_ref, wf2t_ref, bf2_ref, wf3t_ref, bf3_ref,
                  o_ref):
    """x_ref: (1, H, W*Cin) image.  All weights resident in VMEM.

    Conv stage: for pooling offsets (dy, dx) in {0,1}^2,
      A_{dy,dx}[ph, pw*O + o] = sum_kh (Sel_{dy+kh} @ img) @ Wband[dx, kh]
    where Sel_t is a 0/1 matrix selecting image rows t, t+2, t+4, ... and
    Wband[dx, kh] folds the (kw, cin) contraction + the stride-2 column
    selection into a banded (W*Cin, PW*O) matrix.  Pool = max over (dy, dx),
    then a single bias add + ReLU.
    """
    f32 = jnp.float32

    in_h = x_ref.shape[1]                     # 32
    kh1 = w1b_ref.shape[1]                    # 5
    p1h = (in_h - kh1 + 1) // 2               # 14
    kh2 = w2b_ref.shape[1]                    # 5
    p2h = (p1h - kh2 + 1) // 2                # 5

    def conv_relu_pool(img, wband_ref, btile_ref, out_rows):
        n_rows = img.shape[0]
        n_kh = wband_ref.shape[1]
        # 0/1 row-selection matrices (MXU-friendly; avoids strided slices).
        r = lax.broadcasted_iota(jnp.int32, (out_rows, n_rows), 0)
        c = lax.broadcasted_iota(jnp.int32, (out_rows, n_rows), 1)
        lhs = [jnp.dot((c == 2 * r + t).astype(f32), img,
                       preferred_element_type=f32)
               for t in range(n_kh + 1)]                    # (out_rows, n_cols)
        acc = [[None, None], [None, None]]                  # [dy][dx]
        for kh in range(n_kh):
            for dx in range(2):
                rhs = wband_ref[dx, kh]                     # (n_cols, PW*O)
                for dy in range(2):
                    y = jnp.dot(lhs[dy + kh], rhs, preferred_element_type=f32)
                    acc[dy][dx] = y if acc[dy][dx] is None else acc[dy][dx] + y
        m = jnp.maximum(jnp.maximum(acc[0][0], acc[0][1]),
                        jnp.maximum(acc[1][0], acc[1][1]))
        # Shared bias hoisted out of the pooling max; ReLU/max commute.
        return jnp.maximum(m + btile_ref[...], 0.0)

    img = x_ref[0]                                          # (32, 96)
    p1 = conv_relu_pool(img, w1b_ref, bt1_ref, p1h)         # (14, 84) = (ph, pw*6+o)
    p2 = conv_relu_pool(p1, w2b_ref, bt2_ref, p2h)          # (5, 80)  = (ph, pw*16+o)

    # FC stack.  fc1 contracts over the 5 pooled rows via 5 small matmuls; the
    # NCHW flatten order is pre-folded into wf1p's row permutation.
    h = None
    for i in range(p2h):
        part = jnp.dot(p2[i:i + 1, :], wf1p_ref[i], preferred_element_type=f32)
        h = part if h is None else h + part                 # (1, 120)
    h = jnp.maximum(h + bf1_ref[...], 0.0)
    h = jnp.maximum(jnp.dot(h, wf2t_ref[...], preferred_element_type=f32)
                    + bf2_ref[...], 0.0)                    # (1, 84)
    out = jnp.dot(h, wf3t_ref[...], preferred_element_type=f32) + bf3_ref[...]
    o_ref[0] = out                                          # lane-dense (1, 128)


# --------------------------------------------------------------------------
# Wrapper-side weight preparation (pure weight prep; tiny)
# --------------------------------------------------------------------------

def _band_weights(w_oihw, in_w, out_pw):
    """Banded conv weights: out[dx, kh, w*C + c, pw*O + o] =
       w[o, c, kh, w - 2*pw - dx] if 0 <= w - 2*pw - dx < KW else 0."""
    O, C, KH, KW = w_oihw.shape
    w_idx = jnp.arange(in_w).reshape(in_w, 1, 1)
    p_idx = jnp.arange(out_pw).reshape(1, out_pw, 1)
    k_idx = jnp.arange(KW).reshape(1, 1, KW)
    onehot = jnp.stack(
        [(w_idx - 2 * p_idx - dx == k_idx) for dx in range(2)], axis=0
    ).astype(w_oihw.dtype)                                  # (2, in_w, out_pw, KW)
    band = jnp.einsum('dwpk,ochk->dhwcpo', onehot, w_oihw)  # (2,KH,in_w,C,out_pw,O)
    return band.reshape(2, KH, in_w * C, out_pw * O)


def _prepare_operands(params, H, W, nout_pad):
    w1, b1, w2, b2, wf1, bf1, wf2, bf2, wf3, bf3 = params
    O1, C1, KH1, KW1 = w1.shape
    O2, C2, KH2, KW2 = w2.shape
    p1w = (W - KW1 + 1) // 2
    p1h = (H - KH1 + 1) // 2
    p2w = (p1w - KW2 + 1) // 2
    p2h = (p1h - KH2 + 1) // 2
    nf1, nf2, nout = wf1.shape[0], wf2.shape[0], wf3.shape[0]

    w1b = _band_weights(w1, W, p1w)                         # (2, 5, 96, 84)
    w2b = _band_weights(w2, p1w, p2w)                       # (2, 5, 84, 80)
    bt1 = jnp.tile(b1, p1w).reshape(1, p1w * O1)            # bias per (pw, o) column
    bt2 = jnp.tile(b2, p2w).reshape(1, p2w * O2)

    # Fold PyTorch's NCHW view(-1, 400) into fc1's input-row permutation:
    # wf1p[ph, pw*O2 + o, j] = wf1[j, o*(p2h*p2w) + ph*p2w + pw]
    wf1p = wf1.reshape(nf1, O2, p2h, p2w).transpose(2, 3, 1, 0)
    wf1p = wf1p.reshape(p2h, p2w * O2, nf1)                 # (5, 80, 120)
    bf1r = bf1.reshape(1, nf1)
    wf2t = wf2.T                                            # (120, 84)
    bf2r = bf2.reshape(1, nf2)
    wf3t = jnp.pad(wf3.T, ((0, 0), (0, nout_pad - nout)))   # (84, 128) lane-dense
    bf3r = jnp.pad(bf3, (0, nout_pad - nout)).reshape(1, nout_pad)
    return (w1b, bt1, w2b, bt2, wf1p, bf1r, wf2t, bf2r, wf3t, bf3r)


def the_model_forward(x, params):
    """x: (B, 3, 32, 32) float32 NCHW. Returns logits (B, 10)."""
    w1, b1, w2, b2, wf1, bf1, wf2, bf2, wf3, bf3 = params
    B, C, H, W = x.shape
    O1, C1, KH1, KW1 = w1.shape
    O2, C2, KH2, KW2 = w2.shape
    assert C == C1 and (H - KH1 + 1) % 2 == 0 and (W - KW1 + 1) % 2 == 0
    p1h, p1w = (H - KH1 + 1) // 2, (W - KW1 + 1) // 2
    p2h, p2w = (p1h - KH2 + 1) // 2, (p1w - KW2 + 1) // 2
    nf1, nf2, nout = wf1.shape[0], wf2.shape[0], wf3.shape[0]
    nout_pad = _round_up(nout, 128)                         # lane-dense logits store

    weight_ops = _prepare_operands(params, H, W, nout_pad)

    # Single cheap relayout: NCHW -> (B, H, W*C) with column index = w*C + c.
    x2 = jnp.transpose(x, (0, 2, 3, 1)).reshape(B, H, W * C)

    in_specs = [pl.BlockSpec((1, H, W * C), lambda b: (b, 0, 0))]
    for wgt in weight_ops:                                  # resident weights
        in_specs.append(
            pl.BlockSpec(wgt.shape, lambda b, _nd=wgt.ndim: (0,) * _nd))

    flops_img = (
        2 * (KH1 + 1) * p1h * H * (W * C1)                  # conv1 row selection
        + 2 * 4 * KH1 * p1h * (W * C1) * (p1w * O1)         # conv1 banded matmuls
        + 2 * (KH2 + 1) * p2h * p1h * (p1w * C2)            # conv2 row selection
        + 2 * 4 * KH2 * p2h * (p1w * C2) * (p2w * O2)       # conv2 banded matmuls
        + 2 * p2h * (p2w * O2) * nf1 + 2 * nf1 * nf2 + 2 * nf2 * nout_pad)
    weight_bytes = sum(int(w.size) * 4 for w in weight_ops)
    bytes_accessed = 4 * B * (H * W * C1 + nout_pad) + weight_bytes

    out = pl.pallas_call(
        _lenet_kernel,
        out_shape=jax.ShapeDtypeStruct((B, 1, nout_pad), jnp.float32),
        grid=(B,),
        in_specs=in_specs,
        out_specs=pl.BlockSpec((1, 1, nout_pad), lambda b: (b, 0, 0)),
        compiler_params=pltpu.CompilerParams(
            dimension_semantics=("parallel",),
            vmem_limit_bytes=_VMEM_LIMIT),
        cost_estimate=pl.CostEstimate(flops=B * flops_img, transcendentals=0,
                                      bytes_accessed=bytes_accessed),
    )(x2, *weight_ops)
    return out.reshape(B, nout_pad)[:, :nout]


# --------------------------------------------------------------------------
# Parameters (PyTorch layouts) and pure-JAX reference
# --------------------------------------------------------------------------

def init_params(key):
    ks = jax.random.split(key, 10)

    def u(k, shape, fan_in):
        s = 1.0 / jnp.sqrt(fan_in)
        return jax.random.uniform(k, shape, jnp.float32, -s, s)

    w1 = u(ks[0], (6, 3, 5, 5), 3 * 5 * 5)
    b1 = u(ks[1], (6,), 3 * 5 * 5)
    w2 = u(ks[2], (16, 6, 5, 5), 6 * 5 * 5)
    b2 = u(ks[3], (16,), 6 * 5 * 5)
    wf1 = u(ks[4], (120, 400), 400)
    bf1 = u(ks[5], (120,), 400)
    wf2 = u(ks[6], (84, 120), 120)
    bf2 = u(ks[7], (84,), 120)
    wf3 = u(ks[8], (10, 84), 84)
    bf3 = u(ks[9], (10,), 84)
    return (w1, b1, w2, b2, wf1, bf1, wf2, bf2, wf3, bf3)


def reference_forward(x, params):
    """Pure-JAX replica of TheModelClass.forward (NCHW, PyTorch layouts)."""
    w1, b1, w2, b2, wf1, bf1, wf2, bf2, wf3, bf3 = params
    hp = lax.Precision.HIGHEST
    dn = ("NCHW", "OIHW", "NCHW")

    y = lax.conv_general_dilated(x, w1, (1, 1), "VALID",
                                 dimension_numbers=dn, precision=hp)
    y = jnp.maximum(y + b1[None, :, None, None], 0.0)
    y = lax.reduce_window(y, -jnp.inf, lax.max, (1, 1, 2, 2), (1, 1, 2, 2), "VALID")

    y = lax.conv_general_dilated(y, w2, (1, 1), "VALID",
                                 dimension_numbers=dn, precision=hp)
    y = jnp.maximum(y + b2[None, :, None, None], 0.0)
    y = lax.reduce_window(y, -jnp.inf, lax.max, (1, 1, 2, 2), (1, 1, 2, 2), "VALID")

    y = y.reshape(y.shape[0], -1)                           # (B, 400), NCHW order
    y = jnp.maximum(jnp.dot(y, wf1.T, precision=hp) + bf1, 0.0)
    y = jnp.maximum(jnp.dot(y, wf2.T, precision=hp) + bf2, 0.0)
    return jnp.dot(y, wf3.T, precision=hp) + bf3


# --------------------------------------------------------------------------

if __name__ == "__main__":
    key = jax.random.PRNGKey(0)
    kx, kparam = jax.random.split(key)
    x = jax.random.normal(kx, (2, 3, 32, 32), dtype=jnp.float32)  # NCHW
    params = init_params(kparam)

    forward = jax.jit(the_model_forward)
    logits = jax.block_until_ready(forward(x, params))

    ref = reference_forward(x, params)
    assert logits.shape == (2, 10)
    max_err = float(jnp.max(jnp.abs(logits - ref)))
    assert jnp.allclose(logits, ref, atol=2e-3, rtol=2e-3), max_err

    print("KERNEL_OK")
</pallas_src>

<mosaic_0001>
module attributes {stable_mosaic.version = 11 : i64} {
  func.func @_lenet_kernel(%arg0: i32, %arg1: memref<1x32x96xf32, #tpu.memory_space<vmem>>, %arg2: memref<2x5x96x84xf32, #tpu.memory_space<vmem>>, %arg3: memref<1x84xf32, #tpu.memory_space<vmem>>, %arg4: memref<2x5x84x80xf32, #tpu.memory_space<vmem>>, %arg5: memref<1x80xf32, #tpu.memory_space<vmem>>, %arg6: memref<5x80x120xf32, #tpu.memory_space<vmem>>, %arg7: memref<1x120xf32, #tpu.memory_space<vmem>>, %arg8: memref<120x84xf32, #tpu.memory_space<vmem>>, %arg9: memref<1x84xf32, #tpu.memory_space<vmem>>, %arg10: memref<84x128xf32, #tpu.memory_space<vmem>>, %arg11: memref<1x128xf32, #tpu.memory_space<vmem>>, %arg12: memref<1x1x128xf32, #tpu.memory_space<vmem>>) attributes {dimension_semantics = [#tpu.dimension_semantics<parallel>], iteration_bounds = array<i64: 2>, scalar_prefetch = 0 : i64, scratch_operands = 0 : i64, tpu.core_type = #tpu.core_type<tc>, window_params = [{transform_indices = @transform_0, window_bounds = array<i64: 1, 32, 96>}, {pipeline_mode = #tpu.pipeline_mode<synchronous>, transform_indices = @transform_1, window_bounds = array<i64: 2, 5, 96, 84>}, {pipeline_mode = #tpu.pipeline_mode<synchronous>, transform_indices = @transform_2, window_bounds = array<i64: 1, 84>}, {pipeline_mode = #tpu.pipeline_mode<synchronous>, transform_indices = @transform_3, window_bounds = array<i64: 2, 5, 84, 80>}, {pipeline_mode = #tpu.pipeline_mode<synchronous>, transform_indices = @transform_4, window_bounds = array<i64: 1, 80>}, {pipeline_mode = #tpu.pipeline_mode<synchronous>, transform_indices = @transform_5, window_bounds = array<i64: 5, 80, 120>}, {pipeline_mode = #tpu.pipeline_mode<synchronous>, transform_indices = @transform_6, window_bounds = array<i64: 1, 120>}, {pipeline_mode = #tpu.pipeline_mode<synchronous>, transform_indices = @transform_7, window_bounds = array<i64: 120, 84>}, {pipeline_mode = #tpu.pipeline_mode<synchronous>, transform_indices = @transform_8, window_bounds = array<i64: 1, 84>}, {pipeline_mode = #tpu.pipeline_mode<synchronous>, transform_indices = @transform_9, window_bounds = array<i64: 84, 128>}, {pipeline_mode = #tpu.pipeline_mode<synchronous>, transform_indices = @transform_10, window_bounds = array<i64: 1, 128>}, {transform_indices = @transform_11, window_bounds = array<i64: 1, 1, 128>}]} {
    %c0 = arith.constant 0 : index
    %c0_0 = arith.constant 0 : index
    %c0_1 = arith.constant 0 : index
    %0 = vector.load %arg1[%c0, %c0_0, %c0_1] : memref<1x32x96xf32, #tpu.memory_space<vmem>>, vector<1x32x96xf32>
    %1 = vector.shape_cast %0 : vector<1x32x96xf32> to vector<32x96xf32>
    %2 = tpu.iota {dimensions = array<i32: 0>} : vector<14x32xi32>
    %3 = tpu.iota {dimensions = array<i32: 1>} : vector<14x32xi32>
    %c2_i32 = arith.constant 2 : i32
    %4 = vector.broadcast %c2_i32 : i32 to vector<14x32xi32>
    %5 = arith.muli %4, %2 : vector<14x32xi32>
    %c0_i32 = arith.constant 0 : i32
    %6 = vector.broadcast %c0_i32 : i32 to vector<14x32xi32>
    %7 = arith.addi %5, %6 : vector<14x32xi32>
    %8 = arith.cmpi eq, %3, %7 : vector<14x32xi32>
    %9 = arith.extui %8 : vector<14x32xi1> to vector<14x32xi32>
    %10 = arith.sitofp %9 : vector<14x32xi32> to vector<14x32xf32>
    %cst = arith.constant dense<0.000000e+00> : vector<14x96xf32>
    %11 = tpu.matmul %10, %1, %cst {dimension_numbers = #tpu.dot_dimension_numbers<[1], [0], [0], [1], [0, 0, 1, 1], [], []>} : vector<14x32xf32>, vector<32x96xf32>, vector<14x96xf32> -> vector<14x96xf32>
    %c2_i32_2 = arith.constant 2 : i32
    %12 = vector.broadcast %c2_i32_2 : i32 to vector<14x32xi32>
    %13 = arith.muli %12, %2 : vector<14x32xi32>
    %c1_i32 = arith.constant 1 : i32
    %14 = vector.broadcast %c1_i32 : i32 to vector<14x32xi32>
    %15 = arith.addi %13, %14 : vector<14x32xi32>
    %16 = arith.cmpi eq, %3, %15 : vector<14x32xi32>
    %17 = arith.extui %16 : vector<14x32xi1> to vector<14x32xi32>
    %18 = arith.sitofp %17 : vector<14x32xi32> to vector<14x32xf32>
    %cst_3 = arith.constant dense<0.000000e+00> : vector<14x96xf32>
    %19 = tpu.matmul %18, %1, %cst_3 {dimension_numbers = #tpu.dot_dimension_numbers<[1], [0], [0], [1], [0, 0, 1, 1], [], []>} : vector<14x32xf32>, vector<32x96xf32>, vector<14x96xf32> -> vector<14x96xf32>
    %c2_i32_4 = arith.constant 2 : i32
    %20 = vector.broadcast %c2_i32_4 : i32 to vector<14x32xi32>
    %21 = arith.muli %20, %2 : vector<14x32xi32>
    %c2_i32_5 = arith.constant 2 : i32
    %22 = vector.broadcast %c2_i32_5 : i32 to vector<14x32xi32>
    %23 = arith.addi %21, %22 : vector<14x32xi32>
    %24 = arith.cmpi eq, %3, %23 : vector<14x32xi32>
    %25 = arith.extui %24 : vector<14x32xi1> to vector<14x32xi32>
    %26 = arith.sitofp %25 : vector<14x32xi32> to vector<14x32xf32>
    %cst_6 = arith.constant dense<0.000000e+00> : vector<14x96xf32>
    %27 = tpu.matmul %26, %1, %cst_6 {dimension_numbers = #tpu.dot_dimension_numbers<[1], [0], [0], [1], [0, 0, 1, 1], [], []>} : vector<14x32xf32>, vector<32x96xf32>, vector<14x96xf32> -> vector<14x96xf32>
    %c2_i32_7 = arith.constant 2 : i32
    %28 = vector.broadcast %c2_i32_7 : i32 to vector<14x32xi32>
    %29 = arith.muli %28, %2 : vector<14x32xi32>
    %c3_i32 = arith.constant 3 : i32
    %30 = vector.broadcast %c3_i32 : i32 to vector<14x32xi32>
    %31 = arith.addi %29, %30 : vector<14x32xi32>
    %32 = arith.cmpi eq, %3, %31 : vector<14x32xi32>
    %33 = arith.extui %32 : vector<14x32xi1> to vector<14x32xi32>
    %34 = arith.sitofp %33 : vector<14x32xi32> to vector<14x32xf32>
    %cst_8 = arith.constant dense<0.000000e+00> : vector<14x96xf32>
    %35 = tpu.matmul %34, %1, %cst_8 {dimension_numbers = #tpu.dot_dimension_numbers<[1], [0], [0], [1], [0, 0, 1, 1], [], []>} : vector<14x32xf32>, vector<32x96xf32>, vector<14x96xf32> -> vector<14x96xf32>
    %c2_i32_9 = arith.constant 2 : i32
    %36 = vector.broadcast %c2_i32_9 : i32 to vector<14x32xi32>
    %37 = arith.muli %36, %2 : vector<14x32xi32>
    %c4_i32 = arith.constant 4 : i32
    %38 = vector.broadcast %c4_i32 : i32 to vector<14x32xi32>
    %39 = arith.addi %37, %38 : vector<14x32xi32>
    %40 = arith.cmpi eq, %3, %39 : vector<14x32xi32>
    %41 = arith.extui %40 : vector<14x32xi1> to vector<14x32xi32>
    %42 = arith.sitofp %41 : vector<14x32xi32> to vector<14x32xf32>
    %cst_10 = arith.constant dense<0.000000e+00> : vector<14x96xf32>
    %43 = tpu.matmul %42, %1, %cst_10 {dimension_numbers = #tpu.dot_dimension_numbers<[1], [0], [0], [1], [0, 0, 1, 1], [], []>} : vector<14x32xf32>, vector<32x96xf32>, vector<14x96xf32> -> vector<14x96xf32>
    %c2_i32_11 = arith.constant 2 : i32
    %44 = vector.broadcast %c2_i32_11 : i32 to vector<14x32xi32>
    %45 = arith.muli %44, %2 : vector<14x32xi32>
    %c5_i32 = arith.constant 5 : i32
    %46 = vector.broadcast %c5_i32 : i32 to vector<14x32xi32>
    %47 = arith.addi %45, %46 : vector<14x32xi32>
    %48 = arith.cmpi eq, %3, %47 : vector<14x32xi32>
    %49 = arith.extui %48 : vector<14x32xi1> to vector<14x32xi32>
    %50 = arith.sitofp %49 : vector<14x32xi32> to vector<14x32xf32>
    %cst_12 = arith.constant dense<0.000000e+00> : vector<14x96xf32>
    %51 = tpu.matmul %50, %1, %cst_12 {dimension_numbers = #tpu.dot_dimension_numbers<[1], [0], [0], [1], [0, 0, 1, 1], [], []>} : vector<14x32xf32>, vector<32x96xf32>, vector<14x96xf32> -> vector<14x96xf32>
    %c0_13 = arith.constant 0 : index
    %c0_14 = arith.constant 0 : index
    %c0_15 = arith.constant 0 : index
    %c0_16 = arith.constant 0 : index
    %52 = vector.load %arg2[%c0_13, %c0_14, %c0_15, %c0_16] : memref<2x5x96x84xf32, #tpu.memory_space<vmem>>, vector<1x1x96x84xf32>
    %53 = vector.shape_cast %52 : vector<1x1x96x84xf32> to vector<96x84xf32>
    %cst_17 = arith.constant dense<0.000000e+00> : vector<14x84xf32>
    %54 = tpu.matmul %11, %53, %cst_17 {dimension_numbers = #tpu.dot_dimension_numbers<[1], [0], [0], [1], [0, 0, 1, 1], [], []>} : vector<14x96xf32>, vector<96x84xf32>, vector<14x84xf32> -> vector<14x84xf32>
    %cst_18 = arith.constant dense<0.000000e+00> : vector<14x84xf32>
    %55 = tpu.matmul %19, %53, %cst_18 {dimension_numbers = #tpu.dot_dimension_numbers<[1], [0], [0], [1], [0, 0, 1, 1], [], []>} : vector<14x96xf32>, vector<96x84xf32>, vector<14x84xf32> -> vector<14x84xf32>
    %c1 = arith.constant 1 : index
    %c0_19 = arith.constant 0 : index
    %c0_20 = arith.constant 0 : index
    %c0_21 = arith.constant 0 : index
    %56 = vector.load %arg2[%c1, %c0_19, %c0_20, %c0_21] : memref<2x5x96x84xf32, #tpu.memory_space<vmem>>, vector<1x1x96x84xf32>
    %57 = vector.shape_cast %56 : vector<1x1x96x84xf32> to vector<96x84xf32>
    %cst_22 = arith.constant dense<0.000000e+00> : vector<14x84xf32>
    %58 = tpu.matmul %11, %57, %cst_22 {dimension_numbers = #tpu.dot_dimension_numbers<[1], [0], [0], [1], [0, 0, 1, 1], [], []>} : vector<14x96xf32>, vector<96x84xf32>, vector<14x84xf32> -> vector<14x84xf32>
    %cst_23 = arith.constant dense<0.000000e+00> : vector<14x84xf32>
    %59 = tpu.matmul %19, %57, %cst_23 {dimension_numbers = #tpu.dot_dimension_numbers<[1], [0], [0], [1], [0, 0, 1, 1], [], []>} : vector<14x96xf32>, vector<96x84xf32>, vector<14x84xf32> -> vector<14x84xf32>
    %c0_24 = arith.constant 0 : index
    %c1_25 = arith.constant 1 : index
    %c0_26 = arith.constant 0 : index
    %c0_27 = arith.constant 0 : index
    %60 = vector.load %arg2[%c0_24, %c1_25, %c0_26, %c0_27] : memref<2x5x96x84xf32, #tpu.memory_space<vmem>>, vector<1x1x96x84xf32>
    %61 = vector.shape_cast %60 : vector<1x1x96x84xf32> to vector<96x84xf32>
    %cst_28 = arith.constant dense<0.000000e+00> : vector<14x84xf32>
    %62 = tpu.matmul %19, %61, %cst_28 {dimension_numbers = #tpu.dot_dimension_numbers<[1], [0], [0], [1], [0, 0, 1, 1], [], []>} : vector<14x96xf32>, vector<96x84xf32>, vector<14x84xf32> -> vector<14x84xf32>
    %63 = arith.addf %54, %62 : vector<14x84xf32>
    %cst_29 = arith.constant dense<0.000000e+00> : vector<14x84xf32>
    %64 = tpu.matmul %27, %61, %cst_29 {dimension_numbers = #tpu.dot_dimension_numbers<[1], [0], [0], [1], [0, 0, 1, 1], [], []>} : vector<14x96xf32>, vector<96x84xf32>, vector<14x84xf32> -> vector<14x84xf32>
    %65 = arith.addf %55, %64 : vector<14x84xf32>
    %c1_30 = arith.constant 1 : index
    %c1_31 = arith.constant 1 : index
    %c0_32 = arith.constant 0 : index
    %c0_33 = arith.constant 0 : index
    %66 = vector.load %arg2[%c1_30, %c1_31, %c0_32, %c0_33] : memref<2x5x96x84xf32, #tpu.memory_space<vmem>>, vector<1x1x96x84xf32>
    %67 = vector.shape_cast %66 : vector<1x1x96x84xf32> to vector<96x84xf32>
    %cst_34 = arith.constant dense<0.000000e+00> : vector<14x84xf32>
    %68 = tpu.matmul %19, %67, %cst_34 {dimension_numbers = #tpu.dot_dimension_numbers<[1], [0], [0], [1], [0, 0, 1, 1], [], []>} : vector<14x96xf32>, vector<96x84xf32>, vector<14x84xf32> -> vector<14x84xf32>
    %69 = arith.addf %58, %68 : vector<14x84xf32>
    %cst_35 = arith.constant dense<0.000000e+00> : vector<14x84xf32>
    %70 = tpu.matmul %27, %67, %cst_35 {dimension_numbers = #tpu.dot_dimension_numbers<[1], [0], [0], [1], [0, 0, 1, 1], [], []>} : vector<14x96xf32>, vector<96x84xf32>, vector<14x84xf32> -> vector<14x84xf32>
    %71 = arith.addf %59, %70 : vector<14x84xf32>
    %c0_36 = arith.constant 0 : index
    %c2 = arith.constant 2 : index
    %c0_37 = arith.constant 0 : index
    %c0_38 = arith.constant 0 : index
    %72 = vector.load %arg2[%c0_36, %c2, %c0_37, %c0_38] : memref<2x5x96x84xf32, #tpu.memory_space<vmem>>, vector<1x1x96x84xf32>
    %73 = vector.shape_cast %72 : vector<1x1x96x84xf32> to vector<96x84xf32>
    %cst_39 = arith.constant dense<0.000000e+00> : vector<14x84xf32>
    %74 = tpu.matmul %27, %73, %cst_39 {dimension_numbers = #tpu.dot_dimension_numbers<[1], [0], [0], [1], [0, 0, 1, 1], [], []>} : vector<14x96xf32>, vector<96x84xf32>, vector<14x84xf32> -> vector<14x84xf32>
    %75 = arith.addf %63, %74 : vector<14x84xf32>
    %cst_40 = arith.constant dense<0.000000e+00> : vector<14x84xf32>
    %76 = tpu.matmul %35, %73, %cst_40 {dimension_numbers = #tpu.dot_dimension_numbers<[1], [0], [0], [1], [0, 0, 1, 1], [], []>} : vector<14x96xf32>, vector<96x84xf32>, vector<14x84xf32> -> vector<14x84xf32>
    %77 = arith.addf %65, %76 : vector<14x84xf32>
    %c1_41 = arith.constant 1 : index
    %c2_42 = arith.constant 2 : index
    %c0_43 = arith.constant 0 : index
    %c0_44 = arith.constant 0 : index
    %78 = vector.load %arg2[%c1_41, %c2_42, %c0_43, %c0_44] : memref<2x5x96x84xf32, #tpu.memory_space<vmem>>, vector<1x1x96x84xf32>
    %79 = vector.shape_cast %78 : vector<1x1x96x84xf32> to vector<96x84xf32>
    %cst_45 = arith.constant dense<0.000000e+00> : vector<14x84xf32>
    %80 = tpu.matmul %27, %79, %cst_45 {dimension_numbers = #tpu.dot_dimension_numbers<[1], [0], [0], [1], [0, 0, 1, 1], [], []>} : vector<14x96xf32>, vector<96x84xf32>, vector<14x84xf32> -> vector<14x84xf32>
    %81 = arith.addf %69, %80 : vector<14x84xf32>
    %cst_46 = arith.constant dense<0.000000e+00> : vector<14x84xf32>
    %82 = tpu.matmul %35, %79, %cst_46 {dimension_numbers = #tpu.dot_dimension_numbers<[1], [0], [0], [1], [0, 0, 1, 1], [], []>} : vector<14x96xf32>, vector<96x84xf32>, vector<14x84xf32> -> vector<14x84xf32>
    %83 = arith.addf %71, %82 : vector<14x84xf32>
    %c0_47 = arith.constant 0 : index
    %c3 = arith.constant 3 : index
    %c0_48 = arith.constant 0 : index
    %c0_49 = arith.constant 0 : index
    %84 = vector.load %arg2[%c0_47, %c3, %c0_48, %c0_49] : memref<2x5x96x84xf32, #tpu.memory_space<vmem>>, vector<1x1x96x84xf32>
    %85 = vector.shape_cast %84 : vector<1x1x96x84xf32> to vector<96x84xf32>
    %cst_50 = arith.constant dense<0.000000e+00> : vector<14x84xf32>
    %86 = tpu.matmul %35, %85, %cst_50 {dimension_numbers = #tpu.dot_dimension_numbers<[1], [0], [0], [1], [0, 0, 1, 1], [], []>} : vector<14x96xf32>, vector<96x84xf32>, vector<14x84xf32> -> vector<14x84xf32>
    %87 = arith.addf %75, %86 : vector<14x84xf32>
    %cst_51 = arith.constant dense<0.000000e+00> : vector<14x84xf32>
    %88 = tpu.matmul %43, %85, %cst_51 {dimension_numbers = #tpu.dot_dimension_numbers<[1], [0], [0], [1], [0, 0, 1, 1], [], []>} : vector<14x96xf32>, vector<96x84xf32>, vector<14x84xf32> -> vector<14x84xf32>
    %89 = arith.addf %77, %88 : vector<14x84xf32>
    %c1_52 = arith.constant 1 : index
    %c3_53 = arith.constant 3 : index
    %c0_54 = arith.constant 0 : index
    %c0_55 = arith.constant 0 : index
    %90 = vector.load %arg2[%c1_52, %c3_53, %c0_54, %c0_55] : memref<2x5x96x84xf32, #tpu.memory_space<vmem>>, vector<1x1x96x84xf32>
    %91 = vector.shape_cast %90 : vector<1x1x96x84xf32> to vector<96x84xf32>
    %cst_56 = arith.constant dense<0.000000e+00> : vector<14x84xf32>
    %92 = tpu.matmul %35, %91, %cst_56 {dimension_numbers = #tpu.dot_dimension_numbers<[1], [0], [0], [1], [0, 0, 1, 1], [], []>} : vector<14x96xf32>, vector<96x84xf32>, vector<14x84xf32> -> vector<14x84xf32>
    %93 = arith.addf %81, %92 : vector<14x84xf32>
    %cst_57 = arith.constant dense<0.000000e+00> : vector<14x84xf32>
    %94 = tpu.matmul %43, %91, %cst_57 {dimension_numbers = #tpu.dot_dimension_numbers<[1], [0], [0], [1], [0, 0, 1, 1], [], []>} : vector<14x96xf32>, vector<96x84xf32>, vector<14x84xf32> -> vector<14x84xf32>
    %95 = arith.addf %83, %94 : vector<14x84xf32>
    %c0_58 = arith.constant 0 : index
    %c4 = arith.constant 4 : index
    %c0_59 = arith.constant 0 : index
    %c0_60 = arith.constant 0 : index
    %96 = vector.load %arg2[%c0_58, %c4, %c0_59, %c0_60] : memref<2x5x96x84xf32, #tpu.memory_space<vmem>>, vector<1x1x96x84xf32>
    %97 = vector.shape_cast %96 : vector<1x1x96x84xf32> to vector<96x84xf32>
    %cst_61 = arith.constant dense<0.000000e+00> : vector<14x84xf32>
    %98 = tpu.matmul %43, %97, %cst_61 {dimension_numbers = #tpu.dot_dimension_numbers<[1], [0], [0], [1], [0, 0, 1, 1], [], []>} : vector<14x96xf32>, vector<96x84xf32>, vector<14x84xf32> -> vector<14x84xf32>
    %99 = arith.addf %87, %98 : vector<14x84xf32>
    %cst_62 = arith.constant dense<0.000000e+00> : vector<14x84xf32>
    %100 = tpu.matmul %51, %97, %cst_62 {dimension_numbers = #tpu.dot_dimension_numbers<[1], [0], [0], [1], [0, 0, 1, 1], [], []>} : vector<14x96xf32>, vector<96x84xf32>, vector<14x84xf32> -> vector<14x84xf32>
    %101 = arith.addf %89, %100 : vector<14x84xf32>
    %c1_63 = arith.constant 1 : index
    %c4_64 = arith.constant 4 : index
    %c0_65 = arith.constant 0 : index
    %c0_66 = arith.constant 0 : index
    %102 = vector.load %arg2[%c1_63, %c4_64, %c0_65, %c0_66] : memref<2x5x96x84xf32, #tpu.memory_space<vmem>>, vector<1x1x96x84xf32>
    %103 = vector.shape_cast %102 : vector<1x1x96x84xf32> to vector<96x84xf32>
    %cst_67 = arith.constant dense<0.000000e+00> : vector<14x84xf32>
    %104 = tpu.matmul %43, %103, %cst_67 {dimension_numbers = #tpu.dot_dimension_numbers<[1], [0], [0], [1], [0, 0, 1, 1], [], []>} : vector<14x96xf32>, vector<96x84xf32>, vector<14x84xf32> -> vector<14x84xf32>
    %105 = arith.addf %93, %104 : vector<14x84xf32>
    %cst_68 = arith.constant dense<0.000000e+00> : vector<14x84xf32>
    %106 = tpu.matmul %51, %103, %cst_68 {dimension_numbers = #tpu.dot_dimension_numbers<[1], [0], [0], [1], [0, 0, 1, 1], [], []>} : vector<14x96xf32>, vector<96x84xf32>, vector<14x84xf32> -> vector<14x84xf32>
    %107 = arith.addf %95, %106 : vector<14x84xf32>
    %108 = arith.maximumf %99, %105 : vector<14x84xf32>
    %109 = arith.maximumf %101, %107 : vector<14x84xf32>
    %110 = arith.maximumf %108, %109 : vector<14x84xf32>
    %c0_69 = arith.constant 0 : index
    %c0_70 = arith.constant 0 : index
    %111 = vector.load %arg3[%c0_69, %c0_70] : memref<1x84xf32, #tpu.memory_space<vmem>>, vector<1x84xf32>
    %112 = vector.broadcast %111 : vector<1x84xf32> to vector<14x84xf32>
    %113 = arith.addf %110, %112 : vector<14x84xf32>
    %cst_71 = arith.constant 0.000000e+00 : f32
    %114 = vector.broadcast %cst_71 : f32 to vector<14x84xf32>
    %115 = arith.maximumf %113, %114 : vector<14x84xf32>
    %116 = tpu.iota {dimensions = array<i32: 0>} : vector<5x14xi32>
    %117 = tpu.iota {dimensions = array<i32: 1>} : vector<5x14xi32>
    %c2_i32_72 = arith.constant 2 : i32
    %118 = vector.broadcast %c2_i32_72 : i32 to vector<5x14xi32>
    %119 = arith.muli %118, %116 : vector<5x14xi32>
    %c0_i32_73 = arith.constant 0 : i32
    %120 = vector.broadcast %c0_i32_73 : i32 to vector<5x14xi32>
    %121 = arith.addi %119, %120 : vector<5x14xi32>
    %122 = arith.cmpi eq, %117, %121 : vector<5x14xi32>
    %123 = arith.extui %122 : vector<5x14xi1> to vector<5x14xi32>
    %124 = arith.sitofp %123 : vector<5x14xi32> to vector<5x14xf32>
    %cst_74 = arith.constant dense<0.000000e+00> : vector<5x84xf32>
    %125 = tpu.matmul %124, %115, %cst_74 {dimension_numbers = #tpu.dot_dimension_numbers<[1], [0], [0], [1], [0, 0, 1, 1], [], []>} : vector<5x14xf32>, vector<14x84xf32>, vector<5x84xf32> -> vector<5x84xf32>
    %c2_i32_75 = arith.constant 2 : i32
    %126 = vector.broadcast %c2_i32_75 : i32 to vector<5x14xi32>
    %127 = arith.muli %126, %116 : vector<5x14xi32>
    %c1_i32_76 = arith.constant 1 : i32
    %128 = vector.broadcast %c1_i32_76 : i32 to vector<5x14xi32>
    %129 = arith.addi %127, %128 : vector<5x14xi32>
    %130 = arith.cmpi eq, %117, %129 : vector<5x14xi32>
    %131 = arith.extui %130 : vector<5x14xi1> to vector<5x14xi32>
    %132 = arith.sitofp %131 : vector<5x14xi32> to vector<5x14xf32>
    %cst_77 = arith.constant dense<0.000000e+00> : vector<5x84xf32>
    %133 = tpu.matmul %132, %115, %cst_77 {dimension_numbers = #tpu.dot_dimension_numbers<[1], [0], [0], [1], [0, 0, 1, 1], [], []>} : vector<5x14xf32>, vector<14x84xf32>, vector<5x84xf32> -> vector<5x84xf32>
    %c2_i32_78 = arith.constant 2 : i32
    %134 = vector.broadcast %c2_i32_78 : i32 to vector<5x14xi32>
    %135 = arith.muli %134, %116 : vector<5x14xi32>
    %c2_i32_79 = arith.constant 2 : i32
    %136 = vector.broadcast %c2_i32_79 : i32 to vector<5x14xi32>
    %137 = arith.addi %135, %136 : vector<5x14xi32>
    %138 = arith.cmpi eq, %117, %137 : vector<5x14xi32>
    %139 = arith.extui %138 : vector<5x14xi1> to vector<5x14xi32>
    %140 = arith.sitofp %139 : vector<5x14xi32> to vector<5x14xf32>
    %cst_80 = arith.constant dense<0.000000e+00> : vector<5x84xf32>
    %141 = tpu.matmul %140, %115, %cst_80 {dimension_numbers = #tpu.dot_dimension_numbers<[1], [0], [0], [1], [0, 0, 1, 1], [], []>} : vector<5x14xf32>, vector<14x84xf32>, vector<5x84xf32> -> vector<5x84xf32>
    %c2_i32_81 = arith.constant 2 : i32
    %142 = vector.broadcast %c2_i32_81 : i32 to vector<5x14xi32>
    %143 = arith.muli %142, %116 : vector<5x14xi32>
    %c3_i32_82 = arith.constant 3 : i32
    %144 = vector.broadcast %c3_i32_82 : i32 to vector<5x14xi32>
    %145 = arith.addi %143, %144 : vector<5x14xi32>
    %146 = arith.cmpi eq, %117, %145 : vector<5x14xi32>
    %147 = arith.extui %146 : vector<5x14xi1> to vector<5x14xi32>
    %148 = arith.sitofp %147 : vector<5x14xi32> to vector<5x14xf32>
    %cst_83 = arith.constant dense<0.000000e+00> : vector<5x84xf32>
    %149 = tpu.matmul %148, %115, %cst_83 {dimension_numbers = #tpu.dot_dimension_numbers<[1], [0], [0], [1], [0, 0, 1, 1], [], []>} : vector<5x14xf32>, vector<14x84xf32>, vector<5x84xf32> -> vector<5x84xf32>
    %c2_i32_84 = arith.constant 2 : i32
    %150 = vector.broadcast %c2_i32_84 : i32 to vector<5x14xi32>
    %151 = arith.muli %150, %116 : vector<5x14xi32>
    %c4_i32_85 = arith.constant 4 : i32
    %152 = vector.broadcast %c4_i32_85 : i32 to vector<5x14xi32>
    %153 = arith.addi %151, %152 : vector<5x14xi32>
    %154 = arith.cmpi eq, %117, %153 : vector<5x14xi32>
    %155 = arith.extui %154 : vector<5x14xi1> to vector<5x14xi32>
    %156 = arith.sitofp %155 : vector<5x14xi32> to vector<5x14xf32>
    %cst_86 = arith.constant dense<0.000000e+00> : vector<5x84xf32>
    %157 = tpu.matmul %156, %115, %cst_86 {dimension_numbers = #tpu.dot_dimension_numbers<[1], [0], [0], [1], [0, 0, 1, 1], [], []>} : vector<5x14xf32>, vector<14x84xf32>, vector<5x84xf32> -> vector<5x84xf32>
    %c2_i32_87 = arith.constant 2 : i32
    %158 = vector.broadcast %c2_i32_87 : i32 to vector<5x14xi32>
    %159 = arith.muli %158, %116 : vector<5x14xi32>
    %c5_i32_88 = arith.constant 5 : i32
    %160 = vector.broadcast %c5_i32_88 : i32 to vector<5x14xi32>
    %161 = arith.addi %159, %160 : vector<5x14xi32>
    %162 = arith.cmpi eq, %117, %161 : vector<5x14xi32>
    %163 = arith.extui %162 : vector<5x14xi1> to vector<5x14xi32>
    %164 = arith.sitofp %163 : vector<5x14xi32> to vector<5x14xf32>
    %cst_89 = arith.constant dense<0.000000e+00> : vector<5x84xf32>
    %165 = tpu.matmul %164, %115, %cst_89 {dimension_numbers = #tpu.dot_dimension_numbers<[1], [0], [0], [1], [0, 0, 1, 1], [], []>} : vector<5x14xf32>, vector<14x84xf32>, vector<5x84xf32> -> vector<5x84xf32>
    %c0_90 = arith.constant 0 : index
    %c0_91 = arith.constant 0 : index
    %c0_92 = arith.constant 0 : index
    %c0_93 = arith.constant 0 : index
    %166 = vector.load %arg4[%c0_90, %c0_91, %c0_92, %c0_93] : memref<2x5x84x80xf32, #tpu.memory_space<vmem>>, vector<1x1x84x80xf32>
    %167 = vector.shape_cast %166 : vector<1x1x84x80xf32> to vector<84x80xf32>
    %cst_94 = arith.constant dense<0.000000e+00> : vector<5x80xf32>
    %168 = tpu.matmul %125, %167, %cst_94 {dimension_numbers = #tpu.dot_dimension_numbers<[1], [0], [0], [1], [0, 0, 1, 1], [], []>} : vector<5x84xf32>, vector<84x80xf32>, vector<5x80xf32> -> vector<5x80xf32>
    %cst_95 = arith.constant dense<0.000000e+00> : vector<5x80xf32>
    %169 = tpu.matmul %133, %167, %cst_95 {dimension_numbers = #tpu.dot_dimension_numbers<[1], [0], [0], [1], [0, 0, 1, 1], [], []>} : vector<5x84xf32>, vector<84x80xf32>, vector<5x80xf32> -> vector<5x80xf32>
    %c1_96 = arith.constant 1 : index
    %c0_97 = arith.constant 0 : index
    %c0_98 = arith.constant 0 : index
    %c0_99 = arith.constant 0 : index
    %170 = vector.load %arg4[%c1_96, %c0_97, %c0_98, %c0_99] : memref<2x5x84x80xf32, #tpu.memory_space<vmem>>, vector<1x1x84x80xf32>
    %171 = vector.shape_cast %170 : vector<1x1x84x80xf32> to vector<84x80xf32>
    %cst_100 = arith.constant dense<0.000000e+00> : vector<5x80xf32>
    %172 = tpu.matmul %125, %171, %cst_100 {dimension_numbers = #tpu.dot_dimension_numbers<[1], [0], [0], [1], [0, 0, 1, 1], [], []>} : vector<5x84xf32>, vector<84x80xf32>, vector<5x80xf32> -> vector<5x80xf32>
    %cst_101 = arith.constant dense<0.000000e+00> : vector<5x80xf32>
    %173 = tpu.matmul %133, %171, %cst_101 {dimension_numbers = #tpu.dot_dimension_numbers<[1], [0], [0], [1], [0, 0, 1, 1], [], []>} : vector<5x84xf32>, vector<84x80xf32>, vector<5x80xf32> -> vector<5x80xf32>
    %c0_102 = arith.constant 0 : index
    %c1_103 = arith.constant 1 : index
    %c0_104 = arith.constant 0 : index
    %c0_105 = arith.constant 0 : index
    %174 = vector.load %arg4[%c0_102, %c1_103, %c0_104, %c0_105] : memref<2x5x84x80xf32, #tpu.memory_space<vmem>>, vector<1x1x84x80xf32>
    %175 = vector.shape_cast %174 : vector<1x1x84x80xf32> to vector<84x80xf32>
    %cst_106 = arith.constant dense<0.000000e+00> : vector<5x80xf32>
    %176 = tpu.matmul %133, %175, %cst_106 {dimension_numbers = #tpu.dot_dimension_numbers<[1], [0], [0], [1], [0, 0, 1, 1], [], []>} : vector<5x84xf32>, vector<84x80xf32>, vector<5x80xf32> -> vector<5x80xf32>
    %177 = arith.addf %168, %176 : vector<5x80xf32>
    %cst_107 = arith.constant dense<0.000000e+00> : vector<5x80xf32>
    %178 = tpu.matmul %141, %175, %cst_107 {dimension_numbers = #tpu.dot_dimension_numbers<[1], [0], [0], [1], [0, 0, 1, 1], [], []>} : vector<5x84xf32>, vector<84x80xf32>, vector<5x80xf32> -> vector<5x80xf32>
    %179 = arith.addf %169, %178 : vector<5x80xf32>
    %c1_108 = arith.constant 1 : index
    %c1_109 = arith.constant 1 : index
    %c0_110 = arith.constant 0 : index
    %c0_111 = arith.constant 0 : index
    %180 = vector.load %arg4[%c1_108, %c1_109, %c0_110, %c0_111] : memref<2x5x84x80xf32, #tpu.memory_space<vmem>>, vector<1x1x84x80xf32>
    %181 = vector.shape_cast %180 : vector<1x1x84x80xf32> to vector<84x80xf32>
    %cst_112 = arith.constant dense<0.000000e+00> : vector<5x80xf32>
    %182 = tpu.matmul %133, %181, %cst_112 {dimension_numbers = #tpu.dot_dimension_numbers<[1], [0], [0], [1], [0, 0, 1, 1], [], []>} : vector<5x84xf32>, vector<84x80xf32>, vector<5x80xf32> -> vector<5x80xf32>
    %183 = arith.addf %172, %182 : vector<5x80xf32>
    %cst_113 = arith.constant dense<0.000000e+00> : vector<5x80xf32>
    %184 = tpu.matmul %141, %181, %cst_113 {dimension_numbers = #tpu.dot_dimension_numbers<[1], [0], [0], [1], [0, 0, 1, 1], [], []>} : vector<5x84xf32>, vector<84x80xf32>, vector<5x80xf32> -> vector<5x80xf32>
    %185 = arith.addf %173, %184 : vector<5x80xf32>
    %c0_114 = arith.constant 0 : index
    %c2_115 = arith.constant 2 : index
    %c0_116 = arith.constant 0 : index
    %c0_117 = arith.constant 0 : index
    %186 = vector.load %arg4[%c0_114, %c2_115, %c0_116, %c0_117] : memref<2x5x84x80xf32, #tpu.memory_space<vmem>>, vector<1x1x84x80xf32>
    %187 = vector.shape_cast %186 : vector<1x1x84x80xf32> to vector<84x80xf32>
    %cst_118 = arith.constant dense<0.000000e+00> : vector<5x80xf32>
    %188 = tpu.matmul %141, %187, %cst_118 {dimension_numbers = #tpu.dot_dimension_numbers<[1], [0], [0], [1], [0, 0, 1, 1], [], []>} : vector<5x84xf32>, vector<84x80xf32>, vector<5x80xf32> -> vector<5x80xf32>
    %189 = arith.addf %177, %188 : vector<5x80xf32>
    %cst_119 = arith.constant dense<0.000000e+00> : vector<5x80xf32>
    %190 = tpu.matmul %149, %187, %cst_119 {dimension_numbers = #tpu.dot_dimension_numbers<[1], [0], [0], [1], [0, 0, 1, 1], [], []>} : vector<5x84xf32>, vector<84x80xf32>, vector<5x80xf32> -> vector<5x80xf32>
    %191 = arith.addf %179, %190 : vector<5x80xf32>
    %c1_120 = arith.constant 1 : index
    %c2_121 = arith.constant 2 : index
    %c0_122 = arith.constant 0 : index
    %c0_123 = arith.constant 0 : index
    %192 = vector.load %arg4[%c1_120, %c2_121, %c0_122, %c0_123] : memref<2x5x84x80xf32, #tpu.memory_space<vmem>>, vector<1x1x84x80xf32>
    %193 = vector.shape_cast %192 : vector<1x1x84x80xf32> to vector<84x80xf32>
    %cst_124 = arith.constant dense<0.000000e+00> : vector<5x80xf32>
    %194 = tpu.matmul %141, %193, %cst_124 {dimension_numbers = #tpu.dot_dimension_numbers<[1], [0], [0], [1], [0, 0, 1, 1], [], []>} : vector<5x84xf32>, vector<84x80xf32>, vector<5x80xf32> -> vector<5x80xf32>
    %195 = arith.addf %183, %194 : vector<5x80xf32>
    %cst_125 = arith.constant dense<0.000000e+00> : vector<5x80xf32>
    %196 = tpu.matmul %149, %193, %cst_125 {dimension_numbers = #tpu.dot_dimension_numbers<[1], [0], [0], [1], [0, 0, 1, 1], [], []>} : vector<5x84xf32>, vector<84x80xf32>, vector<5x80xf32> -> vector<5x80xf32>
    %197 = arith.addf %185, %196 : vector<5x80xf32>
    %c0_126 = arith.constant 0 : index
    %c3_127 = arith.constant 3 : index
    %c0_128 = arith.constant 0 : index
    %c0_129 = arith.constant 0 : index
    %198 = vector.load %arg4[%c0_126, %c3_127, %c0_128, %c0_129] : memref<2x5x84x80xf32, #tpu.memory_space<vmem>>, vector<1x1x84x80xf32>
    %199 = vector.shape_cast %198 : vector<1x1x84x80xf32> to vector<84x80xf32>
    %cst_130 = arith.constant dense<0.000000e+00> : vector<5x80xf32>
    %200 = tpu.matmul %149, %199, %cst_130 {dimension_numbers = #tpu.dot_dimension_numbers<[1], [0], [0], [1], [0, 0, 1, 1], [], []>} : vector<5x84xf32>, vector<84x80xf32>, vector<5x80xf32> -> vector<5x80xf32>
    %201 = arith.addf %189, %200 : vector<5x80xf32>
    %cst_131 = arith.constant dense<0.000000e+00> : vector<5x80xf32>
    %202 = tpu.matmul %157, %199, %cst_131 {dimension_numbers = #tpu.dot_dimension_numbers<[1], [0], [0], [1], [0, 0, 1, 1], [], []>} : vector<5x84xf32>, vector<84x80xf32>, vector<5x80xf32> -> vector<5x80xf32>
    %203 = arith.addf %191, %202 : vector<5x80xf32>
    %c1_132 = arith.constant 1 : index
    %c3_133 = arith.constant 3 : index
    %c0_134 = arith.constant 0 : index
    %c0_135 = arith.constant 0 : index
    %204 = vector.load %arg4[%c1_132, %c3_133, %c0_134, %c0_135] : memref<2x5x84x80xf32, #tpu.memory_space<vmem>>, vector<1x1x84x80xf32>
    %205 = vector.shape_cast %204 : vector<1x1x84x80xf32> to vector<84x80xf32>
    %cst_136 = arith.constant dense<0.000000e+00> : vector<5x80xf32>
    %206 = tpu.matmul %149, %205, %cst_136 {dimension_numbers = #tpu.dot_dimension_numbers<[1], [0], [0], [1], [0, 0, 1, 1], [], []>} : vector<5x84xf32>, vector<84x80xf32>, vector<5x80xf32> -> vector<5x80xf32>
    %207 = arith.addf %195, %206 : vector<5x80xf32>
    %cst_137 = arith.constant dense<0.000000e+00> : vector<5x80xf32>
    %208 = tpu.matmul %157, %205, %cst_137 {dimension_numbers = #tpu.dot_dimension_numbers<[1], [0], [0], [1], [0, 0, 1, 1], [], []>} : vector<5x84xf32>, vector<84x80xf32>, vector<5x80xf32> -> vector<5x80xf32>
    %209 = arith.addf %197, %208 : vector<5x80xf32>
    %c0_138 = arith.constant 0 : index
    %c4_139 = arith.constant 4 : index
    %c0_140 = arith.constant 0 : index
    %c0_141 = arith.constant 0 : index
    %210 = vector.load %arg4[%c0_138, %c4_139, %c0_140, %c0_141] : memref<2x5x84x80xf32, #tpu.memory_space<vmem>>, vector<1x1x84x80xf32>
    %211 = vector.shape_cast %210 : vector<1x1x84x80xf32> to vector<84x80xf32>
    %cst_142 = arith.constant dense<0.000000e+00> : vector<5x80xf32>
    %212 = tpu.matmul %157, %211, %cst_142 {dimension_numbers = #tpu.dot_dimension_numbers<[1], [0], [0], [1], [0, 0, 1, 1], [], []>} : vector<5x84xf32>, vector<84x80xf32>, vector<5x80xf32> -> vector<5x80xf32>
    %213 = arith.addf %201, %212 : vector<5x80xf32>
    %cst_143 = arith.constant dense<0.000000e+00> : vector<5x80xf32>
    %214 = tpu.matmul %165, %211, %cst_143 {dimension_numbers = #tpu.dot_dimension_numbers<[1], [0], [0], [1], [0, 0, 1, 1], [], []>} : vector<5x84xf32>, vector<84x80xf32>, vector<5x80xf32> -> vector<5x80xf32>
    %215 = arith.addf %203, %214 : vector<5x80xf32>
    %c1_144 = arith.constant 1 : index
    %c4_145 = arith.constant 4 : index
    %c0_146 = arith.constant 0 : index
    %c0_147 = arith.constant 0 : index
    %216 = vector.load %arg4[%c1_144, %c4_145, %c0_146, %c0_147] : memref<2x5x84x80xf32, #tpu.memory_space<vmem>>, vector<1x1x84x80xf32>
    %217 = vector.shape_cast %216 : vector<1x1x84x80xf32> to vector<84x80xf32>
    %cst_148 = arith.constant dense<0.000000e+00> : vector<5x80xf32>
    %218 = tpu.matmul %157, %217, %cst_148 {dimension_numbers = #tpu.dot_dimension_numbers<[1], [0], [0], [1], [0, 0, 1, 1], [], []>} : vector<5x84xf32>, vector<84x80xf32>, vector<5x80xf32> -> vector<5x80xf32>
    %219 = arith.addf %207, %218 : vector<5x80xf32>
    %cst_149 = arith.constant dense<0.000000e+00> : vector<5x80xf32>
    %220 = tpu.matmul %165, %217, %cst_149 {dimension_numbers = #tpu.dot_dimension_numbers<[1], [0], [0], [1], [0, 0, 1, 1], [], []>} : vector<5x84xf32>, vector<84x80xf32>, vector<5x80xf32> -> vector<5x80xf32>
    %221 = arith.addf %209, %220 : vector<5x80xf32>
    %222 = arith.maximumf %213, %219 : vector<5x80xf32>
    %223 = arith.maximumf %215, %221 : vector<5x80xf32>
    %224 = arith.maximumf %222, %223 : vector<5x80xf32>
    %c0_150 = arith.constant 0 : index
    %c0_151 = arith.constant 0 : index
    %225 = vector.load %arg5[%c0_150, %c0_151] : memref<1x80xf32, #tpu.memory_space<vmem>>, vector<1x80xf32>
    %226 = vector.broadcast %225 : vector<1x80xf32> to vector<5x80xf32>
    %227 = arith.addf %224, %226 : vector<5x80xf32>
    %cst_152 = arith.constant 0.000000e+00 : f32
    %228 = vector.broadcast %cst_152 : f32 to vector<5x80xf32>
    %229 = arith.maximumf %227, %228 : vector<5x80xf32>
    %230 = vector.extract_strided_slice %229 {offsets = [0, 0], sizes = [1, 80], strides = [1, 1]} : vector<5x80xf32> to vector<1x80xf32>
    %c0_153 = arith.constant 0 : index
    %c0_154 = arith.constant 0 : index
    %c0_155 = arith.constant 0 : index
    %231 = vector.load %arg6[%c0_153, %c0_154, %c0_155] : memref<5x80x120xf32, #tpu.memory_space<vmem>>, vector<1x80x120xf32>
    %232 = vector.shape_cast %231 : vector<1x80x120xf32> to vector<80x120xf32>
    %cst_156 = arith.constant dense<0.000000e+00> : vector<1x120xf32>
    %233 = tpu.matmul %230, %232, %cst_156 {dimension_numbers = #tpu.dot_dimension_numbers<[1], [0], [0], [1], [0, 0, 1, 1], [], []>} : vector<1x80xf32>, vector<80x120xf32>, vector<1x120xf32> -> vector<1x120xf32>
    %234 = vector.extract_strided_slice %229 {offsets = [1, 0], sizes = [1, 80], strides = [1, 1]} : vector<5x80xf32> to vector<1x80xf32>
    %c1_157 = arith.constant 1 : index
    %c0_158 = arith.constant 0 : index
    %c0_159 = arith.constant 0 : index
    %235 = vector.load %arg6[%c1_157, %c0_158, %c0_159] : memref<5x80x120xf32, #tpu.memory_space<vmem>>, vector<1x80x120xf32>
    %236 = vector.shape_cast %235 : vector<1x80x120xf32> to vector<80x120xf32>
    %cst_160 = arith.constant dense<0.000000e+00> : vector<1x120xf32>
    %237 = tpu.matmul %234, %236, %cst_160 {dimension_numbers = #tpu.dot_dimension_numbers<[1], [0], [0], [1], [0, 0, 1, 1], [], []>} : vector<1x80xf32>, vector<80x120xf32>, vector<1x120xf32> -> vector<1x120xf32>
    %238 = arith.addf %233, %237 : vector<1x120xf32>
    %239 = vector.extract_strided_slice %229 {offsets = [2, 0], sizes = [1, 80], strides = [1, 1]} : vector<5x80xf32> to vector<1x80xf32>
    %c2_161 = arith.constant 2 : index
    %c0_162 = arith.constant 0 : index
    %c0_163 = arith.constant 0 : index
    %240 = vector.load %arg6[%c2_161, %c0_162, %c0_163] : memref<5x80x120xf32, #tpu.memory_space<vmem>>, vector<1x80x120xf32>
    %241 = vector.shape_cast %240 : vector<1x80x120xf32> to vector<80x120xf32>
    %cst_164 = arith.constant dense<0.000000e+00> : vector<1x120xf32>
    %242 = tpu.matmul %239, %241, %cst_164 {dimension_numbers = #tpu.dot_dimension_numbers<[1], [0], [0], [1], [0, 0, 1, 1], [], []>} : vector<1x80xf32>, vector<80x120xf32>, vector<1x120xf32> -> vector<1x120xf32>
    %243 = arith.addf %238, %242 : vector<1x120xf32>
    %244 = vector.extract_strided_slice %229 {offsets = [3, 0], sizes = [1, 80], strides = [1, 1]} : vector<5x80xf32> to vector<1x80xf32>
    %c3_165 = arith.constant 3 : index
    %c0_166 = arith.constant 0 : index
    %c0_167 = arith.constant 0 : index
    %245 = vector.load %arg6[%c3_165, %c0_166, %c0_167] : memref<5x80x120xf32, #tpu.memory_space<vmem>>, vector<1x80x120xf32>
    %246 = vector.shape_cast %245 : vector<1x80x120xf32> to vector<80x120xf32>
    %cst_168 = arith.constant dense<0.000000e+00> : vector<1x120xf32>
    %247 = tpu.matmul %244, %246, %cst_168 {dimension_numbers = #tpu.dot_dimension_numbers<[1], [0], [0], [1], [0, 0, 1, 1], [], []>} : vector<1x80xf32>, vector<80x120xf32>, vector<1x120xf32> -> vector<1x120xf32>
    %248 = arith.addf %243, %247 : vector<1x120xf32>
    %249 = vector.extract_strided_slice %229 {offsets = [4, 0], sizes = [1, 80], strides = [1, 1]} : vector<5x80xf32> to vector<1x80xf32>
    %c4_169 = arith.constant 4 : index
    %c0_170 = arith.constant 0 : index
    %c0_171 = arith.constant 0 : index
    %250 = vector.load %arg6[%c4_169, %c0_170, %c0_171] : memref<5x80x120xf32, #tpu.memory_space<vmem>>, vector<1x80x120xf32>
    %251 = vector.shape_cast %250 : vector<1x80x120xf32> to vector<80x120xf32>
    %cst_172 = arith.constant dense<0.000000e+00> : vector<1x120xf32>
    %252 = tpu.matmul %249, %251, %cst_172 {dimension_numbers = #tpu.dot_dimension_numbers<[1], [0], [0], [1], [0, 0, 1, 1], [], []>} : vector<1x80xf32>, vector<80x120xf32>, vector<1x120xf32> -> vector<1x120xf32>
    %253 = arith.addf %248, %252 : vector<1x120xf32>
    %c0_173 = arith.constant 0 : index
    %c0_174 = arith.constant 0 : index
    %254 = vector.load %arg7[%c0_173, %c0_174] : memref<1x120xf32, #tpu.memory_space<vmem>>, vector<1x120xf32>
    %255 = arith.addf %253, %254 : vector<1x120xf32>
    %cst_175 = arith.constant 0.000000e+00 : f32
    %256 = vector.broadcast %cst_175 : f32 to vector<1x120xf32>
    %257 = arith.maximumf %255, %256 : vector<1x120xf32>
    %c0_176 = arith.constant 0 : index
    %c0_177 = arith.constant 0 : index
    %258 = vector.load %arg8[%c0_176, %c0_177] : memref<120x84xf32, #tpu.memory_space<vmem>>, vector<120x84xf32>
    %cst_178 = arith.constant dense<0.000000e+00> : vector<1x84xf32>
    %259 = tpu.matmul %257, %258, %cst_178 {dimension_numbers = #tpu.dot_dimension_numbers<[1], [0], [0], [1], [0, 0, 1, 1], [], []>} : vector<1x120xf32>, vector<120x84xf32>, vector<1x84xf32> -> vector<1x84xf32>
    %c0_179 = arith.constant 0 : index
    %c0_180 = arith.constant 0 : index
    %260 = vector.load %arg9[%c0_179, %c0_180] : memref<1x84xf32, #tpu.memory_space<vmem>>, vector<1x84xf32>
    %261 = arith.addf %259, %260 : vector<1x84xf32>
    %cst_181 = arith.constant 0.000000e+00 : f32
    %262 = vector.broadcast %cst_181 : f32 to vector<1x84xf32>
    %263 = arith.maximumf %261, %262 : vector<1x84xf32>
    %c0_182 = arith.constant 0 : index
    %c0_183 = arith.constant 0 : index
    %264 = vector.load %arg10[%c0_182, %c0_183] : memref<84x128xf32, #tpu.memory_space<vmem>>, vector<84x128xf32>
    %cst_184 = arith.constant dense<0.000000e+00> : vector<1x128xf32>
    %265 = tpu.matmul %263, %264, %cst_184 {dimension_numbers = #tpu.dot_dimension_numbers<[1], [0], [0], [1], [0, 0, 1, 1], [], []>} : vector<1x84xf32>, vector<84x128xf32>, vector<1x128xf32> -> vector<1x128xf32>
    %c0_185 = arith.constant 0 : index
    %c0_186 = arith.constant 0 : index
    %266 = vector.load %arg11[%c0_185, %c0_186] : memref<1x128xf32, #tpu.memory_space<vmem>>, vector<1x128xf32>
    %267 = arith.addf %265, %266 : vector<1x128xf32>
    %c0_187 = arith.constant 0 : index
    %c0_188 = arith.constant 0 : index
    %c0_189 = arith.constant 0 : index
    %268 = vector.load %arg12[%c0_187, %c0_188, %c0_189] : memref<1x1x128xf32, #tpu.memory_space<vmem>>, vector<1x1x128xf32>
    %269 = vector.shape_cast %268 : vector<1x1x128xf32> to vector<1x128xf32>
    %270 = vector.shape_cast %267 : vector<1x128xf32> to vector<1x1x128xf32>
    tpu.vector_store %arg12[%c0_187, %c0_188, %c0_189], %270 {strides = array<i32>} : memref<1x1x128xf32, #tpu.memory_space<vmem>>, vector<1x1x128xf32>,
    return
  }
  func.func @transform_0(%arg0: i32) -> (i32, i32, i32) {
    %c0_i32 = arith.constant 0 : i32
    %c0_i32_0 = arith.constant 0 : i32
    %c0_i32_1 = arith.constant 0 : i32
    return %arg0, %c0_i32, %c0_i32_0 : i32, i32, i32
  }
  func.func @transform_1(%arg0: i32) -> (i32, i32, i32, i32) {
    %c0_i32 = arith.constant 0 : i32
    %c0_i32_0 = arith.constant 0 : i32
    %c0_i32_1 = arith.constant 0 : i32
    %c0_i32_2 = arith.constant 0 : i32
    %c0_i32_3 = arith.constant 0 : i32
    return %c0_i32, %c0_i32_0, %c0_i32_1, %c0_i32_2 : i32, i32, i32, i32
  }
  func.func @transform_2(%arg0: i32) -> (i32, i32) {
    %c0_i32 = arith.constant 0 : i32
    %c0_i32_0 = arith.constant 0 : i32
    %c0_i32_1 = arith.constant 0 : i32
    return %c0_i32, %c0_i32_0 : i32, i32
  }
  func.func @transform_3(%arg0: i32) -> (i32, i32, i32, i32) {
    %c0_i32 = arith.constant 0 : i32
    %c0_i32_0 = arith.constant 0 : i32
    %c0_i32_1 = arith.constant 0 : i32
    %c0_i32_2 = arith.constant 0 : i32
    %c0_i32_3 = arith.constant 0 : i32
    return %c0_i32, %c0_i32_0, %c0_i32_1, %c0_i32_2 : i32, i32, i32, i32
  }
  func.func @transform_4(%arg0: i32) -> (i32, i32) {
    %c0_i32 = arith.constant 0 : i32
    %c0_i32_0 = arith.constant 0 : i32
    %c0_i32_1 = arith.constant 0 : i32
    return %c0_i32, %c0_i32_0 : i32, i32
  }
  func.func @transform_5(%arg0: i32) -> (i32, i32, i32) {
    %c0_i32 = arith.constant 0 : i32
    %c0_i32_0 = arith.constant 0 : i32
    %c0_i32_1 = arith.constant 0 : i32
    %c0_i32_2 = arith.constant 0 : i32
    return %c0_i32, %c0_i32_0, %c0_i32_1 : i32, i32, i32
  }
  func.func @transform_6(%arg0: i32) -> (i32, i32) {
    %c0_i32 = arith.constant 0 : i32
    %c0_i32_0 = arith.constant 0 : i32
    %c0_i32_1 = arith.constant 0 : i32
    return %c0_i32, %c0_i32_0 : i32, i32
  }
  func.func @transform_7(%arg0: i32) -> (i32, i32) {
    %c0_i32 = arith.constant 0 : i32
    %c0_i32_0 = arith.constant 0 : i32
    %c0_i32_1 = arith.constant 0 : i32
    return %c0_i32, %c0_i32_0 : i32, i32
  }
  func.func @transform_8(%arg0: i32) -> (i32, i32) {
    %c0_i32 = arith.constant 0 : i32
    %c0_i32_0 = arith.constant 0 : i32
    %c0_i32_1 = arith.constant 0 : i32
    return %c0_i32, %c0_i32_0 : i32, i32
  }
  func.func @transform_9(%arg0: i32) -> (i32, i32) {
    %c0_i32 = arith.constant 0 : i32
    %c0_i32_0 = arith.constant 0 : i32
    %c0_i32_1 = arith.constant 0 : i32
    return %c0_i32, %c0_i32_0 : i32, i32
  }
  func.func @transform_10(%arg0: i32) -> (i32, i32) {
    %c0_i32 = arith.constant 0 : i32
    %c0_i32_0 = arith.constant 0 : i32
    %c0_i32_1 = arith.constant 0 : i32
    return %c0_i32, %c0_i32_0 : i32, i32
  }
  func.func @transform_11(%arg0: i32) -> (i32, i32, i32) {
    %c0_i32 = arith.constant 0 : i32
    %c0_i32_0 = arith.constant 0 : i32
    %c0_i32_1 = arith.constant 0 : i32
    return %arg0, %c0_i32, %c0_i32_0 : i32, i32, i32
  }
}

</mosaic_0001>

<bundles_post_ra>
// kernel: tile.13
= control target key start
LH: loop header
LB: loop body
LE: loop exit
PB: predicated region body
PF: predicated region fallthrough
CT: control target
= control target key end

     0   :  { %s28_s0 = inlined_call_operand.vmem [shape: f32[6], index: 0, kind: input, shape index: {}]   ;;  %s29_s1 = inlined_call_operand.vmem [shape: f32[14,6], index: 1, kind: output, shape index: {}]  }
   0x1   :  { %v4_v0 = vld [vmem:[%s28_s0] ss:$0 sm:$0xff] }
   0x2   :  { %5 = vst [vmem:[%s29_s1] sm:$0xff] %v4_v0  ;;  %8 = vst [vmem:[%s29_s1 + $0x8] sm:$0xff] %v4_v0 }

// kernel: tile.14
= control target key start
LH: loop header
LB: loop body
LE: loop exit
PB: predicated region body
PF: predicated region fallthrough
CT: control target
= control target key end

     0   :  { %s117_s10 = smov 78   ;;  %s118_s11 = smov 66   ;;  %vm3_vm0 = vcmask 48128   ;;  %vm9_vm1 = vcmask 687728   ;;  %vm15_vm2 = vcmask 638528   ;;  %vm21_vm3 = vcmask 589328   ;;  %s185_s0 = inlined_call_operand.vmem [shape: f32[14,6], index: 0, kind: input, shape index: {}]   ;;  %s186_s1 = inlined_call_operand.vmem [shape: f32[1,84], index: 1, kind: output, shape index: {}]  }
   0x1   :  { %v91_v0 = vld [vmem:[%s185_s0 + $0xd] sm:$0x1]   ;;  %v93_v1 = vld [vmem:[%s185_s0 + $0xb] sm:$0x1]   ;;  %v92_v2 = vld [vmem:[%s185_s0 + $0xc] sm:$0x1]  }
   0x2   :  { %7 = vrot.lane.b32.xlu0 %v91_v0, %s117_s10  ;;  %19 = vrot.lane.b32.xlu1 %v93_v1, %s118_s11  ;;  %v94_v3 = vld [vmem:[%s185_s0 + $0xa] sm:$0x1]   ;;  %s119_s16 = smov 72   ;;  %s120_s17 = smov 60   ;;  %v95_v4 = vld [vmem:[%s185_s0 + $0x9] sm:$0x1]  }
   0x3   :  { %v96_v5 = vld [vmem:[%s185_s0 + $0x8] sm:$0x1]   ;;  %v2_v6 = vld [vmem:[%s185_s0] sm:$0x1]   ;;  %s121_s24 = smov 54   ;;  %s122_s25 = smov 48  }
   0x4   :  { %4 = vst.msk [vmem:[#allocation0] sm:$0x1] %vm3_vm0, %v2_v6   ;;  %v97_v7 = vld [vmem:[%s185_s0 + $0x7] sm:$0x1]   ;;  %v98_v8 = vld [vmem:[%s185_s0 + $0x6] sm:$0x1]  }
   0x5   :  { %s123_s30 = smov 42   ;;  %s124_s2 = smov 36   ;;  %v99_v9 = vld [vmem:[%s185_s0 + $0x5] sm:$0x1]   ;;  %v100_v10 = vld [vmem:[%s185_s0 + $0x4] sm:$0x1]  }
   0x6   :  { %13 = vrot.lane.b32.xlu0 %v92_v2, %s119_s16  ;;  %25 = vrot.lane.b32.xlu1 %v94_v3, %s120_s17  ;;  %s125_s7 = smov 30   ;;  %s126_s8 = smov 24   ;;  %v101_v11 = vld [vmem:[%s185_s0 + $0x3] sm:$0x1]   ;;  %v102_v12 = vld [vmem:[%s185_s0 + $0x2] sm:$0x1]  }
   0x7   :  { %s127_s13 = smov 18   ;;  %s128_s14 = smov 12   ;;  %v103_v13 = vld [vmem:[%s185_s0 + $0x1] sm:$0x1]   ;;  %vm27_vm4 = vcmask 540128   ;;  %vm33_vm5 = vcmask 490928  }
   0x8   :  { %s129_s0 = smov 6   ;;  %vm39_vm6 = vcmask 441728   ;;  %vm45_vm7 = vcmask 392528   ;;  %vm51_vm8 = vcmask 343328   ;;  %vm57_vm9 = vcmask 294128  }
   0x9   :  { %vm63_vm10 = vcmask 244928   ;;  %vm69_vm11 = vcmask 195728   ;;  %vm75_vm12 = vcmask 146528   ;;  %vm81_vm13 = vcmask 97328  }
   0xa   :  { %31 = vrot.lane.b32.xlu0 %v95_v4, %s121_s24  ;;  %37 = vrot.lane.b32.xlu1 %v96_v5, %s122_s25 }
   0xe   :  { %43 = vrot.lane.b32.xlu0 %v97_v7, %s123_s30  ;;  %49 = vrot.lane.b32.xlu1 %v98_v8, %s124_s2 }
  0x12   :  { %55 = vrot.lane.b32.xlu0 %v99_v9, %s125_s7  ;;  %61 = vrot.lane.b32.xlu1 %v100_v10, %s126_s8 }
  0x16   :  { %67 = vrot.lane.b32.xlu0 %v101_v11, %s127_s13  ;;  %73 = vrot.lane.b32.xlu1 %v102_v12, %s128_s14 }
  0x1a   :  { %79 = vrot.lane.b32.xlu0 %v103_v13, %s129_s0 }
  0x74   :  { %v8_v14 = vpop.permute.xlu0 %7   ;;  %v20_v15 = vpop.permute.xlu1 %19  }
  0x75   :  { %10 = vst.msk [vmem:[#allocation0] sm:$0x1] %vm9_vm1, %v8_v14  }
  0x78   :  { %v14_v16 = vpop.permute.xlu0 %13   ;;  %v26_v17 = vpop.permute.xlu1 %25  }
  0x79   :  { %16 = vst.msk [vmem:[#allocation0] sm:$0x1] %vm15_vm2, %v14_v16  }
  0x7a   :  { %22 = vst.msk [vmem:[#allocation0] sm:$0x1] %vm21_vm3, %v20_v15  }
  0x7b   :  { %28 = vst.msk [vmem:[#allocation0] sm:$0x1] %vm27_vm4, %v26_v17  }
  0x7c   :  { %v32_v18 = vpop.permute.xlu0 %31   ;;  %v38_v19 = vpop.permute.xlu1 %37  }
  0x7d   :  { %34 = vst.msk [vmem:[#allocation0] sm:$0x1] %vm33_vm5, %v32_v18  }
  0x7e   :  { %40 = vst.msk [vmem:[#allocation0] sm:$0x1] %vm39_vm6, %v38_v19  }
  0x80   :  { %v44_v20 = vpop.permute.xlu0 %43   ;;  %v50_v21 = vpop.permute.xlu1 %49  }
  0x81   :  { %46 = vst.msk [vmem:[#allocation0] sm:$0x1] %vm45_vm7, %v44_v20  }
  0x82   :  { %52 = vst.msk [vmem:[#allocation0] sm:$0x1] %vm51_vm8, %v50_v21  }
  0x84   :  { %v56_v22 = vpop.permute.xlu0 %55   ;;  %v62_v23 = vpop.permute.xlu1 %61  }
  0x85   :  { %58 = vst.msk [vmem:[#allocation0] sm:$0x1] %vm57_vm9, %v56_v22  }
  0x86   :  { %64 = vst.msk [vmem:[#allocation0] sm:$0x1] %vm63_vm10, %v62_v23  }
  0x88   :  { %v68_v24 = vpop.permute.xlu0 %67   ;;  %v74_v25 = vpop.permute.xlu1 %73  }
  0x89   :  { %70 = vst.msk [vmem:[#allocation0] sm:$0x1] %vm69_vm11, %v68_v24  }
  0x8a   :  { %76 = vst.msk [vmem:[#allocation0] sm:$0x1] %vm75_vm12, %v74_v25  }
  0x8c   :  { %v80_v26 = vpop.permute.xlu0 %79  }
  0x8d   :  { %82 = vst.msk [vmem:[#allocation0] sm:$0x1] %vm81_vm13, %v80_v26  }
  0x94   :  { %v87_v27 = vld [vmem:[#allocation0] sm:$0x1] }
  0x95   :  { %90 = vst [vmem:[%s186_s1] sm:$0x1] %v87_v27 }

// kernel: tile.18
= control target key start
LH: loop header
LB: loop body
LE: loop exit
PB: predicated region body
PF: predicated region fallthrough
CT: control target
= control target key end

     0   :  { %s22_s0 = inlined_call_operand.vmem [shape: f32[16], index: 0, kind: input, shape index: {}]   ;;  %s23_s1 = inlined_call_operand.vmem [shape: f32[5,16], index: 1, kind: output, shape index: {}]  }
   0x1   :  { %v4_v0 = vld [vmem:[%s22_s0] ss:$0 sm:$0xff] }
   0x2   :  { %5 = vst [vmem:[%s23_s1] sm:$0xff] %v4_v0 }

// kernel: tile.19
= control target key start
LH: loop header
LB: loop body
LE: loop exit
PB: predicated region body
PF: predicated region fallthrough
CT: control target
= control target key end

     0   :  { %s45_s10 = smov 64   ;;  %s46_s11 = smov 32   ;;  %vm3_vm0 = vcmask 130048   ;;  %vm9_vm1 = vcmask 654848   ;;  %vm15_vm2 = vcmask 523648   ;;  %vm21_vm3 = vcmask 392448   ;;  %s77_s0 = inlined_call_operand.vmem [shape: f32[5,16], index: 0, kind: input, shape index: {}]   ;;  %s78_s1 = inlined_call_operand.vmem [shape: f32[1,80], index: 1, kind: output, shape index: {}]  }
   0x1   :  { %v37_v0 = vld [vmem:[%s77_s0 + $0x4] sm:$0x1]   ;;  %v39_v1 = vld [vmem:[%s77_s0 + $0x2] sm:$0x1]   ;;  %v38_v2 = vld [vmem:[%s77_s0 + $0x3] sm:$0x1]  }
   0x2   :  { %7 = vrot.lane.b32.xlu0 %v37_v0, %s45_s10  ;;  %19 = vrot.lane.b32.xlu1 %v39_v1, %s46_s11  ;;  %v40_v3 = vld [vmem:[%s77_s0 + $0x1] sm:$0x1]   ;;  %v2_v4 = vld [vmem:[%s77_s0] sm:$0x1]   ;;  %s47_s0 = smov 48   ;;  %s48_s18 = smov 16  }
   0x3   :  { %4 = vst.msk [vmem:[#allocation0] sm:$0x1] %vm3_vm0, %v2_v4   ;;  %vm27_vm4 = vcmask 261248  }
   0x6   :  { %13 = vrot.lane.b32.xlu0 %v38_v2, %s47_s0  ;;  %25 = vrot.lane.b32.xlu1 %v40_v3, %s48_s18 }
  0x74   :  { %v8_v5 = vpop.permute.xlu0 %7   ;;  %v20_v6 = vpop.permute.xlu1 %19  }
  0x75   :  { %10 = vst.msk [vmem:[#allocation0] sm:$0x1] %vm9_vm1, %v8_v5  }
  0x78   :  { %v14_v7 = vpop.permute.xlu0 %13   ;;  %v26_v8 = vpop.permute.xlu1 %25  }
  0x79   :  { %16 = vst.msk [vmem:[#allocation0] sm:$0x1] %vm15_vm2, %v14_v7  }
  0x7a   :  { %22 = vst.msk [vmem:[#allocation0] sm:$0x1] %vm21_vm3, %v20_v6  }
  0x7b   :  { %28 = vst.msk [vmem:[#allocation0] sm:$0x1] %vm27_vm4, %v26_v8  }
  0x82   :  { %v33_v9 = vld [vmem:[#allocation0] sm:$0x1] }
  0x83   :  { %36 = vst [vmem:[%s78_s1] sm:$0x1] %v33_v9 }

// kernel: the_model_forward.1
= control target key start
LH: loop header
LB: loop body
LE: loop exit
PB: predicated region body
PF: predicated region fallthrough
CT: control target
= control target key end

     0   :  { %s10005_s0 = inlined_call_operand.vmem [shape: f32[2,32,96], index: 0, kind: input, shape index: {}]   ;;  %s10006_s1 = inlined_call_operand.vmem [shape: f32[2,5,96,84], index: 1, kind: input, shape index: {}]   ;;  %s10007_s2 = inlined_call_operand.vmem [shape: f32[1,84], index: 2, kind: input, shape index: {}]   ;;  %s10008_s3 = inlined_call_operand.vmem [shape: f32[2,5,84,80], index: 3, kind: input, shape index: {}]   ;;  %s10009_s4 = inlined_call_operand.vmem [shape: f32[1,80], index: 4, kind: input, shape index: {}]   ;;  %s10010_s5 = inlined_call_operand.vmem [shape: f32[5,80,120], index: 5, kind: input, shape index: {}]   ;;  %s10011_s6 = inlined_call_operand.vmem [shape: f32[1,120], index: 6, kind: input, shape index: {}]   ;;  %s10012_s7 = inlined_call_operand.vmem [shape: f32[120,84], index: 7, kind: input, shape index: {}]   ;;  %s10013_s8 = inlined_call_operand.vmem [shape: f32[1,84], index: 8, kind: input, shape index: {}]   ;;  %s10014_s9 = inlined_call_operand.vmem [shape: f32[84,128], index: 9, kind: input, shape index: {}]   ;;  %s10015_s10 = inlined_call_operand.vmem [shape: f32[1,128], index: 10, kind: input, shape index: {}]   ;;  %s10016_s11 = inlined_call_operand.hbm [shape: f32[2,1,128], index: 11, kind: output, shape index: {}]  }
   0x1   :  { %10017 = sst [smem:[#allocation5_spill]] %s10005_s0 }
   0x2   :  { %16 = vsyncpa [#allocation3], 0 }
   0x3   :  { %18 = vsyncpa [#allocation3 + $0x1], 0  ;;  %s7866_s17 = smov 0   ;;  %s7868_s18 = smov 0  }
   0x4   :  { %s7870_s19 = smov 0   ;;  %s7872_s20 = smov 0  }
   0x5 LB: > { %s7887_s21 = sadd.s32 4294967295, %s7801_s20   ;;  %s5339_s22 = sadd.s32 4294967294, %s7801_s20   ;;  %s7801_s20 = sphi %s7872_s20, %s10024_s20   ;;  %s7797_s19 = sphi %s7870_s19, %s10023_s19   ;;  %s7793_s18 = sphi %s7868_s18, %s10022_s18   ;;  %s7789_s17 = sphi %s7866_s17, %s10021_s17  }
   0x6   : > { %s7891_s23 = sadd.s32 1, %s7801_s20   ;;  %s267_s24 = sadd.s32 1, %s7797_s19 }
   0x7   : > { %s264_s25 = ssub.s32 %s7801_s20, %s7891_s23  ;;  %p277_p0 = scmp.ne.s32.totalorder %s7797_s19, %s7793_s18 }
   0x8   : > { %p265_p1 = scmp.eq.s32.totalorder %s264_s25, 0  ;;  %p278_p2 = scmp.eq.s32.totalorder %s7887_s21, 1 }
   0x9   : > { %p283_p3 = scmp.ne.s32.totalorder %s7793_s18, %s7789_s17  ;;  %p284_p4 = scmp.eq.s32.totalorder %s5339_s22, 1 }
   0xa   : > { %s7902_s26 = scalar_select %p265_p1, %s7797_s19, %s267_s24  }
   0xb   : > { %p7904_p5 = por %p278_p2, %p277_p0  ;;  %p7908_p6 = por %p284_p4, %p283_p3 }
   0xc   : > { %p5342_p7 = scmp.ge.s32.totalorder %s7801_s20, 1  ;;  %p340_p8 = scmp.lt.s32.totalorder %s7801_s20, 3 }
   0xe   : > { %p341_p9 = pnand %p5342_p7, %p340_p8 }
   0xf   : > { %p379_p10 = scmp.lt.s32.totalorder (!%p341_p9), %s7887_s21, 1  ;;  %s10020_s0 = sld [smem:[#allocation5_spill]] (!%p341_p9) }
  0x10   : > { %344 = sbr.rel (%p341_p9) target bundleno = 1934 (0x78e), region = 64  ;;  %s377_s15 = sand.u32 (!%p341_p9), 1, %s7793_s18  }
  0x11   : > { %s5718_s24 = sshll.u32 (!%p341_p9), %s7887_s21, 4  ;;  %s378_s25 = scalar_lea.vmem (!%p341_p9), [#allocation2], %s377_s15 }
  0x12   : > { %s9970_s13 = scalar_lea.hbm (!%p341_p9), %s10016_s11, %s5718_s24  ;;  %s7805_s16 = smov (!%p341_p9), [#allocation2]  }
  0x15   : > { %v388_v0 = vlaneseq  ;;  %s380_s29 = scalar_select %p379_p10, %s7887_s21, 1  ;;  %vm401_vm0 = vcmask 261120   ;;  %v7803_v9 = vmov 0.0   ;;  %v8035_v32 = vld [vmem:[%s10006_s1 + $0xb8] sm:$0xff]  ;;  %v8045_v33 = vld [vmem:[%s10006_s1 + $0xb0] sm:$0xff]  ;;  %v8055_v34 = vld [vmem:[%s10006_s1 + $0xa8] sm:$0xff] }
  0x16   : > { %v8064_v35 = vld [vmem:[%s10006_s1 + $0xa0] sm:$0xff]  ;;  %v8070_v36 = vld [vmem:[%s10006_s1 + $0x58] sm:$0xff]  ;;  %v8080_v38 = vld [vmem:[%s10006_s1 + $0x50] sm:$0xff]  ;;  %vm966_vm13 = vcmask 785408   ;;  %vm7804_vm14 = vmmov 0   ;;  %vm2638_vm15 = vcmask 1045504  }
  0x17   : > { %v389_v1 = vshrl.u32 %v388_v0, 7  ;;  %v7916_v2 = vand.u32 127, %v388_v0  ;;  %s5721_s30 = sshll.u32 %s380_s29, 5  ;;  %v8086_v39 = vld [vmem:[%s10006_s1 + $0x98] sm:$0xff]  ;;  %v8094_v40 = vld [vmem:[%s10006_s1 + $0x48] sm:$0xff]  ;;  %v8100_v41 = vld [vmem:[%s10006_s1 + $0x90] sm:$0xff] }
  0x18   : > { %s383_s14 = scalar_lea.vmem %s10020_s0, %s5721_s30  ;;  %v8108_v42 = vld [vmem:[%s10006_s1 + $0x40] sm:$0xff]  ;;  %v8114_v43 = vld [vmem:[%s10006_s1 + $0x88] sm:$0xff]  ;;  %v8122_v44 = vld [vmem:[%s10006_s1 + $0x38] sm:$0xff]  ;;  %s5284_s29 = sshll.u32 %s378_s25, 4  ;;  %s5285_s29 = int_to_ptr.vmem [resolvable:$true] %s5284_s29 }
  0x19   : > { %v7918_v3 = vmul.u32 2, %v389_v1  ;;  %v390_v4 = vadd.s32 8, %v389_v1  ;;  %v7923_v5 = vld [vmem:[%s383_s14 + $0x18] sm:$0xff]  ;;  %v7925_v6 = vld [vmem:[%s383_s14 + $0x10] sm:$0xff]  ;;  %v7938_v11 = vld [vmem:[%s383_s14 + $0x8] sm:$0xff]  ;;  %s7741_s0 = scalar_lea.vmem %s5285_s29, 16 }
  0x1a   : > { %6379 = vmatprep.subr.mxu1 %v7923_v5  ;;  %6401 = vmatprep.subr.mxu0 %v7923_v5  ;;  %v7949_v14 = vld [vmem:[%s383_s14] sm:$0xff]  ;;  %v934_v45 = vld [vmem:[%s10006_s1 + $0x30] sm:$0xff]  ;;  %v933_v46 = vld [vmem:[%s10006_s1 + $0x28] sm:$0xff]  ;;  %s5272_s14 = scalar_lea.sflag [#allocation3], %s377_s15  ;;  %p7742_p11 = scmp.ne.s32.totalorder %s5285_s29, %s7741_s0 }
  0x1b   : > { %vm395_vm1 = vcmp.eq.s32.totalorder %v7916_v2, %v7918_v3  ;;  %v7929_v7 = vmul.u32 2, %v390_v4  ;;  %v483_v8 = vadd.s32 1, %v7918_v3  ;;  %6380 = vmatpush3.msra.mxu1 %v7923_v5  ;;  %v572_v12 = vadd.s32 2, %v7918_v3  ;;  %6402 = vmatpush3.msra.mxu0 %v7923_v5  ;;  %v8140_v47 = vld [vmem:[%s10006_s1 + $0x20] sm:$0xff]  ;;  %v8145_v48 = vld [vmem:[%s10006_s1 + $0x18] sm:$0xff]  ;;  %v8152_v49 = vld [vmem:[%s10006_s1 + $0x10] sm:$0xff] }
  0x1c   : > { %v7934_v10 = vsel %vm395_vm1, 1.0, %v7803_v9  ;;  %6381 = vmatprep.subr.mxu1 %v7925_v6  ;;  %6403 = vmatprep.subr.mxu0 %v7925_v6  ;;  %v661_v18 = vadd.s32 3, %v7918_v3  ;;  %v750_v22 = vadd.s32 4, %v7918_v3  ;;  %v839_v26 = vadd.s32 5, %v7918_v3  ;;  %v8159_v50 = vld [vmem:[%s10006_s1 + $0x8] sm:$0xff]  ;;  %v8168_v51 = vld [vmem:[%s10006_s1 + $0x80] sm:$0xff]  ;;  %p7743_p12 = pnand %p7742_p11, %p7904_p5 }
  0x1d   : > { %6387 = vmatprep.mubr.msk.f32.mxu1 %vm401_vm0, %v7934_v10  ;;  %vm396_vm2 = vcmp.eq.s32.totalorder %v7916_v2, %v7929_v7  ;;  %v573_v13 = vadd.s32 2, %v7929_v7  ;;  %6382 = vmatpush3.msra.mxu1 %v7925_v6  ;;  %vm485_vm3 = vcmp.eq.s32.totalorder %v7916_v2, %v483_v8  ;;  %vm574_vm4 = vcmp.eq.s32.totalorder %v7916_v2, %v572_v12  ;;  %v8173_v52 = vld [vmem:[%s10006_s1] sm:$0xff]  ;;  %v8182_v53 = vld [vmem:[%s10006_s1 + $0x78] sm:$0xff]  ;;  %v8190_v54 = vld [vmem:[%s10006_s1 + $0x70] sm:$0xff]  ;;  %s7745_s21 = sshll.u32 %s7805_s16, 4  ;;  %s7746_s21 = int_to_ptr.vmem [resolvable:$false] %s7745_s21 }
  0x1e   : > { %6383 = vmatprep.subr.mxu1 %v7938_v11  ;;  %6404 = vmatpush3.msra.mxu0 %v7925_v6  ;;  %v5346_v15 = vsel %vm396_vm2, 1.0, %v7803_v9  ;;  %v7961_v16 = vsel %vm485_vm3, 1.0, %v7803_v9  ;;  %v484_v17 = vadd.s32 1, %v7929_v7  ;;  %v7972_v19 = vsel %vm574_vm4, 1.0, %v7803_v9  ;;  %v8197_v55 = vld [vmem:[%s10006_s1 + $0x68] sm:$0xff]  ;;  %v8204_v56 = vld [vmem:[%s10006_s1 + $0x60] sm:$0xff]  ;;  %p7744_p13 = pneg %p7743_p12  ;;  %p7748_p0 = scmp.lt.s32.totalorder %s5285_s29, %s7746_s21 }
  0x1f   : > { %6384 = vmatpush3.msra.mxu1 %v7938_v11  ;;  %6405 = vmatprep.subr.mxu0 %v7938_v11  ;;  %vm575_vm5 = vcmp.eq.s32.totalorder %v7916_v2, %v573_v13  ;;  %vm663_vm7 = vcmp.eq.s32.totalorder %v7916_v2, %v661_v18  ;;  %v662_v24 = vadd.s32 3, %v7929_v7  ;;  %v751_v25 = vadd.s32 4, %v7929_v7  ;;  %v8258_v61 = vld [vmem:[%s10006_s1 + $0x238] sm:$0xff]  ;;  %v8270_v62 = vld [vmem:[%s10006_s1 + $0x230] sm:$0xff]  ;;  %v8281_v0 = vld [vmem:[%s10006_s1 + $0x228] sm:$0xff]  ;;  %s7747_s22 = scalar_lea.vmem %s7746_s21, 32 }
  0x20   : > { %6385 = vmatprep.subr.mxu1 %v7949_v14  ;;  %6406 = vmatpush3.msra.mxu0 %v7938_v11  ;;  %v5354_v20 = vsel %vm575_vm5, 1.0, %v7803_v9  ;;  %vm486_vm6 = vcmp.eq.s32.totalorder %v7916_v2, %v484_v17  ;;  %v7993_v23 = vsel %vm663_vm7, 1.0, %v7803_v9  ;;  %vm752_vm8 = vcmp.eq.s32.totalorder %v7916_v2, %v750_v22  ;;  %v8301_v3 = vld [vmem:[%s10006_s1 + $0x298] sm:$0xff]  ;;  %v8339_v8 = vld [vmem:[%s10006_s1 + $0x208] sm:$0xff]  ;;  %v8353_v12 = vld [vmem:[%s10006_s1 + $0x200] sm:$0xff]  ;;  %p7749_p1 = scmp.lt.s32.totalorder %s7747_s22, %s7741_s0 }
  0x21   : > { %6386 = vmatpush3.msra.mxu1 %v7949_v14  ;;  %6407 = vmatprep.subr.mxu0 %v7949_v14  ;;  %v5350_v21 = vsel %vm486_vm6, 1.0, %v7803_v9  ;;  %vm664_vm9 = vcmp.eq.s32.totalorder %v7916_v2, %v662_v24  ;;  %vm753_vm10 = vcmp.eq.s32.totalorder %v7916_v2, %v751_v25  ;;  %vm841_vm11 = vcmp.eq.s32.totalorder %v7916_v2, %v839_v26  ;;  %v8309_v4 = vld [vmem:[%s10006_s1 + $0x218] sm:$0xff]  ;;  %v8381_v17 = vld [vmem:[%s10006_s1 + $0x1f0] sm:$0xff]  ;;  %v8390_v18 = vld [vmem:[%s10006_s1 + $0x268] sm:$0xff] }
  0x22   : > { %6388 = vmatmul.mubr.msk.f32.vlgmr.msra.gmra.mxu1 %vm401_vm0, %v5346_v15  ;;  %6390 = vmatprep.subr.mxu1 %v7923_v5  ;;  %v8017_v27 = vsel %vm752_vm8, 1.0, %v7803_v9  ;;  %v5358_v28 = vsel %vm664_vm9, 1.0, %v7803_v9  ;;  %v5362_v29 = vsel %vm753_vm10, 1.0, %v7803_v9  ;;  %v8026_v30 = vsel %vm841_vm11, 1.0, %v7803_v9  ;;  %v8362_v13 = vld [vmem:[%s10006_s1 + $0x278] sm:$0xff]  ;;  %v8376_v15 = vld [vmem:[%s10006_s1 + $0x270] sm:$0xff]  ;;  %p7750_p2 = por %p7749_p1, %p7748_p0 }
  0x23   : > { %6391 = vmatpush3.msra.mxu1 %v7923_v5  ;;  %6398 = vmatprep.mubr.msk.f32.mxu1 %vm401_vm0, %v7961_v16  ;;  %v840_v31 = vadd.s32 5, %v7929_v7  ;;  %v8334_v7 = vld [vmem:[%s10006_s1 + $0x288] sm:$0xff]  ;;  %v8409_v22 = vld [vmem:[%s10006_s1 + $0x1e0] sm:$0xff]  ;;  %v8418_v24 = vld [vmem:[%s10006_s1 + $0x258] sm:$0xff]  ;;  %vm3111_vm1 = vcmask 1043456   ;;  %vm3107_vm2 = vcmask 687104  }
  0x24   : > { %6392 = vmatprep.subr.mxu1 %v7925_v6  ;;  %6408 = vmatpush3.msra.mxu0 %v7949_v14  ;;  %v5403_v25 = vld [vmem:[%s10006_s1 + $0x250] sm:$0xff]  ;;  %v5402_v26 = vld [vmem:[%s10006_s1 + $0x248] sm:$0xff]  ;;  %vm4688_vm3 = vcmask 654336   ;;  %vm5107_vm4 = vcmask 982016   ;;  %p7751_p3 = pnand %p7750_p2, %p7744_p13 }
  0x25   : > { %6393 = vmatpush3.msra.mxu1 %v7925_v6  ;;  %6409 = vmatprep.mubr.msk.f32.mxu0 %vm401_vm0, %v7972_v19  ;;  %vm842_vm12 = vcmp.eq.s32.totalorder %v7916_v2, %v840_v31  ;;  %v8292_v2 = vld [vmem:[%s10006_s1 + $0x220] sm:$0xff]  ;;  %v5431_v31 = vld [vmem:[%s10006_s1 + $0x110] sm:$0xff] }
  0x26   : > { %6394 = vmatprep.subr.mxu1 %v7938_v11  ;;  %6410 = vmatmul.mubr.msk.f32.vlgmr.msra.gmra.mxu0 %vm401_vm0, %v5354_v20  ;;  %v5366_v37 = vsel %vm842_vm12, 1.0, %v7803_v9  ;;  %v8395_v20 = vld [vmem:[%s10006_s1 + $0x1e8] sm:$0xff] }
  0x27   : > { %6395 = vmatpush3.msra.mxu1 %v7938_v11  ;;  %6423 = vmatprep.subr.mxu0 %v7923_v5 }
  0x28   : > { %6396 = vmatprep.subr.mxu1 %v7949_v14  ;;  %6424 = vmatpush3.msra.mxu0 %v7923_v5 }
  0x29   : > { %6397 = vmatpush3.msra.mxu1 %v7949_v14  ;;  %6425 = vmatprep.subr.mxu0 %v7925_v6 }
  0x2a   : > { %6399 = vmatmul.mubr.msk.f32.vlgmr.msra.gmra.mxu1 %vm401_vm0, %v5350_v21  ;;  %6412 = vmatprep.subr.mxu1 %v7923_v5  ;;  %v8404_v21 = vld [vmem:[%s10006_s1 + $0x260] sm:$0xff] }
  0x2b   : > { %6413 = vmatpush3.msra.mxu1 %v7923_v5  ;;  %6420 = vmatprep.mubr.msk.f32.mxu1 %vm401_vm0, %v7993_v23 }
  0x2c   : > { %6414 = vmatprep.subr.mxu1 %v7925_v6  ;;  %6426 = vmatpush3.msra.mxu0 %v7925_v6 }
  0x2d   : > { %6415 = vmatpush3.msra.mxu1 %v7925_v6  ;;  %6427 = vmatprep.subr.mxu0 %v7938_v11 }
  0x2e   : > { %6416 = vmatprep.subr.mxu1 %v7938_v11  ;;  %6428 = vmatpush3.msra.mxu0 %v7938_v11 }
  0x2f   : > { %6417 = vmatpush3.msra.mxu1 %v7938_v11  ;;  %6429 = vmatprep.subr.mxu0 %v7949_v14 }
  0x30   : > { %6418 = vmatprep.subr.mxu1 %v7949_v14  ;;  %6430 = vmatpush3.msra.mxu0 %v7949_v14 }
  0x31   : > { %6419 = vmatpush3.msra.mxu1 %v7949_v14  ;;  %6431 = vmatprep.mubr.msk.f32.mxu0 %vm401_vm0, %v8017_v27 }
  0x32   : > { %6421 = vmatmul.mubr.msk.f32.vlgmr.msra.gmra.mxu1 %vm401_vm0, %v5358_v28  ;;  %6432 = vmatmul.mubr.msk.f32.vlgmr.msra.gmra.mxu0 %vm401_vm0, %v5362_v29  ;;  %v5401_v28 = vld [vmem:[%s10006_s1 + $0x240] sm:$0xff]  ;;  %v5432_v29 = vld [vmem:[%s10006_s1 + $0x118] sm:$0xff] }
  0x33   : > { %6434 = vmatprep.subr.mxu1 %v7923_v5  ;;  %6442 = vmatprep.mubr.msk.f32.mxu1 %vm401_vm0, %v8026_v30 }
  0x34   : > { %6435 = vmatpush3.msra.mxu1 %v7923_v5  ;;  %6445 = vmatprep.subr.mxu0 %v8035_v32  ;;  %v8319_v5 = vld [vmem:[%s10006_s1 + $0x290] sm:$0xff] }
  0x35   : > { %6436 = vmatprep.subr.mxu1 %v7925_v6  ;;  %6446 = vmatpush3.msra.mxu0 %v8035_v32 }
  0x36   : > { %6437 = vmatpush3.msra.mxu1 %v7925_v6  ;;  %6447 = vmatprep.subr.mxu0 %v8045_v33  ;;  %v8324_v6 = vld [vmem:[%s10006_s1 + $0x210] sm:$0xff] }
  0x37   : > { %6438 = vmatprep.subr.mxu1 %v7938_v11  ;;  %6448 = vmatpush3.msra.mxu0 %v8045_v33 }
  0x38   : > { %6439 = vmatpush3.msra.mxu1 %v7938_v11  ;;  %6449 = vmatprep.subr.mxu0 %v8055_v34  ;;  %v8348_v11 = vld [vmem:[%s10006_s1 + $0x280] sm:$0xff] }
  0x39   : > { %6440 = vmatprep.subr.mxu1 %v7949_v14  ;;  %6450 = vmatpush3.msra.mxu0 %v8055_v34 }
  0x3a   : > { %6441 = vmatpush3.msra.mxu1 %v7949_v14  ;;  %6451 = vmatprep.subr.mxu0 %v8064_v35  ;;  %v8367_v14 = vld [vmem:[%s10006_s1 + $0x1f8] sm:$0xff] }
  0x3b   : > { %6472 = vmatprep.subr.mxu1 %v8070_v36  ;;  %6443 = vmatmul.mubr.msk.f32.vlgmr.msra.gmra.mxu1 %vm401_vm0, %v5366_v37  ;;  %v5425_v37 = vld [vmem:[%s10006_s1 + $0xe0] sm:$0xff]  ;;  %vm2635_vm0 = vcmask 113664  }
  0x3c   : > { %6473 = vmatpush3.msra.mxu1 %v8070_v36  ;;  %6452 = vmatpush3.msra.mxu0 %v8064_v35 }
  0x3d   : > { %6474 = vmatprep.subr.mxu1 %v8080_v38  ;;  %6453 = vmatprep.subr.mxu0 %v8086_v39 }
  0x3e   : > { %6475 = vmatpush3.msra.mxu1 %v8080_v38  ;;  %6454 = vmatpush3.msra.mxu0 %v8086_v39 }
  0x3f   : > { %6476 = vmatprep.subr.mxu1 %v8094_v40  ;;  %6455 = vmatprep.subr.mxu0 %v8100_v41 }
  0x40   : > { %6477 = vmatpush3.msra.mxu1 %v8094_v40  ;;  %6456 = vmatpush3.msra.mxu0 %v8100_v41 }
  0x41   : > { %6478 = vmatprep.subr.mxu1 %v8108_v42  ;;  %6457 = vmatprep.subr.mxu0 %v8114_v43 }
  0x42   : > { %6479 = vmatpush3.msra.mxu1 %v8108_v42  ;;  %6458 = vmatpush3.msra.mxu0 %v8114_v43 }
  0x43   : > { %6480 = vmatprep.subr.mxu1 %v8122_v44  ;;  %6459 = vmatprep.subr.mxu0 %v8168_v51 }
  0x44   : > { %6481 = vmatpush3.msra.mxu1 %v8122_v44  ;;  %6460 = vmatpush3.msra.mxu0 %v8168_v51 }
  0x45   : > { %6482 = vmatprep.subr.mxu1 %v934_v45  ;;  %6461 = vmatprep.subr.mxu0 %v8182_v53 }
  0x46   : > { %6483 = vmatpush3.msra.mxu1 %v934_v45  ;;  %6462 = vmatpush3.msra.mxu0 %v8182_v53 }
  0x47   : > { %6484 = vmatprep.subr.mxu1 %v933_v46  ;;  %6463 = vmatprep.subr.mxu0 %v8190_v54 }
  0x48   : > { %6485 = vmatpush3.msra.mxu1 %v933_v46  ;;  %6464 = vmatpush3.msra.mxu0 %v8190_v54 }
  0x49   : > { %6486 = vmatprep.subr.mxu1 %v8140_v47  ;;  %6465 = vmatprep.subr.mxu0 %v8197_v55 }
  0x4a   : > { %6487 = vmatpush3.msra.mxu1 %v8140_v47  ;;  %6466 = vmatpush3.msra.mxu0 %v8197_v55 }
  0x4b   : > { %6488 = vmatprep.subr.mxu1 %v8145_v48  ;;  %6467 = vmatprep.subr.mxu0 %v8204_v56 }
  0x4c   : > { %6489 = vmatpush3.msra.mxu1 %v8145_v48  ;;  %6468 = vmatpush3.msra.mxu0 %v8204_v56 }
  0x4d   : > { %6490 = vmatprep.subr.mxu1 %v8152_v49  ;;  %6499 = vmatprep.subr.mxu0 %v8035_v32 }
  0x4e   : > { %6491 = vmatpush3.msra.mxu1 %v8152_v49 }
  0x4f   : > { %6492 = vmatprep.subr.mxu1 %v8159_v50 }
  0x50   : > { %6493 = vmatpush3.msra.mxu1 %v8159_v50 }
  0x51   : > { %6494 = vmatprep.subr.mxu1 %v8173_v52 }
  0x52   : > { %6495 = vmatpush3.msra.mxu1 %v8173_v52 }
  0x53   : > { %6526 = vmatprep.subr.mxu1 %v8070_v36 }
  0xe2   : > { %v8209_v57 = vpop.f32.mrf.mxu1 }
  0xe4   : > { %v474_v58 = vpop.f32.mrf.mxu1 }
  0xe5   : > { %6496 = vmatprep.mubr.msk.f32.mxu1 %vm966_vm13, %v474_v58 }
  0xe6   : > { %6497 = vmatmul.mubr.msk.f32.vlgmr.msra.gmra.mxu1 %vm966_vm13, %v8209_v57  ;;  %v8272_v63 = vpop.f32.mrf.mxu0 }
  0xe7   : > { %6527 = vmatpush3.msra.mxu1 %v8070_v36  ;;  %v5426_v36 = vld [vmem:[%s10006_s1 + $0xe8] sm:$0xff] }
  0xe8   : > { %6528 = vmatprep.subr.mxu1 %v8080_v38  ;;  %v8287_v1 = vpop.f32.mrf.mxu0 }
  0xe9   : > { %6529 = vmatpush3.msra.mxu1 %v8080_v38  ;;  %v5424_v38 = vld [vmem:[%s10006_s1 + $0xd8] sm:$0xff] }
  0xea   : > { %6530 = vmatprep.subr.mxu1 %v8094_v40  ;;  %v8218_v59 = vpop.f32.mrf.mxu1 }
  0xeb   : > { %6531 = vmatpush3.msra.mxu1 %v8094_v40 }
  0xec   : > { %6532 = vmatprep.subr.mxu1 %v8108_v42  ;;  %v8222_v60 = vpop.f32.mrf.mxu1 }
  0xed   : > { %6533 = vmatpush3.msra.mxu1 %v8108_v42  ;;  %6469 = vmatprep.mubr.msk.f32.mxu0 %vm966_vm13, %v8222_v60  ;;  %v5421_v42 = vld [vmem:[%s10006_s1 + $0xc0] sm:$0xff] }
  0xee   : > { %6534 = vmatprep.subr.mxu1 %v8122_v44  ;;  %6550 = vmatprep.mubr.msk.f32.mxu1 %vm966_vm13, %v8222_v60 }
  0xef   : > { %6470 = vmatmul.mubr.msk.f32.vlgmr.msra.gmra.mxu0 %vm966_vm13, %v8218_v59  ;;  %6535 = vmatpush3.msra.mxu1 %v8122_v44  ;;  %v5448_v44 = vld [vmem:[%s10006_s1 + $0x2f8] sm:$0xff] }
  0xf0   : > { %6500 = vmatpush3.msra.mxu0 %v8035_v32  ;;  %6536 = vmatprep.subr.mxu1 %v934_v45  ;;  %v5430_v32 = vld [vmem:[%s10006_s1 + $0x108] sm:$0xff] }
  0xf1   : > { %6501 = vmatprep.subr.mxu0 %v8045_v33  ;;  %6537 = vmatpush3.msra.mxu1 %v934_v45  ;;  %v5447_v45 = vld [vmem:[%s10006_s1 + $0x2f0] sm:$0xff] }
  0xf2   : > { %6502 = vmatpush3.msra.mxu0 %v8045_v33  ;;  %6538 = vmatprep.subr.mxu1 %v933_v46  ;;  %v5429_v33 = vld [vmem:[%s10006_s1 + $0x100] sm:$0xff]  ;;  %v8521_v40 = vpop.f32.mrf.mxu1 }
  0xf3   : > { %6503 = vmatprep.subr.mxu0 %v8055_v34  ;;  %6539 = vmatpush3.msra.mxu1 %v933_v46  ;;  %v5446_v46 = vld [vmem:[%s10006_s1 + $0x2e8] sm:$0xff] }
  0xf4   : > { %6504 = vmatpush3.msra.mxu0 %v8055_v34  ;;  %6540 = vmatprep.subr.mxu1 %v8140_v47  ;;  %v5428_v34 = vld [vmem:[%s10006_s1 + $0xf8] sm:$0xff] }
  0xf5   : > { %6505 = vmatprep.subr.mxu0 %v8064_v35  ;;  %6541 = vmatpush3.msra.mxu1 %v8140_v47  ;;  %v5445_v47 = vld [vmem:[%s10006_s1 + $0x2e0] sm:$0xff] }
  0xf6   : > { %6506 = vmatpush3.msra.mxu0 %v8064_v35  ;;  %6542 = vmatprep.subr.mxu1 %v8145_v48  ;;  %v5427_v35 = vld [vmem:[%s10006_s1 + $0xf0] sm:$0xff] }
  0xf7   : > { %6507 = vmatprep.subr.mxu0 %v8086_v39  ;;  %6543 = vmatpush3.msra.mxu1 %v8145_v48  ;;  %v5444_v48 = vld [vmem:[%s10006_s1 + $0x2d8] sm:$0xff] }
  0xf8   : > { %6508 = vmatpush3.msra.mxu0 %v8086_v39  ;;  %6544 = vmatprep.subr.mxu1 %v8152_v49  ;;  %v5423_v39 = vld [vmem:[%s10006_s1 + $0xd0] sm:$0xff] }
  0xf9   : > { %6509 = vmatprep.subr.mxu0 %v8100_v41  ;;  %6545 = vmatpush3.msra.mxu1 %v8152_v49  ;;  %v5443_v49 = vld [vmem:[%s10006_s1 + $0x2d0] sm:$0xff] }
  0xfa   : > { %6510 = vmatpush3.msra.mxu0 %v8100_v41  ;;  %6546 = vmatprep.subr.mxu1 %v8159_v50  ;;  %v5422_v41 = vld [vmem:[%s10006_s1 + $0xc8] sm:$0xff] }
  0xfb   : > { %6511 = vmatprep.subr.mxu0 %v8114_v43  ;;  %6547 = vmatpush3.msra.mxu1 %v8159_v50  ;;  %v5442_v50 = vld [vmem:[%s10006_s1 + $0x2c8] sm:$0xff] }
  0xfc   : > { %6512 = vmatpush3.msra.mxu0 %v8114_v43  ;;  %6548 = vmatprep.subr.mxu1 %v8173_v52  ;;  %v8529_v43 = vpop.f32.mrf.mxu1 }
  0xfd   : > { %6513 = vmatprep.subr.mxu0 %v8168_v51  ;;  %6549 = vmatpush3.msra.mxu1 %v8173_v52  ;;  %v5440_v52 = vld [vmem:[%s10006_s1 + $0x2b8] sm:$0xff] }
  0xfe   : > { %6514 = vmatpush3.msra.mxu0 %v8168_v51  ;;  %6551 = vmatmul.mubr.msk.f32.vlgmr.msra.gmra.mxu1 %vm966_vm13, %v8218_v59  ;;  %v5441_v51 = vld [vmem:[%s10006_s1 + $0x2c0] sm:$0xff] }
  0xff   : > { %6515 = vmatprep.subr.mxu0 %v8182_v53  ;;  %6580 = vmatprep.subr.mxu1 %v8258_v61 }
 0x100   : > { %6516 = vmatpush3.msra.mxu0 %v8182_v53  ;;  %6581 = vmatpush3.msra.mxu1 %v8258_v61  ;;  %v5439_v53 = vld [vmem:[%s10006_s1 + $0x2b0] sm:$0xff] }
 0x101   : > { %6604 = vmatprep.mubr.msk.f32.mxu1 %vm966_vm13, %v474_v58  ;;  %6517 = vmatprep.subr.mxu0 %v8190_v54  ;;  %v5462_v58 = vld [vmem:[%s10006_s1 + $0x168] sm:$0xff] }
 0x102   : > { %6582 = vmatprep.subr.mxu1 %v8270_v62  ;;  %6518 = vmatpush3.msra.mxu0 %v8190_v54  ;;  %v5438_v54 = vld [vmem:[%s10006_s1 + $0x2a8] sm:$0xff] }
 0x103   : > { %6583 = vmatpush3.msra.mxu1 %v8270_v62  ;;  %6519 = vmatprep.subr.mxu0 %v8197_v55 }
 0x104   : > { %6584 = vmatprep.subr.mxu1 %v8281_v0  ;;  %6520 = vmatpush3.msra.mxu0 %v8197_v55  ;;  %v5437_v55 = vld [vmem:[%s10006_s1 + $0x2a0] sm:$0xff] }
 0x105   : > { %6585 = vmatpush3.msra.mxu1 %v8281_v0  ;;  %6521 = vmatprep.subr.mxu0 %v8204_v56 }
 0x106   : > { %6523 = vmatprep.mubr.msk.f32.mxu0 %vm966_vm13, %v8287_v1  ;;  %6586 = vmatprep.subr.mxu1 %v8292_v2 }
 0x107   : > { %6522 = vmatpush3.msra.mxu0 %v8204_v56  ;;  %6587 = vmatpush3.msra.mxu1 %v8292_v2  ;;  %v5464_v56 = vld [vmem:[%s10006_s1 + $0x178] sm:$0xff] }
 0x108   : > { %6524 = vmatmul.mubr.msk.f32.vlgmr.msra.gmra.mxu0 %vm966_vm13, %v8272_v63  ;;  %6553 = vmatprep.subr.mxu0 %v8301_v3 }
 0x109   : > { %6588 = vmatprep.subr.mxu1 %v8309_v4  ;;  %6554 = vmatpush3.msra.mxu0 %v8301_v3 }
 0x10a   : > { %6577 = vmatprep.mubr.msk.f32.mxu0 %vm966_vm13, %v8222_v60  ;;  %6589 = vmatpush3.msra.mxu1 %v8309_v4 }
 0x10b   : > { %6555 = vmatprep.subr.mxu0 %v8319_v5  ;;  %6590 = vmatprep.subr.mxu1 %v8324_v6 }
 0x10c   : > { %6556 = vmatpush3.msra.mxu0 %v8319_v5  ;;  %6591 = vmatpush3.msra.mxu1 %v8324_v6 }
 0x10d   : > { %6557 = vmatprep.subr.mxu0 %v8334_v7  ;;  %6592 = vmatprep.subr.mxu1 %v8339_v8 }
 0x10e   : > { %6558 = vmatpush3.msra.mxu0 %v8334_v7  ;;  %6593 = vmatpush3.msra.mxu1 %v8339_v8 }
 0x10f   : > { %6559 = vmatprep.subr.mxu0 %v8348_v11  ;;  %6594 = vmatprep.subr.mxu1 %v8353_v12 }
 0x110   : > { %6560 = vmatpush3.msra.mxu0 %v8348_v11  ;;  %6595 = vmatpush3.msra.mxu1 %v8353_v12 }
 0x111   : > { %6561 = vmatprep.subr.mxu0 %v8362_v13  ;;  %6596 = vmatprep.subr.mxu1 %v8367_v14 }
 0x112   : > { %6562 = vmatpush3.msra.mxu0 %v8362_v13  ;;  %6597 = vmatpush3.msra.mxu1 %v8367_v14 }
 0x113   : > { %6563 = vmatprep.subr.mxu0 %v8376_v15  ;;  %6598 = vmatprep.subr.mxu1 %v8381_v17 }
 0x114   : > { %6564 = vmatpush3.msra.mxu0 %v8376_v15  ;;  %6599 = vmatpush3.msra.mxu1 %v8381_v17 }
 0x115   : > { %6565 = vmatprep.subr.mxu0 %v8390_v18  ;;  %6600 = vmatprep.subr.mxu1 %v8395_v20 }
 0x116   : > { %6566 = vmatpush3.msra.mxu0 %v8390_v18  ;;  %6601 = vmatpush3.msra.mxu1 %v8395_v20 }
 0x117   : > { %6567 = vmatprep.subr.mxu0 %v8404_v21  ;;  %6602 = vmatprep.subr.mxu1 %v8409_v22 }
 0x118   : > { %6568 = vmatpush3.msra.mxu0 %v8404_v21  ;;  %6603 = vmatpush3.msra.mxu1 %v8409_v22 }
 0x119   : > { %6569 = vmatprep.subr.mxu0 %v8418_v24  ;;  %6605 = vmatmul.mubr.msk.f32.vlgmr.msra.gmra.mxu1 %vm966_vm13, %v8209_v57  ;;  %v5463_v57 = vld [vmem:[%s10006_s1 + $0x170] sm:$0xff] }
 0x11a   : > { %6634 = vmatprep.subr.mxu1 %v8258_v61  ;;  %6570 = vmatpush3.msra.mxu0 %v8418_v24 }
 0x11b   : > { %6635 = vmatpush3.msra.mxu1 %v8258_v61  ;;  %6658 = vmatprep.mubr.msk.f32.mxu1 %vm966_vm13, %v8222_v60  ;;  %v5460_v60 = vld [vmem:[%s10006_s1 + $0x158] sm:$0xff]  ;;  %v5459_v61 = vld [vmem:[%s10006_s1 + $0x150] sm:$0xff] }
 0x11c   : > { %6571 = vmatprep.subr.mxu0 %v5403_v25  ;;  %6636 = vmatprep.subr.mxu1 %v8270_v62 }
 0x11d   : > { %6572 = vmatpush3.msra.mxu0 %v5403_v25  ;;  %6637 = vmatpush3.msra.mxu1 %v8270_v62  ;;  %v5458_v62 = vld [vmem:[%s10006_s1 + $0x148] sm:$0xff] }
 0x11e   : > { %6573 = vmatprep.subr.mxu0 %v5402_v26  ;;  %6638 = vmatprep.subr.mxu1 %v8281_v0 }
 0x11f   : > { %6574 = vmatpush3.msra.mxu0 %v5402_v26  ;;  %6639 = vmatpush3.msra.mxu1 %v8281_v0  ;;  %v5456_v0 = vld [vmem:[%s10006_s1 + $0x138] sm:$0xff] }
 0x120   : > { %6575 = vmatprep.subr.mxu0 %v5401_v28  ;;  %6640 = vmatprep.subr.mxu1 %v8292_v2 }
 0x121   : > { %6576 = vmatpush3.msra.mxu0 %v5401_v28  ;;  %6641 = vmatpush3.msra.mxu1 %v8292_v2  ;;  %v8613_v2 = vpop.f32.mrf.mxu0 }
 0x122   : > { %6578 = vmatmul.mubr.msk.f32.vlgmr.msra.gmra.mxu0 %vm966_vm13, %v8218_v59  ;;  %6607 = vmatprep.subr.mxu0 %v8301_v3 }
 0x123   : > { %6642 = vmatprep.subr.mxu1 %v8309_v4  ;;  %6608 = vmatpush3.msra.mxu0 %v8301_v3  ;;  %v5454_v3 = vld [vmem:[%s10006_s1 + $0x128] sm:$0xff] }
 0x124   : > { %6631 = vmatprep.mubr.msk.f32.mxu0 %vm966_vm13, %v8287_v1  ;;  %6643 = vmatpush3.msra.mxu1 %v8309_v4  ;;  %v5453_v4 = vld [vmem:[%s10006_s1 + $0x120] sm:$0xff] }
 0x125   : > { %6609 = vmatprep.subr.mxu0 %v8319_v5  ;;  %6644 = vmatprep.subr.mxu1 %v8324_v6 }
 0x126   : > { %6610 = vmatpush3.msra.mxu0 %v8319_v5  ;;  %6645 = vmatpush3.msra.mxu1 %v8324_v6  ;;  %v8621_v5 = vpop.f32.mrf.mxu0  ;;  %v5480_v6 = vld [vmem:[%s10006_s1 + $0x358] sm:$0xff] }
 0x127   : > { %6611 = vmatprep.subr.mxu0 %v8334_v7  ;;  %6646 = vmatprep.subr.mxu1 %v8339_v8 }
 0x128   : > { %6612 = vmatpush3.msra.mxu0 %v8334_v7  ;;  %6647 = vmatpush3.msra.mxu1 %v8339_v8  ;;  %v5479_v7 = vld [vmem:[%s10006_s1 + $0x350] sm:$0xff]  ;;  %v5478_v8 = vld [vmem:[%s10006_s1 + $0x348] sm:$0xff] }
 0x129   : > { %6613 = vmatprep.subr.mxu0 %v8348_v11  ;;  %6648 = vmatprep.subr.mxu1 %v8353_v12 }
 0x12a   : > { %6614 = vmatpush3.msra.mxu0 %v8348_v11  ;;  %6649 = vmatpush3.msra.mxu1 %v8353_v12  ;;  %v5477_v11 = vld [vmem:[%s10006_s1 + $0x340] sm:$0xff]  ;;  %v5476_v12 = vld [vmem:[%s10006_s1 + $0x338] sm:$0xff] }
 0x12b   : > { %6615 = vmatprep.subr.mxu0 %v8362_v13  ;;  %6650 = vmatprep.subr.mxu1 %v8367_v14 }
 0x12c   : > { %6616 = vmatpush3.msra.mxu0 %v8362_v13  ;;  %6651 = vmatpush3.msra.mxu1 %v8367_v14  ;;  %v5475_v13 = vld [vmem:[%s10006_s1 + $0x330] sm:$0xff]  ;;  %v5474_v14 = vld [vmem:[%s10006_s1 + $0x328] sm:$0xff] }
 0x12d   : > { %6617 = vmatprep.subr.mxu0 %v8376_v15  ;;  %6652 = vmatprep.subr.mxu1 %v8381_v17 }
 0x12e   : > { %6618 = vmatpush3.msra.mxu0 %v8376_v15  ;;  %6653 = vmatpush3.msra.mxu1 %v8381_v17  ;;  %v5473_v15 = vld [vmem:[%s10006_s1 + $0x320] sm:$0xff]  ;;  %v5472_v17 = vld [vmem:[%s10006_s1 + $0x318] sm:$0xff] }
 0x12f   : > { %6619 = vmatprep.subr.mxu0 %v8390_v18  ;;  %6654 = vmatprep.subr.mxu1 %v8395_v20 }
 0x130   : > { %6620 = vmatpush3.msra.mxu0 %v8390_v18  ;;  %6655 = vmatpush3.msra.mxu1 %v8395_v20  ;;  %v5471_v18 = vld [vmem:[%s10006_s1 + $0x310] sm:$0xff]  ;;  %v5470_v20 = vld [vmem:[%s10006_s1 + $0x308] sm:$0xff] }
 0x131   : > { %6621 = vmatprep.subr.mxu0 %v8404_v21  ;;  %6656 = vmatprep.subr.mxu1 %v8409_v22 }
 0x132   : > { %6622 = vmatpush3.msra.mxu0 %v8404_v21  ;;  %6657 = vmatpush3.msra.mxu1 %v8409_v22  ;;  %v5469_v21 = vld [vmem:[%s10006_s1 + $0x300] sm:$0xff]  ;;  %v5496_v22 = vld [vmem:[%s10006_s1 + $0x1d8] sm:$0xff] }
 0x133   : > { %6623 = vmatprep.subr.mxu0 %v8418_v24  ;;  %6659 = vmatmul.mubr.msk.f32.vlgmr.msra.gmra.mxu1 %vm966_vm13, %v8218_v59  ;;  %v5461_v59 = vld [vmem:[%s10006_s1 + $0x160] sm:$0xff] }
 0x134   : > { %6688 = vmatprep.subr.mxu1 %v5432_v29  ;;  %6624 = vmatpush3.msra.mxu0 %v8418_v24  ;;  %v5495_v24 = vld [vmem:[%s10006_s1 + $0x1d0] sm:$0xff] }
 0x135   : > { %6689 = vmatpush3.msra.mxu1 %v5432_v29  ;;  %6625 = vmatprep.subr.mxu0 %v5403_v25 }
 0x136   : > { %6690 = vmatprep.subr.mxu1 %v5431_v31  ;;  %6626 = vmatpush3.msra.mxu0 %v5403_v25  ;;  %v5494_v25 = vld [vmem:[%s10006_s1 + $0x1c8] sm:$0xff] }
 0x137   : > { %6691 = vmatpush3.msra.mxu1 %v5431_v31  ;;  %6627 = vmatprep.subr.mxu0 %v5402_v26 }
 0x138   : > { %6692 = vmatprep.subr.mxu1 %v5430_v32  ;;  %6628 = vmatpush3.msra.mxu0 %v5402_v26  ;;  %v5493_v26 = vld [vmem:[%s10006_s1 + $0x1c0] sm:$0xff] }
 0x139   : > { %6693 = vmatpush3.msra.mxu1 %v5430_v32  ;;  %6629 = vmatprep.subr.mxu0 %v5401_v28 }
 0x13a   : > { %6694 = vmatprep.subr.mxu1 %v5429_v33  ;;  %6630 = vmatpush3.msra.mxu0 %v5401_v28  ;;  %v8683_v28 = vpop.f32.mrf.mxu1 }
 0x13b   : > { %6695 = vmatpush3.msra.mxu1 %v5429_v33  ;;  %6632 = vmatmul.mubr.msk.f32.vlgmr.msra.gmra.mxu0 %vm966_vm13, %v8272_v63 }
 0x13c   : > { %6661 = vmatprep.subr.mxu0 %v5432_v29  ;;  %6696 = vmatprep.subr.mxu1 %v5428_v34 }
 0x13d   : > { %6662 = vmatpush3.msra.mxu0 %v5432_v29  ;;  %6685 = vmatprep.mubr.msk.f32.mxu0 %vm966_vm13, %v8287_v1  ;;  %v5492_v29 = vld [vmem:[%s10006_s1 + $0x1b8] sm:$0xff] }
 0x13e   : > { %6697 = vmatpush3.msra.mxu1 %v5428_v34  ;;  %6663 = vmatprep.subr.mxu0 %v5431_v31 }
 0x13f   : > { %6698 = vmatprep.subr.mxu1 %v5427_v35  ;;  %6664 = vmatpush3.msra.mxu0 %v5431_v31  ;;  %v919_v31 = vpop.f32.mrf.mxu1 }
 0x140   : > { %6699 = vmatpush3.msra.mxu1 %v5427_v35  ;;  %6665 = vmatprep.subr.mxu0 %v5430_v32 }
 0x141   : > { %6700 = vmatprep.subr.mxu1 %v5426_v36  ;;  %6666 = vmatpush3.msra.mxu0 %v5430_v32  ;;  %v5491_v32 = vld [vmem:[%s10006_s1 + $0x1b0] sm:$0xff] }
 0x142   : > { %6701 = vmatpush3.msra.mxu1 %v5426_v36  ;;  %6667 = vmatprep.subr.mxu0 %v5429_v33 }
 0x143   : > { %6702 = vmatprep.subr.mxu1 %v5425_v37  ;;  %6668 = vmatpush3.msra.mxu0 %v5429_v33  ;;  %v5490_v33 = vld [vmem:[%s10006_s1 + $0x1a8] sm:$0xff] }
 0x144   : > { %6703 = vmatpush3.msra.mxu1 %v5425_v37  ;;  %6669 = vmatprep.subr.mxu0 %v5428_v34 }
 0x145   : > { %6704 = vmatprep.subr.mxu1 %v5424_v38  ;;  %6670 = vmatpush3.msra.mxu0 %v5428_v34  ;;  %v5489_v34 = vld [vmem:[%s10006_s1 + $0x1a0] sm:$0xff] }
 0x146   : > { %6705 = vmatpush3.msra.mxu1 %v5424_v38  ;;  %6671 = vmatprep.subr.mxu0 %v5427_v35 }
 0x147   : > { %6706 = vmatprep.subr.mxu1 %v5423_v39  ;;  %6672 = vmatpush3.msra.mxu0 %v5427_v35  ;;  %v5488_v35 = vld [vmem:[%s10006_s1 + $0x198] sm:$0xff] }
 0x148   : > { %6707 = vmatpush3.msra.mxu1 %v5423_v39  ;;  %6673 = vmatprep.subr.mxu0 %v5426_v36 }
 0x149   : > { %6708 = vmatprep.subr.mxu1 %v5422_v41  ;;  %6674 = vmatpush3.msra.mxu0 %v5426_v36  ;;  %v5487_v36 = vld [vmem:[%s10006_s1 + $0x190] sm:$0xff] }
 0x14a   : > { %6709 = vmatpush3.msra.mxu1 %v5422_v41  ;;  %6675 = vmatprep.subr.mxu0 %v5425_v37 }
 0x14b   : > { %6710 = vmatprep.subr.mxu1 %v5421_v42  ;;  %6676 = vmatpush3.msra.mxu0 %v5425_v37  ;;  %v5486_v37 = vld [vmem:[%s10006_s1 + $0x188] sm:$0xff] }
 0x14c   : > { %6711 = vmatpush3.msra.mxu1 %v5421_v42  ;;  %6712 = vmatprep.mubr.msk.f32.mxu1 %vm966_vm13, %v8529_v43 }
 0x14d   : > { %6677 = vmatprep.subr.mxu0 %v5424_v38  ;;  %6713 = vmatmul.mubr.msk.f32.vlgmr.msra.gmra.mxu1 %vm966_vm13, %v8521_v40 }
 0x14e   : > { %6742 = vmatprep.subr.mxu1 %v5448_v44  ;;  %6678 = vmatpush3.msra.mxu0 %v5424_v38  ;;  %v5485_v38 = vld [vmem:[%s10006_s1 + $0x180] sm:$0xff] }
 0x14f   : > { %6743 = vmatpush3.msra.mxu1 %v5448_v44  ;;  %6679 = vmatprep.subr.mxu0 %v5423_v39 }
 0x150   : > { %6744 = vmatprep.subr.mxu1 %v5447_v45  ;;  %6680 = vmatpush3.msra.mxu0 %v5423_v39  ;;  %v5512_v39 = vld [vmem:[%s10006_s1 + $0x3b8] sm:$0xff] }
 0x151   : > { %6745 = vmatpush3.msra.mxu1 %v5447_v45  ;;  %6681 = vmatprep.subr.mxu0 %v5422_v41 }
 0x152   : > { %6746 = vmatprep.subr.mxu1 %v5446_v46  ;;  %6682 = vmatpush3.msra.mxu0 %v5422_v41  ;;  %v5510_v41 = vld [vmem:[%s10006_s1 + $0x3a8] sm:$0xff] }
 0x153   : > { %6747 = vmatpush3.msra.mxu1 %v5446_v46  ;;  %6683 = vmatprep.subr.mxu0 %v5421_v42 }
 0x154   : > { %6748 = vmatprep.subr.mxu1 %v5445_v47  ;;  %6766 = vmatprep.mubr.msk.f32.mxu1 %vm966_vm13, %v8529_v43 }
 0x155   : > { %6684 = vmatpush3.msra.mxu0 %v5421_v42  ;;  %6749 = vmatpush3.msra.mxu1 %v5445_v47  ;;  %v5509_v42 = vld [vmem:[%s10006_s1 + $0x3a0] sm:$0xff] }
 0x156   : > { %6686 = vmatmul.mubr.msk.f32.vlgmr.msra.gmra.mxu0 %vm966_vm13, %v8272_v63  ;;  %6715 = vmatprep.subr.mxu0 %v5448_v44 }
 0x157   : > { %6750 = vmatprep.subr.mxu1 %v5444_v48  ;;  %6716 = vmatpush3.msra.mxu0 %v5448_v44  ;;  %v5507_v44 = vld [vmem:[%s10006_s1 + $0x390] sm:$0xff] }
 0x158   : > { %6739 = vmatprep.mubr.msk.f32.mxu0 %vm966_vm13, %v8287_v1  ;;  %6751 = vmatpush3.msra.mxu1 %v5444_v48  ;;  %v5455_v1 = vld [vmem:[%s10006_s1 + $0x130] sm:$0xff] }
 0x159   : > { %6717 = vmatprep.subr.mxu0 %v5447_v45  ;;  %6752 = vmatprep.subr.mxu1 %v5443_v49 }
 0x15a   : > { %6718 = vmatpush3.msra.mxu0 %v5447_v45  ;;  %6753 = vmatpush3.msra.mxu1 %v5443_v49  ;;  %v5506_v45 = vld [vmem:[%s10006_s1 + $0x388] sm:$0xff] }
 0x15b   : > { %6719 = vmatprep.subr.mxu0 %v5446_v46  ;;  %6754 = vmatprep.subr.mxu1 %v5442_v50 }
 0x15c   : > { %6720 = vmatpush3.msra.mxu0 %v5446_v46  ;;  %6755 = vmatpush3.msra.mxu1 %v5442_v50  ;;  %v5505_v46 = vld [vmem:[%s10006_s1 + $0x380] sm:$0xff] }
 0x15d   : > { %6721 = vmatprep.subr.mxu0 %v5445_v47  ;;  %6756 = vmatprep.subr.mxu1 %v5441_v51 }
 0x15e   : > { %6722 = vmatpush3.msra.mxu0 %v5445_v47  ;;  %6757 = vmatpush3.msra.mxu1 %v5441_v51  ;;  %v5504_v47 = vld [vmem:[%s10006_s1 + $0x378] sm:$0xff] }
 0x15f   : > { %6723 = vmatprep.subr.mxu0 %v5444_v48  ;;  %6758 = vmatprep.subr.mxu1 %v5440_v52 }
 0x160   : > { %6724 = vmatpush3.msra.mxu0 %v5444_v48  ;;  %6759 = vmatpush3.msra.mxu1 %v5440_v52  ;;  %v5503_v48 = vld [vmem:[%s10006_s1 + $0x370] sm:$0xff] }
 0x161   : > { %6725 = vmatprep.subr.mxu0 %v5443_v49  ;;  %6760 = vmatprep.subr.mxu1 %v5439_v53 }
 0x162   : > { %6726 = vmatpush3.msra.mxu0 %v5443_v49  ;;  %6761 = vmatpush3.msra.mxu1 %v5439_v53  ;;  %v5502_v49 = vld [vmem:[%s10006_s1 + $0x368] sm:$0xff] }
 0x163   : > { %6727 = vmatprep.subr.mxu0 %v5442_v50  ;;  %6762 = vmatprep.subr.mxu1 %v5438_v54 }
 0x164   : > { %6728 = vmatpush3.msra.mxu0 %v5442_v50  ;;  %6763 = vmatpush3.msra.mxu1 %v5438_v54  ;;  %v5501_v50 = vld [vmem:[%s10006_s1 + $0x360] sm:$0xff] }
 0x165   : > { %6729 = vmatprep.subr.mxu0 %v5441_v51  ;;  %6764 = vmatprep.subr.mxu1 %v5437_v55 }
 0x166   : > { %6730 = vmatpush3.msra.mxu0 %v5441_v51  ;;  %6765 = vmatpush3.msra.mxu1 %v5437_v55 }
 0x167   : > { %6731 = vmatprep.subr.mxu0 %v5440_v52  ;;  %6767 = vmatmul.mubr.msk.f32.vlgmr.msra.gmra.mxu1 %vm966_vm13, %v8521_v40 }
 0x168   : > { %6796 = vmatprep.subr.mxu1 %v5464_v56  ;;  %6732 = vmatpush3.msra.mxu0 %v5440_v52 }
 0x169   : > { %6797 = vmatpush3.msra.mxu1 %v5464_v56  ;;  %6733 = vmatprep.subr.mxu0 %v5439_v53 }
 0x16a   : > { %6798 = vmatprep.subr.mxu1 %v5463_v57  ;;  %6734 = vmatpush3.msra.mxu0 %v5439_v53 }
 0x16b   : > { %6799 = vmatpush3.msra.mxu1 %v5463_v57  ;;  %6735 = vmatprep.subr.mxu0 %v5438_v54 }
 0x16c   : > { %6800 = vmatprep.subr.mxu1 %v5462_v58  ;;  %6736 = vmatpush3.msra.mxu0 %v5438_v54 }
 0x16d   : > { %6801 = vmatpush3.msra.mxu1 %v5462_v58  ;;  %6737 = vmatprep.subr.mxu0 %v5437_v55 }
 0x16e   : > { %6802 = vmatprep.subr.mxu1 %v5461_v59  ;;  %6738 = vmatpush3.msra.mxu0 %v5437_v55 }
 0x16f   : > { %6803 = vmatpush3.msra.mxu1 %v5461_v59  ;;  %6740 = vmatmul.mubr.msk.f32.vlgmr.msra.gmra.mxu0 %vm966_vm13, %v8272_v63  ;;  %v5457_v63 = vld [vmem:[%s10006_s1 + $0x140] sm:$0xff] }
 0x170   : > { %6769 = vmatprep.subr.mxu0 %v5464_v56  ;;  %6804 = vmatprep.subr.mxu1 %v5460_v60 }
 0x171   : > { %6770 = vmatpush3.msra.mxu0 %v5464_v56  ;;  %6793 = vmatprep.mubr.msk.f32.mxu0 %vm966_vm13, %v8529_v43 }
 0x172   : > { %6805 = vmatpush3.msra.mxu1 %v5460_v60  ;;  %6771 = vmatprep.subr.mxu0 %v5463_v57 }
 0x173   : > { %6806 = vmatprep.subr.mxu1 %v5459_v61  ;;  %6772 = vmatpush3.msra.mxu0 %v5463_v57 }
 0x174   : > { %6807 = vmatpush3.msra.mxu1 %v5459_v61  ;;  %6773 = vmatprep.subr.mxu0 %v5462_v58 }
 0x175   : > { %6808 = vmatprep.subr.mxu1 %v5458_v62  ;;  %6774 = vmatpush3.msra.mxu0 %v5462_v58 }
 0x176   : > { %6809 = vmatpush3.msra.mxu1 %v5458_v62  ;;  %6775 = vmatprep.subr.mxu0 %v5461_v59 }
 0x177   : > { %6810 = vmatprep.subr.mxu1 %v5457_v63  ;;  %6776 = vmatpush3.msra.mxu0 %v5461_v59 }
 0x178   : > { %6811 = vmatpush3.msra.mxu1 %v5457_v63  ;;  %6777 = vmatprep.subr.mxu0 %v5460_v60 }
 0x179   : > { %6812 = vmatprep.subr.mxu1 %v5456_v0  ;;  %6778 = vmatpush3.msra.mxu0 %v5460_v60 }
 0x17a   : > { %6813 = vmatpush3.msra.mxu1 %v5456_v0  ;;  %6779 = vmatprep.subr.mxu0 %v5459_v61 }
 0x17b   : > { %6814 = vmatprep.subr.mxu1 %v5455_v1  ;;  %6780 = vmatpush3.msra.mxu0 %v5459_v61 }
 0x17c   : > { %6815 = vmatpush3.msra.mxu1 %v5455_v1  ;;  %6781 = vmatprep.subr.mxu0 %v5458_v62 }
 0x17d   : > { %6816 = vmatprep.subr.mxu1 %v5454_v3  ;;  %6782 = vmatpush3.msra.mxu0 %v5458_v62 }
 0x17e   : > { %6817 = vmatpush3.msra.mxu1 %v5454_v3  ;;  %6783 = vmatprep.subr.mxu0 %v5457_v63 }
 0x17f   : > { %6818 = vmatprep.subr.mxu1 %v5453_v4  ;;  %6784 = vmatpush3.msra.mxu0 %v5457_v63 }
 0x180   : > { %6819 = vmatpush3.msra.mxu1 %v5453_v4  ;;  %6820 = vmatprep.mubr.msk.f32.mxu1 %vm966_vm13, %v8621_v5 }
 0x181   : > { %6785 = vmatprep.subr.mxu0 %v5456_v0  ;;  %6821 = vmatmul.mubr.msk.f32.vlgmr.msra.gmra.mxu1 %vm966_vm13, %v8613_v2 }
 0x182   : > { %6850 = vmatprep.subr.mxu1 %v5480_v6  ;;  %6786 = vmatpush3.msra.mxu0 %v5456_v0 }
 0x183   : > { %6851 = vmatpush3.msra.mxu1 %v5480_v6  ;;  %6787 = vmatprep.subr.mxu0 %v5455_v1 }
 0x184   : > { %6852 = vmatprep.subr.mxu1 %v5479_v7  ;;  %6788 = vmatpush3.msra.mxu0 %v5455_v1 }
 0x185   : > { %6853 = vmatpush3.msra.mxu1 %v5479_v7  ;;  %6789 = vmatprep.subr.mxu0 %v5454_v3 }
 0x186   : > { %6854 = vmatprep.subr.mxu1 %v5478_v8  ;;  %6790 = vmatpush3.msra.mxu0 %v5454_v3 }
 0x187   : > { %6855 = vmatpush3.msra.mxu1 %v5478_v8  ;;  %6791 = vmatprep.subr.mxu0 %v5453_v4 }
 0x188   : > { %6856 = vmatprep.subr.mxu1 %v5477_v11  ;;  %6874 = vmatprep.mubr.msk.f32.mxu1 %vm966_vm13, %v8621_v5 }
 0x189   : > { %6792 = vmatpush3.msra.mxu0 %v5453_v4  ;;  %6857 = vmatpush3.msra.mxu1 %v5477_v11 }
 0x18a   : > { %6794 = vmatmul.mubr.msk.f32.vlgmr.msra.gmra.mxu0 %vm966_vm13, %v8521_v40  ;;  %6823 = vmatprep.subr.mxu0 %v5480_v6 }
 0x18b   : > { %6858 = vmatprep.subr.mxu1 %v5476_v12  ;;  %6824 = vmatpush3.msra.mxu0 %v5480_v6 }
 0x18c   : > { %6847 = vmatprep.mubr.msk.f32.mxu0 %vm966_vm13, %v8529_v43  ;;  %6859 = vmatpush3.msra.mxu1 %v5476_v12  ;;  %v5508_v43 = vld [vmem:[%s10006_s1 + $0x398] sm:$0xff] }
 0x18d   : > { %6825 = vmatprep.subr.mxu0 %v5479_v7  ;;  %6860 = vmatprep.subr.mxu1 %v5475_v13 }
 0x18e   : > { %6826 = vmatpush3.msra.mxu0 %v5479_v7  ;;  %6861 = vmatpush3.msra.mxu1 %v5475_v13 }
 0x18f   : > { %6827 = vmatprep.subr.mxu0 %v5478_v8  ;;  %6862 = vmatprep.subr.mxu1 %v5474_v14 }
 0x190   : > { %6828 = vmatpush3.msra.mxu0 %v5478_v8  ;;  %6863 = vmatpush3.msra.mxu1 %v5474_v14 }
 0x191   : > { %6829 = vmatprep.subr.mxu0 %v5477_v11  ;;  %6864 = vmatprep.subr.mxu1 %v5473_v15 }
 0x192   : > { %6830 = vmatpush3.msra.mxu0 %v5477_v11  ;;  %6865 = vmatpush3.msra.mxu1 %v5473_v15 }
 0x193   : > { %6831 = vmatprep.subr.mxu0 %v5476_v12  ;;  %6866 = vmatprep.subr.mxu1 %v5472_v17 }
 0x194   : > { %6832 = vmatpush3.msra.mxu0 %v5476_v12  ;;  %6867 = vmatpush3.msra.mxu1 %v5472_v17 }
 0x195   : > { %6833 = vmatprep.subr.mxu0 %v5475_v13  ;;  %6868 = vmatprep.subr.mxu1 %v5471_v18 }
 0x196   : > { %6834 = vmatpush3.msra.mxu0 %v5475_v13  ;;  %6869 = vmatpush3.msra.mxu1 %v5471_v18 }
 0x197   : > { %6835 = vmatprep.subr.mxu0 %v5474_v14  ;;  %6870 = vmatprep.subr.mxu1 %v5470_v20 }
 0x198   : > { %6836 = vmatpush3.msra.mxu0 %v5474_v14  ;;  %6871 = vmatpush3.msra.mxu1 %v5470_v20 }
 0x199   : > { %6837 = vmatprep.subr.mxu0 %v5473_v15  ;;  %6872 = vmatprep.subr.mxu1 %v5469_v21 }
 0x19a   : > { %6838 = vmatpush3.msra.mxu0 %v5473_v15  ;;  %6873 = vmatpush3.msra.mxu1 %v5469_v21 }
 0x19b   : > { %6839 = vmatprep.subr.mxu0 %v5472_v17  ;;  %6875 = vmatmul.mubr.msk.f32.vlgmr.msra.gmra.mxu1 %vm966_vm13, %v8613_v2 }
 0x19c   : > { %6904 = vmatprep.subr.mxu1 %v5496_v22  ;;  %6840 = vmatpush3.msra.mxu0 %v5472_v17 }
 0x19d   : > { %6905 = vmatpush3.msra.mxu1 %v5496_v22  ;;  %6841 = vmatprep.subr.mxu0 %v5471_v18 }
 0x19e   : > { %6906 = vmatprep.subr.mxu1 %v5495_v24  ;;  %6842 = vmatpush3.msra.mxu0 %v5471_v18 }
 0x19f   : > { %6907 = vmatpush3.msra.mxu1 %v5495_v24  ;;  %6843 = vmatprep.subr.mxu0 %v5470_v20 }
 0x1a0   : > { %6908 = vmatprep.subr.mxu1 %v5494_v25  ;;  %6844 = vmatpush3.msra.mxu0 %v5470_v20 }
 0x1a1   : > { %6909 = vmatpush3.msra.mxu1 %v5494_v25  ;;  %6845 = vmatprep.subr.mxu0 %v5469_v21 }
 0x1a2   : > { %6910 = vmatprep.subr.mxu1 %v5493_v26  ;;  %6846 = vmatpush3.msra.mxu0 %v5469_v21 }
 0x1a3   : > { %6911 = vmatpush3.msra.mxu1 %v5493_v26  ;;  %6848 = vmatmul.mubr.msk.f32.vlgmr.msra.gmra.mxu0 %vm966_vm13, %v8521_v40  ;;  %v5511_v40 = vld [vmem:[%s10006_s1 + $0x3b0] sm:$0xff] }
 0x1a4   : > { %6877 = vmatprep.subr.mxu0 %v5496_v22  ;;  %6912 = vmatprep.subr.mxu1 %v5492_v29 }
 0x1a5   : > { %6878 = vmatpush3.msra.mxu0 %v5496_v22  ;;  %6901 = vmatprep.mubr.msk.f32.mxu0 %vm966_vm13, %v8621_v5 }
 0x1a6   : > { %6913 = vmatpush3.msra.mxu1 %v5492_v29  ;;  %6879 = vmatprep.subr.mxu0 %v5495_v24  ;;  %v6498_v51 = vpop.f32.mrf.mxu1 }
 0x1a7   : > { %6914 = vmatprep.subr.mxu1 %v5491_v32  ;;  %6928 = vmatprep.mubr.msk.f32.mxu1 %vm966_vm13, %v919_v31 }
 0x1a8   : > { %6880 = vmatpush3.msra.mxu0 %v5495_v24  ;;  %6915 = vmatpush3.msra.mxu1 %v5491_v32  ;;  %v1120_v52 = vpop.f32.mrf.mxu1 }
 0x1a9   : > { %6881 = vmatprep.subr.mxu0 %v5494_v25  ;;  %6916 = vmatprep.subr.mxu1 %v5490_v33 }
 0x1aa   : > { %6882 = vmatpush3.msra.mxu0 %v5494_v25  ;;  %6917 = vmatpush3.msra.mxu1 %v5490_v33 }
 0x1ab   : > { %6883 = vmatprep.subr.mxu0 %v5493_v26  ;;  %6918 = vmatprep.subr.mxu1 %v5489_v34 }
 0x1ac   : > { %6884 = vmatpush3.msra.mxu0 %v5493_v26  ;;  %6919 = vmatpush3.msra.mxu1 %v5489_v34 }
 0x1ad   : > { %6885 = vmatprep.subr.mxu0 %v5492_v29  ;;  %6920 = vmatprep.subr.mxu1 %v5488_v35 }
 0x1ae   : > { %6886 = vmatpush3.msra.mxu0 %v5492_v29  ;;  %6921 = vmatpush3.msra.mxu1 %v5488_v35 }
 0x1af   : > { %6887 = vmatprep.subr.mxu0 %v5491_v32  ;;  %6922 = vmatprep.subr.mxu1 %v5487_v36  ;;  %v6471_v53 = vpop.f32.mrf.mxu0 }
 0x1b0   : > { %6888 = vmatpush3.msra.mxu0 %v5491_v32  ;;  %6923 = vmatpush3.msra.mxu1 %v5487_v36  ;;  %v1126_v32 = vadd.f32 %v6498_v51, %v6471_v53 }
 0x1b1   : > { %6889 = vmatprep.subr.mxu0 %v5490_v33  ;;  %6924 = vmatprep.subr.mxu1 %v5486_v37  ;;  %v1039_v55 = vpop.f32.mrf.mxu0 }
 0x1b2   : > { %6890 = vmatpush3.msra.mxu0 %v5490_v33  ;;  %6925 = vmatpush3.msra.mxu1 %v5486_v37 }
 0x1b3   : > { %6891 = vmatprep.subr.mxu0 %v5489_v34  ;;  %6926 = vmatprep.subr.mxu1 %v5485_v38 }
 0x1b4   : > { %6892 = vmatpush3.msra.mxu0 %v5489_v34  ;;  %6927 = vmatpush3.msra.mxu1 %v5485_v38 }
 0x1b5   : > { %6893 = vmatprep.subr.mxu0 %v5488_v35  ;;  %6929 = vmatmul.mubr.msk.f32.vlgmr.msra.gmra.mxu1 %vm966_vm13, %v8683_v28 }
 0x1b6   : > { %6958 = vmatprep.subr.mxu1 %v5512_v39  ;;  %6894 = vmatpush3.msra.mxu0 %v5488_v35 }
 0x1b7   : > { %6959 = vmatpush3.msra.mxu1 %v5512_v39  ;;  %6982 = vmatprep.mubr.msk.f32.mxu1 %vm966_vm13, %v919_v31 }
 0x1b8   : > { %6895 = vmatprep.subr.mxu0 %v5487_v36  ;;  %6960 = vmatprep.subr.mxu1 %v5511_v40 }
 0x1b9   : > { %6896 = vmatpush3.msra.mxu0 %v5487_v36  ;;  %6961 = vmatpush3.msra.mxu1 %v5511_v40  ;;  %v1121_v36 = vadd.f32 %v1120_v52, %v1039_v55 }
 0x1ba   : > { %6897 = vmatprep.subr.mxu0 %v5486_v37  ;;  %6962 = vmatprep.subr.mxu1 %v5510_v41 }
 0x1bb   : > { %6898 = vmatpush3.msra.mxu0 %v5486_v37  ;;  %6963 = vmatpush3.msra.mxu1 %v5510_v41 }
 0x1bc   : > { %6899 = vmatprep.subr.mxu0 %v5485_v38  ;;  %6964 = vmatprep.subr.mxu1 %v5509_v42 }
 0x1bd   : > { %6900 = vmatpush3.msra.mxu0 %v5485_v38  ;;  %6965 = vmatpush3.msra.mxu1 %v5509_v42 }
 0x1be   : > { %6902 = vmatmul.mubr.msk.f32.vlgmr.msra.gmra.mxu0 %vm966_vm13, %v8613_v2  ;;  %6931 = vmatprep.subr.mxu0 %v5512_v39  ;;  %v6552_v54 = vpop.f32.mrf.mxu1 }
 0x1bf   : > { %6966 = vmatprep.subr.mxu1 %v5508_v43  ;;  %6932 = vmatpush3.msra.mxu0 %v5512_v39 }
 0x1c0   : > { %6955 = vmatprep.mubr.msk.f32.mxu0 %vm966_vm13, %v8621_v5  ;;  %6967 = vmatpush3.msra.mxu1 %v5508_v43  ;;  %v1276_v56 = vpop.f32.mrf.mxu1 }
 0x1c1   : > { %6933 = vmatprep.subr.mxu0 %v5511_v40  ;;  %6968 = vmatprep.subr.mxu1 %v5507_v44 }
 0x1c2   : > { %6934 = vmatpush3.msra.mxu0 %v5511_v40  ;;  %6969 = vmatpush3.msra.mxu1 %v5507_v44 }
 0x1c3   : > { %6935 = vmatprep.subr.mxu0 %v5510_v41  ;;  %6970 = vmatprep.subr.mxu1 %v5506_v45 }
 0x1c4   : > { %6936 = vmatpush3.msra.mxu0 %v5510_v41  ;;  %6971 = vmatpush3.msra.mxu1 %v5506_v45 }
 0x1c5   : > { %6937 = vmatprep.subr.mxu0 %v5509_v42  ;;  %6972 = vmatprep.subr.mxu1 %v5505_v46 }
 0x1c6   : > { %6938 = vmatpush3.msra.mxu0 %v5509_v42  ;;  %6973 = vmatpush3.msra.mxu1 %v5505_v46 }
 0x1c7   : > { %6939 = vmatprep.subr.mxu0 %v5508_v43  ;;  %6974 = vmatprep.subr.mxu1 %v5504_v47 }
 0x1c8   : > { %6940 = vmatpush3.msra.mxu0 %v5508_v43  ;;  %6975 = vmatpush3.msra.mxu1 %v5504_v47  ;;  %v6525_v57 = vpop.f32.mrf.mxu0 }
 0x1c9   : > { %6941 = vmatprep.subr.mxu0 %v5507_v44  ;;  %6976 = vmatprep.subr.mxu1 %v5503_v48 }
 0x1ca   : > { %6942 = vmatpush3.msra.mxu0 %v5507_v44  ;;  %6977 = vmatpush3.msra.mxu1 %v5503_v48  ;;  %v1201_v59 = vpop.f32.mrf.mxu0 }
 0x1cb   : > { %6943 = vmatprep.subr.mxu0 %v5506_v45  ;;  %6978 = vmatprep.subr.mxu1 %v5502_v49  ;;  %v1277_v37 = vadd.f32 %v1276_v56, %v1201_v59 }
 0x1cc   : > { %6944 = vmatpush3.msra.mxu0 %v5506_v45  ;;  %6979 = vmatpush3.msra.mxu1 %v5502_v49 }
 0x1cd   : > { %6945 = vmatprep.subr.mxu0 %v5505_v46  ;;  %6980 = vmatprep.subr.mxu1 %v5501_v50 }
 0x1ce   : > { %6946 = vmatpush3.msra.mxu0 %v5505_v46  ;;  %6981 = vmatpush3.msra.mxu1 %v5501_v50 }
 0x1cf   : > { %6947 = vmatprep.subr.mxu0 %v5504_v47  ;;  %6983 = vmatmul.mubr.msk.f32.vlgmr.msra.gmra.mxu1 %vm966_vm13, %v8683_v28  ;;  %v1282_v28 = vadd.f32 %v6552_v54, %v6525_v57 }
 0x1d0   : > { %6948 = vmatpush3.msra.mxu0 %v5504_v47  ;;  %6992 = vmatprep.subr.mxu1 %v7803_v9 }
 0x1d1   : > { %6949 = vmatprep.subr.mxu0 %v5503_v48  ;;  %6996 = vmatprep.mubr.msk.f32.mxu1 %vm7804_vm14, %v7803_v9 }
 0x1d2   : > { %6950 = vmatpush3.msra.mxu0 %v5503_v48 }
 0x1d3   : > { %6951 = vmatprep.subr.mxu0 %v5502_v49 }
 0x1d4   : > { %6952 = vmatpush3.msra.mxu0 %v5502_v49 }
 0x1d5   : > { %6953 = vmatprep.subr.mxu0 %v5501_v50 }
 0x1d6   : > { %6954 = vmatpush3.msra.mxu0 %v5501_v50 }
 0x1d7   : > { %6956 = vmatmul.mubr.msk.f32.vlgmr.msra.gmra.mxu0 %vm966_vm13, %v8613_v2  ;;  %6985 = vmatprep.subr.mxu0 %v7803_v9 }
 0x1d8   : > { %6989 = vmatprep.mubr.msk.f32.mxu0 %vm7804_vm14, %v7803_v9 }
 0x1d9   : > { %v6606_v58 = vpop.f32.mrf.mxu1 }
 0x1db   : > { %v1439_v60 = vpop.f32.mrf.mxu1 }
 0x1e2   : > { %v6579_v61 = vpop.f32.mrf.mxu0 }
 0x1e3   : > { %v1445_v33 = vadd.f32 %v6606_v58, %v6579_v61 }
 0x1e4   : > { %v1364_v63 = vpop.f32.mrf.mxu0 }
 0x1e5   : > { %v1440_v38 = vadd.f32 %v1439_v60, %v1364_v63 }
 0x1f3   : > { %v6660_v62 = vpop.f32.mrf.mxu1 }
 0x1f5   : > { %v1589_v0 = vpop.f32.mrf.mxu1 }
 0x1fb   : > { %v6633_v1 = vpop.f32.mrf.mxu0 }
 0x1fc   : > { %v1595_v26 = vadd.f32 %v6660_v62, %v6633_v1 }
 0x1fd   : > { %v1514_v3 = vpop.f32.mrf.mxu0 }
 0x1fe   : > { %v1590_v34 = vadd.f32 %v1589_v0, %v1514_v3 }
 0x20d   : > { %v6714_v2 = vpop.f32.mrf.mxu1 }
 0x20e   : > { %v1770_v39 = vadd.f32 %v6714_v2, %v1282_v28  ;;  %v8912_v28 = vld [vmem:[%s10008_s3 + $0x18] sm:$0xff] }
 0x20f   : > { %v1760_v4 = vpop.f32.mrf.mxu1 }
 0x210   : > { %v1769_v44 = vadd.f32 %v1760_v4, %v1277_v37  ;;  %v5517_v4 = vld [vmem:[%s10007_s2] ss:$0 sm:$0xff] }
 0x216   : > { %v6687_v5 = vpop.f32.mrf.mxu0 }
 0x217   : > { %v1687_v40 = vadd.f32 %v6687_v5, %v1126_v32  ;;  %v8935_v32 = vld [vmem:[%s10008_s3 + $0x60] sm:$0xff] }
 0x218   : > { %v1677_v7 = vpop.f32.mrf.mxu0 }
 0x219   : > { %v1686_v45 = vadd.f32 %v1677_v7, %v1121_v36 }
 0x227   : > { %v6768_v6 = vpop.f32.mrf.mxu1 }
 0x228   : > { %v1937_v35 = vadd.f32 %v6768_v6, %v1595_v26  ;;  %v8907_v26 = vld [vmem:[%s10008_s3 + $0x70] sm:$0xff] }
 0x229   : > { %v1927_v8 = vpop.f32.mrf.mxu1 }
 0x22a   : > { %v1936_v41 = vadd.f32 %v1927_v8, %v1590_v34  ;;  %v8949_v34 = vld [vmem:[%s10008_s3 + $0x58] sm:$0xff] }
 0x22f   : > { %v6741_v11 = vpop.f32.mrf.mxu0 }
 0x230   : > { %v1860_v42 = vadd.f32 %v6741_v11, %v1445_v33  ;;  %v8940_v33 = vld [vmem:[%s10008_s3 + $0x8] sm:$0xff] }
 0x231   : > { %v1850_v13 = vpop.f32.mrf.mxu0 }
 0x232   : > { %v1859_v46 = vadd.f32 %v1850_v13, %v1440_v38 }
 0x241   : > { %v6822_v12 = vpop.f32.mrf.mxu1 }
 0x242   : > { %v2110_v47 = vadd.f32 %v6822_v12, %v1770_v39 }
 0x243   : > { %v2100_v14 = vpop.f32.mrf.mxu1 }
 0x244   : > { %v2109_v57 = vadd.f32 %v2100_v14, %v1769_v44 }
 0x24a   : > { %v6795_v15 = vpop.f32.mrf.mxu0 }
 0x24b   : > { %v2027_v50 = vadd.f32 %v6795_v15, %v1687_v40  ;;  %v8851_v15 = vld [vmem:[%s10008_s3 + $0x90] sm:$0xff] }
 0x24c   : > { %v2017_v18 = vpop.f32.mrf.mxu0 }
 0x24d   : > { %v2026_v58 = vadd.f32 %v2017_v18, %v1686_v45  ;;  %v8865_v18 = vld [vmem:[%s10008_s3 + $0x88] sm:$0xff] }
 0x25b   : > { %v6876_v17 = vpop.f32.mrf.mxu1 }
 0x25c   : > { %v2277_v43 = vadd.f32 %v6876_v17, %v1937_v35  ;;  %v8856_v17 = vld [vmem:[%s10008_s3 + $0x38] sm:$0xff]  ;;  %v8954_v35 = vld [vmem:[%s10008_s3] sm:$0xff] }
 0x25d   : > { %v2267_v20 = vpop.f32.mrf.mxu1 }
 0x25e   : > { %v2276_v54 = vadd.f32 %v2267_v20, %v1936_v41  ;;  %v8870_v20 = vld [vmem:[%s10008_s3 + $0x30] sm:$0xff] }
 0x263   : > { %v6849_v21 = vpop.f32.mrf.mxu0 }
 0x264   : > { %v2200_v51 = vadd.f32 %v6849_v21, %v1860_v42  ;;  %v8879_v21 = vld [vmem:[%s10008_s3 + $0x80] sm:$0xff] }
 0x265   : > { %v2190_v24 = vpop.f32.mrf.mxu0 }
 0x266   : > { %v2199_v52 = vadd.f32 %v2190_v24, %v1859_v46  ;;  %v8893_v24 = vld [vmem:[%s10008_s3 + $0x78] sm:$0xff]  ;;  %v9033_v46 = vld [vmem:[%s10008_s3 + $0x260] sm:$0xf] }
 0x275   : > { %v6930_v22 = vpop.f32.mrf.mxu1 }
 0x276   : > { %v2450_v56 = vadd.f32 %v6930_v22, %v2110_v47  ;;  %v8884_v22 = vld [vmem:[%s10008_s3 + $0x28] sm:$0xff] }
 0x277   : > { %v2440_v25 = vpop.f32.mrf.mxu1  ;;  %v9038_v47 = vld [vmem:[%s10008_s3 + $0x208] sm:$0xf] }
 0x278   : > { %v2449_v62 = vadd.f32 %v2440_v25, %v2109_v57  ;;  %v8898_v25 = vld [vmem:[%s10008_s3 + $0x20] sm:$0xff] }
 0x279   : > { %v9093_v57 = vld [vmem:[%s10008_s3 + $0x240] sm:$0xff] }
 0x27e   : > { %v6903_v29 = vpop.f32.mrf.mxu0 }
 0x27f   : > { %v2367_v59 = vadd.f32 %v6903_v29, %v2027_v50  ;;  %v8921_v29 = vld [vmem:[%s10008_s3 + $0x68] sm:$0xff]  ;;  %v9065_v50 = vld [vmem:[%s10008_s3 + $0x250] sm:$0xff] }
 0x280   : > { %v2357_v48 = vpop.f32.mrf.mxu0 }
 0x281   : > { %v2366_v0 = vadd.f32 %v2357_v48, %v2026_v58  ;;  %v9049_v48 = vld [vmem:[%s10008_s3 + $0x258] sm:$0xff]  ;;  %v9098_v58 = vld [vmem:[%s10008_s3 + $0x1e8] sm:$0xff] }
 0x28f   : > { %v6984_v31 = vpop.f32.mrf.mxu1 }
 0x290   : > { %v2617_v53 = vadd.f32 %v6984_v31, %v2277_v43  ;;  %v8926_v31 = vld [vmem:[%s10008_s3 + $0x10] sm:$0xff] }
 0x291   : > { %v2607_v49 = vpop.f32.mrf.mxu1 }
 0x292   : > { %v2616_v60 = vadd.f32 %v2607_v49, %v2276_v54  ;;  %v2621_v1 = vmax.f32 %v2450_v56, %v2617_v53  ;;  %v9054_v49 = vld [vmem:[%s10008_s3 + $0x200] sm:$0xff]  ;;  %v9070_v54 = vld [vmem:[%s10008_s3 + $0x1f8] sm:$0xff]  ;;  %v9084_v53 = vld [vmem:[%s10008_s3 + $0x1f0] sm:$0xff] }
 0x293   : > { %v9121_v56 = vld [vmem:[%s10008_s3 + $0x230] sm:$0xff] }
 0x294   : > { %v2620_v5 = vmax.f32 %v2449_v62, %v2616_v60  ;;  %v5563_v60 = vld [vmem:[%s10008_s3 + $0x228] sm:$0xff]  ;;  %v5562_v62 = vld [vmem:[%s10008_s3 + $0x220] sm:$0xff] }
 0x297   : > { %v6957_v55 = vpop.f32.mrf.mxu0 }
 0x298   : > { %v2540_v61 = vadd.f32 %v6957_v55, %v2200_v51  ;;  %v9079_v51 = vld [vmem:[%s10008_s3 + $0x248] sm:$0xff]  ;;  %v9112_v55 = vld [vmem:[%s10008_s3 + $0x1e0] sm:$0xff] }
 0x299   : > { %v2530_v63 = vpop.f32.mrf.mxu0 }
 0x29a   : > { %v2619_v2 = vmax.f32 %v2367_v59, %v2540_v61  ;;  %v2539_v3 = vadd.f32 %v2530_v63, %v2199_v52  ;;  %v9107_v52 = vld [vmem:[%s10008_s3 + $0x238] sm:$0xff]  ;;  %v5533_v61 = vld [vmem:[%s10008_s3 + $0x1d0] sm:$0xff]  ;;  %v5532_v63 = vld [vmem:[%s10008_s3 + $0x1c8] sm:$0xff] }
 0x29b   : > { %v9126_v59 = vld [vmem:[%s10008_s3 + $0x1d8] sm:$0xff] }
 0x29c   : > { %v2623_v6 = vmax.f32 %v2619_v2, %v2621_v1  ;;  %v2618_v7 = vmax.f32 %v2366_v0, %v2539_v3  ;;  %v5561_v0 = vld [vmem:[%s10008_s3 + $0x218] sm:$0xff]  ;;  %v5531_v1 = vld [vmem:[%s10008_s3 + $0x1c0] sm:$0xff]  ;;  %v5560_v2 = vld [vmem:[%s10008_s3 + $0x210] sm:$0xff] }
 0x29d   : > { %v5530_v3 = vld [vmem:[%s10008_s3 + $0x1b8] sm:$0xff] }
 0x29e   : > { %v2632_v8 = vadd.f32 %v5517_v4, %v2623_v6  ;;  %v2622_v11 = vmax.f32 %v2618_v7, %v2620_v5  ;;  %v5589_v6 = vld [vmem:[%s10008_s3 + $0x100] sm:$0xf]  ;;  %v5588_v7 = vld [vmem:[%s10008_s3 + $0xf8] sm:$0xff] }
 0x2a0   : > { %v2634_v12 = vmax.f32 %v2632_v8, 0.0  ;;  %v2631_v13 = vadd.f32 %v5517_v4, %v2622_v11  ;;  %v5587_v8 = vld [vmem:[%s10008_s3 + $0xf0] sm:$0xff]  ;;  %v5586_v11 = vld [vmem:[%s10008_s3 + $0xe8] sm:$0xff] }
 0x2a2   : > { %v2633_v14 = vmax.f32 %v2631_v13, 0.0  ;;  %6986 = vmatpush3.msk.msra.mxu0 %vm2638_vm15, %v2634_v12  ;;  %6993 = vmatpush3.msk.msra.mxu1 %vm2638_vm15, %v2634_v12  ;;  %v5584_v13 = vld [vmem:[%s10008_s3 + $0xd8] sm:$0xff] }
 0x2a3   : > { %6987 = vmatprep.subr.mxu0 %v7803_v9  ;;  %6994 = vmatprep.subr.mxu1 %v7803_v9 }
 0x2a4   : > { %6988 = vmatpush3.msra.mxu0 %v2633_v14  ;;  %6995 = vmatpush3.msra.mxu1 %v2633_v14 }
 0x2a5   : > { %6990 = vmatmul.mubr.msk.f32.vlgmr.msra.gmra.mxu0 %vm2635_vm0, %v7934_v10  ;;  %6997 = vmatmul.mubr.msk.f32.vlgmr.msra.gmra.mxu1 %vm2635_vm0, %v7961_v16  ;;  %v8805_v10 = vld [vmem:[%s10008_s3 + $0xa8] sm:$0xf]  ;;  %v8810_v16 = vld [vmem:[%s10008_s3 + $0x50] sm:$0xf] }
 0x2a6   : > { %6999 = vmatprep.subr.mxu0 %v7803_v9  ;;  %7006 = vmatprep.subr.mxu1 %v7803_v9 }
 0x2a7   : > { %7000 = vmatpush3.msk.msra.mxu0 %vm2638_vm15, %v2634_v12  ;;  %7007 = vmatpush3.msk.msra.mxu1 %vm2638_vm15, %v2634_v12 }
 0x2a8   : > { %7001 = vmatprep.subr.mxu0 %v7803_v9  ;;  %7008 = vmatprep.subr.mxu1 %v7803_v9 }
 0x2a9   : > { %7002 = vmatpush3.msra.mxu0 %v2633_v14  ;;  %7009 = vmatpush3.msra.mxu1 %v2633_v14 }
 0x2aa   : > { %7003 = vmatprep.mubr.msk.f32.mxu0 %vm7804_vm14, %v7803_v9  ;;  %7010 = vmatprep.mubr.msk.f32.mxu1 %vm7804_vm14, %v7803_v9 }
 0x2ab   : > { %7013 = vmatprep.subr.mxu0 %v7803_v9  ;;  %7020 = vmatprep.subr.mxu1 %v7803_v9 }
 0x2ac   : > { %7004 = vmatmul.mubr.msk.f32.vlgmr.msra.gmra.mxu0 %vm2635_vm0, %v7972_v19  ;;  %7011 = vmatmul.mubr.msk.f32.vlgmr.msra.gmra.mxu1 %vm2635_vm0, %v7993_v23  ;;  %v8821_v19 = vld [vmem:[%s10008_s3 + $0xa0] sm:$0xff]  ;;  %v8826_v23 = vld [vmem:[%s10008_s3 + $0x48] sm:$0xff] }
 0x2ad   : > { %7014 = vmatpush3.msk.msra.mxu0 %vm2638_vm15, %v2634_v12  ;;  %7021 = vmatpush3.msk.msra.mxu1 %vm2638_vm15, %v2634_v12  ;;  %v5585_v12 = vld [vmem:[%s10008_s3 + $0xe0] sm:$0xff] }
 0x2ae   : > { %7015 = vmatprep.subr.mxu0 %v7803_v9  ;;  %7022 = vmatprep.subr.mxu1 %v7803_v9 }
 0x2af   : > { %7016 = vmatpush3.msra.mxu0 %v2633_v14  ;;  %7023 = vmatpush3.msra.mxu1 %v2633_v14  ;;  %v5583_v14 = vld [vmem:[%s10008_s3 + $0xd0] sm:$0xff] }
 0x2b0   : > { %7017 = vmatprep.mubr.msk.f32.mxu0 %vm7804_vm14, %v7803_v9  ;;  %7024 = vmatprep.mubr.msk.f32.mxu1 %vm7804_vm14, %v7803_v9 }
 0x2b1   : > { %7018 = vmatmul.mubr.msk.f32.vlgmr.msra.gmra.mxu0 %vm2635_vm0, %v8017_v27  ;;  %7025 = vmatmul.mubr.msk.f32.vlgmr.msra.gmra.mxu1 %vm2635_vm0, %v8026_v30  ;;  %v8837_v27 = vld [vmem:[%s10008_s3 + $0x98] sm:$0xff]  ;;  %v8842_v30 = vld [vmem:[%s10008_s3 + $0x40] sm:$0xff] }
 0x2b2   : > { %7027 = vmatprep.subr.mxu0 %v7803_v9  ;;  %7052 = vmatprep.subr.mxu1 %v7803_v9 }
 0x2b3   : > { %7028 = vmatpush3.msk.msra.mxu0 %vm3111_vm1, %v8805_v10  ;;  %7053 = vmatpush3.msk.msra.mxu1 %vm3111_vm1, %v8810_v16 }
 0x2b4   : > { %7029 = vmatprep.subr.mxu0 %v7803_v9  ;;  %7054 = vmatprep.subr.mxu1 %v7803_v9 }
 0x2b5   : > { %7030 = vmatpush3.msra.mxu0 %v8821_v19  ;;  %7055 = vmatpush3.msra.mxu1 %v8826_v23 }
 0x2b6   : > { %7031 = vmatprep.subr.mxu0 %v7803_v9  ;;  %7056 = vmatprep.subr.mxu1 %v7803_v9 }
 0x2b7   : > { %7032 = vmatpush3.msra.mxu0 %v8837_v27  ;;  %7057 = vmatpush3.msra.mxu1 %v8842_v30 }
 0x2b8   : > { %7033 = vmatprep.subr.mxu0 %v7803_v9  ;;  %7058 = vmatprep.subr.mxu1 %v7803_v9 }
 0x2b9   : > { %7034 = vmatpush3.msra.mxu0 %v8851_v15  ;;  %7059 = vmatpush3.msra.mxu1 %v8856_v17 }
 0x2ba   : > { %7035 = vmatprep.subr.mxu0 %v7803_v9  ;;  %7060 = vmatprep.subr.mxu1 %v7803_v9 }
 0x2bb   : > { %7036 = vmatpush3.msra.mxu0 %v8865_v18  ;;  %7061 = vmatpush3.msra.mxu1 %v8870_v20 }
 0x2bc   : > { %7037 = vmatprep.subr.mxu0 %v7803_v9  ;;  %7062 = vmatprep.subr.mxu1 %v7803_v9 }
 0x2bd   : > { %7038 = vmatpush3.msra.mxu0 %v8879_v21  ;;  %7063 = vmatpush3.msra.mxu1 %v8884_v22 }
 0x2be   : > { %7039 = vmatprep.subr.mxu0 %v7803_v9  ;;  %7064 = vmatprep.subr.mxu1 %v7803_v9 }
 0x2bf   : > { %7040 = vmatpush3.msra.mxu0 %v8893_v24  ;;  %7065 = vmatpush3.msra.mxu1 %v8898_v25 }
 0x2c0   : > { %7041 = vmatprep.subr.mxu0 %v7803_v9  ;;  %7066 = vmatprep.subr.mxu1 %v7803_v9 }
 0x2c1   : > { %7042 = vmatpush3.msra.mxu0 %v8907_v26  ;;  %7067 = vmatpush3.msra.mxu1 %v8912_v28 }
 0x2c2   : > { %7043 = vmatprep.subr.mxu0 %v7803_v9  ;;  %7068 = vmatprep.subr.mxu1 %v7803_v9 }
 0x2c3   : > { %7044 = vmatpush3.msra.mxu0 %v8921_v29  ;;  %7069 = vmatpush3.msra.mxu1 %v8926_v31 }
 0x2c4   : > { %7045 = vmatprep.subr.mxu0 %v7803_v9  ;;  %7070 = vmatprep.subr.mxu1 %v7803_v9 }
 0x2c5   : > { %7046 = vmatpush3.msra.mxu0 %v8935_v32  ;;  %7071 = vmatpush3.msra.mxu1 %v8940_v33 }
 0x2c6   : > { %7047 = vmatprep.subr.mxu0 %v7803_v9  ;;  %7072 = vmatprep.subr.mxu1 %v7803_v9 }
 0x2c7   : > { %7048 = vmatpush3.msra.mxu0 %v8949_v34  ;;  %7073 = vmatpush3.msra.mxu1 %v8954_v35 }
 0x2c8   : > { %7049 = vmatprep.mubr.msk.f32.mxu0 %vm7804_vm14, %v7803_v9  ;;  %7074 = vmatprep.mubr.msk.f32.mxu1 %vm7804_vm14, %v7803_v9 }
 0x2c9   : > { %7077 = vmatprep.subr.mxu0 %v7803_v9  ;;  %7102 = vmatprep.subr.mxu1 %v7803_v9 }
 0x365   : > { %v8968_v36 = vpop.f32.mrf.mxu0  ;;  %v8970_v37 = vpop.f32.mrf.mxu1 }
 0x366   : > { %7050 = vmatmul.mubr.msk.f32.vlgmr.msra.gmra.mxu0 %vm3107_vm2, %v8970_v37  ;;  %7075 = vmatmul.mubr.msk.f32.vlgmr.msra.gmra.mxu1 %vm3107_vm2, %v8968_v36 }
 0x367   : > { %7078 = vmatpush3.msk.msra.mxu0 %vm3111_vm1, %v8805_v10  ;;  %7103 = vmatpush3.msk.msra.mxu1 %vm3111_vm1, %v8810_v16  ;;  %v6991_v38 = vpop.f32.mrf.mxu0  ;;  %v6998_v39 = vpop.f32.mrf.mxu1  ;;  %v5582_v10 = vld [vmem:[%s10008_s3 + $0xc8] sm:$0xff]  ;;  %v5581_v16 = vld [vmem:[%s10008_s3 + $0xc0] sm:$0xff] }
 0x368   : > { %7079 = vmatprep.subr.mxu0 %v7803_v9  ;;  %7104 = vmatprep.subr.mxu1 %v7803_v9  ;;  %v5610_v38 = vld [vmem:[%s10008_s3 + $0x110] sm:$0xff]  ;;  %v5609_v39 = vld [vmem:[%s10008_s3 + $0x108] sm:$0xff] }
 0x369   : > { %7080 = vmatpush3.msra.mxu0 %v8821_v19  ;;  %7105 = vmatpush3.msra.mxu1 %v8826_v23  ;;  %v5580_v19 = vld [vmem:[%s10008_s3 + $0xb8] sm:$0xff]  ;;  %v5579_v23 = vld [vmem:[%s10008_s3 + $0xb0] sm:$0xff] }
 0x36a   : > { %7081 = vmatprep.subr.mxu0 %v7803_v9  ;;  %7106 = vmatprep.subr.mxu1 %v7803_v9 }
 0x36b   : > { %7082 = vmatpush3.msra.mxu0 %v8837_v27  ;;  %7107 = vmatpush3.msra.mxu1 %v8842_v30  ;;  %v5604_v27 = vld [vmem:[%s10008_s3 + $0x2b8] sm:$0xf]  ;;  %v5603_v30 = vld [vmem:[%s10008_s3 + $0x2b0] sm:$0xff] }
 0x36c   : > { %7083 = vmatprep.subr.mxu0 %v7803_v9  ;;  %7108 = vmatprep.subr.mxu1 %v7803_v9  ;;  %v8990_v40 = vpop.f32.mrf.mxu0  ;;  %v8992_v41 = vpop.f32.mrf.mxu1 }
 0x36d   : > { %7084 = vmatpush3.msra.mxu0 %v8851_v15  ;;  %7109 = vmatpush3.msra.mxu1 %v8856_v17  ;;  %v5602_v15 = vld [vmem:[%s10008_s3 + $0x2a8] sm:$0xff]  ;;  %v5601_v17 = vld [vmem:[%s10008_s3 + $0x2a0] sm:$0xff] }
 0x36e   : > { %7085 = vmatprep.subr.mxu0 %v7803_v9  ;;  %7110 = vmatprep.subr.mxu1 %v7803_v9  ;;  %v7005_v42 = vpop.f32.mrf.mxu0  ;;  %v7012_v43 = vpop.f32.mrf.mxu1 }
 0x36f   : > { %7086 = vmatpush3.msra.mxu0 %v8865_v18  ;;  %7111 = vmatpush3.msra.mxu1 %v8870_v20  ;;  %v5600_v18 = vld [vmem:[%s10008_s3 + $0x298] sm:$0xff]  ;;  %v5599_v20 = vld [vmem:[%s10008_s3 + $0x290] sm:$0xff]  ;;  %v5633_v42 = vld [vmem:[%s10008_s3 + $0x308] sm:$0xff] }
 0x370   : > { %7087 = vmatprep.subr.mxu0 %v7803_v9  ;;  %7112 = vmatprep.subr.mxu1 %v7803_v9  ;;  %v5632_v43 = vld [vmem:[%s10008_s3 + $0x300] sm:$0xff] }
 0x371   : > { %7088 = vmatpush3.msra.mxu0 %v8879_v21  ;;  %7113 = vmatpush3.msra.mxu1 %v8884_v22  ;;  %v9006_v44 = vpop.f32.mrf.mxu0  ;;  %v9192_v4 = vpop.f32.mrf.mxu1  ;;  %v5598_v21 = vld [vmem:[%s10008_s3 + $0x288] sm:$0xff]  ;;  %v5597_v22 = vld [vmem:[%s10008_s3 + $0x280] sm:$0xff] }
 0x372   : > { %7089 = vmatprep.subr.mxu0 %v7803_v9  ;;  %7114 = vmatprep.subr.mxu1 %v7803_v9 }
 0x373   : > { %7090 = vmatpush3.msra.mxu0 %v8893_v24  ;;  %7115 = vmatpush3.msra.mxu1 %v8898_v25  ;;  %v7019_v45 = vpop.f32.mrf.mxu0  ;;  %v7026_v5 = vpop.f32.mrf.mxu1  ;;  %v5596_v24 = vld [vmem:[%s10008_s3 + $0x278] sm:$0xff]  ;;  %v5595_v25 = vld [vmem:[%s10008_s3 + $0x270] sm:$0xff] }
 0x374   : > { %7091 = vmatprep.subr.mxu0 %v7803_v9  ;;  %7116 = vmatprep.subr.mxu1 %v7803_v9  ;;  %v5631_v45 = vld [vmem:[%s10008_s3 + $0x2f8] sm:$0xff] }
 0x375   : > { %7092 = vmatpush3.msra.mxu0 %v8907_v26  ;;  %7117 = vmatpush3.msra.mxu1 %v8912_v28  ;;  %v5594_v26 = vld [vmem:[%s10008_s3 + $0x268] sm:$0xff]  ;;  %v5619_v28 = vld [vmem:[%s10008_s3 + $0x158] sm:$0xf] }
 0x376   : > { %7093 = vmatprep.subr.mxu0 %v7803_v9  ;;  %7118 = vmatprep.subr.mxu1 %v7803_v9  ;;  %v5662_v5 = vld [vmem:[%s10008_s3 + $0x358] sm:$0xff] }
 0x377   : > { %7094 = vmatpush3.msra.mxu0 %v8921_v29  ;;  %7119 = vmatpush3.msra.mxu1 %v8926_v31  ;;  %v5618_v29 = vld [vmem:[%s10008_s3 + $0x150] sm:$0xff]  ;;  %v5617_v31 = vld [vmem:[%s10008_s3 + $0x148] sm:$0xff] }
 0x378   : > { %7095 = vmatprep.subr.mxu0 %v7803_v9  ;;  %7120 = vmatprep.subr.mxu1 %v7803_v9 }
 0x379   : > { %7096 = vmatpush3.msra.mxu0 %v8935_v32  ;;  %7121 = vmatpush3.msra.mxu1 %v8940_v33  ;;  %v5616_v32 = vld [vmem:[%s10008_s3 + $0x140] sm:$0xff]  ;;  %v5615_v33 = vld [vmem:[%s10008_s3 + $0x138] sm:$0xff] }
 0x37a   : > { %7097 = vmatprep.subr.mxu0 %v7803_v9  ;;  %7122 = vmatprep.subr.mxu1 %v7803_v9 }
 0x37b   : > { %7098 = vmatpush3.msra.mxu0 %v8949_v34  ;;  %7099 = vmatprep.mubr.msk.f32.mxu0 %vm7804_vm14, %v7803_v9  ;;  %v5614_v34 = vld [vmem:[%s10008_s3 + $0x130] sm:$0xff] }
 0x37c   : > { %7123 = vmatpush3.msra.mxu1 %v8954_v35  ;;  %7124 = vmatprep.mubr.msk.f32.mxu1 %vm7804_vm14, %v7803_v9  ;;  %v5613_v35 = vld [vmem:[%s10008_s3 + $0x128] sm:$0xff] }
 0x37d   : > { %7100 = vmatmul.mubr.msk.f32.vlgmr.msra.gmra.mxu0 %vm3107_vm2, %v8990_v40  ;;  %7125 = vmatmul.mubr.msk.f32.vlgmr.msra.gmra.mxu1 %vm3107_vm2, %v8970_v37 }
 0x37e   : > { %7127 = vmatprep.subr.mxu0 %v7803_v9  ;;  %7152 = vmatprep.subr.mxu1 %v7803_v9 }
 0x37f   : > { %7128 = vmatpush3.msk.msra.mxu0 %vm3111_vm1, %v9033_v46  ;;  %7153 = vmatpush3.msk.msra.mxu1 %vm3111_vm1, %v9038_v47 }
 0x380   : > { %7129 = vmatprep.subr.mxu0 %v7803_v9  ;;  %7154 = vmatprep.subr.mxu1 %v7803_v9 }
 0x381   : > { %7130 = vmatpush3.msra.mxu0 %v9049_v48  ;;  %7155 = vmatpush3.msra.mxu1 %v9054_v49 }
 0x382   : > { %7131 = vmatprep.subr.mxu0 %v7803_v9  ;;  %7156 = vmatprep.subr.mxu1 %v7803_v9 }
 0x383   : > { %7132 = vmatpush3.msra.mxu0 %v9065_v50  ;;  %7157 = vmatpush3.msra.mxu1 %v9070_v54 }
 0x384   : > { %7133 = vmatprep.subr.mxu0 %v7803_v9  ;;  %7158 = vmatprep.subr.mxu1 %v7803_v9 }
 0x385   : > { %7134 = vmatpush3.msra.mxu0 %v9079_v51  ;;  %7159 = vmatpush3.msra.mxu1 %v9084_v53 }
 0x386   : > { %7135 = vmatprep.subr.mxu0 %v7803_v9  ;;  %7160 = vmatprep.subr.mxu1 %v7803_v9 }
 0x387   : > { %7136 = vmatpush3.msra.mxu0 %v9093_v57  ;;  %7161 = vmatpush3.msra.mxu1 %v9098_v58 }
 0x388   : > { %7137 = vmatprep.subr.mxu0 %v7803_v9  ;;  %7162 = vmatprep.subr.mxu1 %v7803_v9 }
 0x389   : > { %7138 = vmatpush3.msra.mxu0 %v9107_v52  ;;  %7163 = vmatpush3.msra.mxu1 %v9112_v55 }
 0x38a   : > { %7139 = vmatprep.subr.mxu0 %v7803_v9  ;;  %7164 = vmatprep.subr.mxu1 %v7803_v9 }
 0x38b   : > { %7140 = vmatpush3.msra.mxu0 %v9121_v56  ;;  %7165 = vmatpush3.msra.mxu1 %v9126_v59 }
 0x38c   : > { %7141 = vmatprep.subr.mxu0 %v7803_v9  ;;  %7166 = vmatprep.subr.mxu1 %v7803_v9 }
 0x38d   : > { %7142 = vmatpush3.msra.mxu0 %v5563_v60  ;;  %7167 = vmatpush3.msra.mxu1 %v5533_v61 }
 0x38e   : > { %7143 = vmatprep.subr.mxu0 %v7803_v9  ;;  %7168 = vmatprep.subr.mxu1 %v7803_v9 }
 0x38f   : > { %7144 = vmatpush3.msra.mxu0 %v5562_v62  ;;  %7169 = vmatpush3.msra.mxu1 %v5532_v63 }
 0x390   : > { %7145 = vmatprep.subr.mxu0 %v7803_v9  ;;  %7170 = vmatprep.subr.mxu1 %v7803_v9 }
 0x391   : > { %7146 = vmatpush3.msra.mxu0 %v5561_v0  ;;  %7171 = vmatpush3.msra.mxu1 %v5531_v1 }
 0x392   : > { %7147 = vmatprep.subr.mxu0 %v7803_v9  ;;  %7172 = vmatprep.subr.mxu1 %v7803_v9 }
 0x393   : > { %7148 = vmatpush3.msra.mxu0 %v5560_v2  ;;  %7149 = vmatprep.mubr.msk.f32.mxu0 %vm7804_vm14, %v7803_v9 }
 0x394   : > { %7173 = vmatpush3.msra.mxu1 %v5530_v3  ;;  %7174 = vmatprep.mubr.msk.f32.mxu1 %vm7804_vm14, %v7803_v9 }
 0x395   : > { %7150 = vmatmul.mubr.msk.f32.vlgmr.msra.gmra.mxu0 %vm3107_vm2, %v8970_v37  ;;  %7175 = vmatmul.mubr.msk.f32.vlgmr.msra.gmra.mxu1 %vm3107_vm2, %v8968_v36  ;;  %v5612_v36 = vld [vmem:[%s10008_s3 + $0x120] sm:$0xff] }
 0x396   : > { %7177 = vmatprep.subr.mxu0 %v7803_v9  ;;  %7202 = vmatprep.subr.mxu1 %v7803_v9 }
 0x397   : > { %7178 = vmatpush3.msk.msra.mxu0 %vm3111_vm1, %v9033_v46  ;;  %7203 = vmatpush3.msk.msra.mxu1 %vm3111_vm1, %v9038_v47  ;;  %v5630_v46 = vld [vmem:[%s10008_s3 + $0x2f0] sm:$0xff]  ;;  %v5629_v47 = vld [vmem:[%s10008_s3 + $0x2e8] sm:$0xff] }
 0x398   : > { %7179 = vmatprep.subr.mxu0 %v7803_v9  ;;  %7204 = vmatprep.subr.mxu1 %v7803_v9 }
 0x399   : > { %7180 = vmatpush3.msra.mxu0 %v9049_v48  ;;  %7205 = vmatpush3.msra.mxu1 %v9054_v49  ;;  %v5628_v48 = vld [vmem:[%s10008_s3 + $0x2e0] sm:$0xff]  ;;  %v5627_v49 = vld [vmem:[%s10008_s3 + $0x2d8] sm:$0xff] }
 0x39a   : > { %7181 = vmatprep.subr.mxu0 %v7803_v9  ;;  %7206 = vmatprep.subr.mxu1 %v7803_v9 }
 0x39b   : > { %7182 = vmatpush3.msra.mxu0 %v9065_v50  ;;  %7207 = vmatpush3.msra.mxu1 %v9070_v54  ;;  %v5626_v50 = vld [vmem:[%s10008_s3 + $0x2d0] sm:$0xff]  ;;  %v5625_v54 = vld [vmem:[%s10008_s3 + $0x2c8] sm:$0xff] }
 0x39c   : > { %7183 = vmatprep.subr.mxu0 %v7803_v9  ;;  %7208 = vmatprep.subr.mxu1 %v7803_v9 }
 0x39d   : > { %7184 = vmatpush3.msra.mxu0 %v9079_v51  ;;  %7209 = vmatpush3.msra.mxu1 %v9084_v53  ;;  %v5624_v51 = vld [vmem:[%s10008_s3 + $0x2c0] sm:$0xff]  ;;  %v5649_v53 = vld [vmem:[%s10008_s3 + $0x1b0] sm:$0xf] }
 0x39e   : > { %7185 = vmatprep.subr.mxu0 %v7803_v9  ;;  %7210 = vmatprep.subr.mxu1 %v7803_v9 }
 0x39f   : > { %7186 = vmatpush3.msra.mxu0 %v9093_v57  ;;  %7211 = vmatpush3.msra.mxu1 %v9098_v58  ;;  %v5648_v57 = vld [vmem:[%s10008_s3 + $0x1a8] sm:$0xff]  ;;  %v5646_v58 = vld [vmem:[%s10008_s3 + $0x198] sm:$0xff] }
 0x3a0   : > { %7187 = vmatprep.subr.mxu0 %v7803_v9  ;;  %7212 = vmatprep.subr.mxu1 %v7803_v9 }
 0x3a1   : > { %7188 = vmatpush3.msra.mxu0 %v9107_v52  ;;  %7213 = vmatpush3.msra.mxu1 %v9112_v55  ;;  %v5645_v52 = vld [vmem:[%s10008_s3 + $0x190] sm:$0xff]  ;;  %v5644_v55 = vld [vmem:[%s10008_s3 + $0x188] sm:$0xff] }
 0x3a2   : > { %7189 = vmatprep.subr.mxu0 %v7803_v9  ;;  %7214 = vmatprep.subr.mxu1 %v7803_v9 }
 0x3a3   : > { %7190 = vmatpush3.msra.mxu0 %v9121_v56  ;;  %7215 = vmatpush3.msra.mxu1 %v9126_v59  ;;  %v5643_v56 = vld [vmem:[%s10008_s3 + $0x180] sm:$0xff]  ;;  %v5642_v59 = vld [vmem:[%s10008_s3 + $0x178] sm:$0xff] }
 0x3a4   : > { %7191 = vmatprep.subr.mxu0 %v7803_v9  ;;  %7216 = vmatprep.subr.mxu1 %v7803_v9 }
 0x3a5   : > { %7192 = vmatpush3.msra.mxu0 %v5563_v60  ;;  %7217 = vmatpush3.msra.mxu1 %v5533_v61  ;;  %v5641_v60 = vld [vmem:[%s10008_s3 + $0x170] sm:$0xff]  ;;  %v5640_v61 = vld [vmem:[%s10008_s3 + $0x168] sm:$0xff] }
 0x3a6   : > { %7193 = vmatprep.subr.mxu0 %v7803_v9  ;;  %7218 = vmatprep.subr.mxu1 %v7803_v9 }
 0x3a7   : > { %7194 = vmatpush3.msra.mxu0 %v5562_v62  ;;  %7219 = vmatpush3.msra.mxu1 %v5532_v63  ;;  %v5639_v62 = vld [vmem:[%s10008_s3 + $0x160] sm:$0xff]  ;;  %v5664_v63 = vld [vmem:[%s10008_s3 + $0x368] sm:$0xf] }
 0x3a8   : > { %7195 = vmatprep.subr.mxu0 %v7803_v9  ;;  %7220 = vmatprep.subr.mxu1 %v7803_v9 }
 0x3a9   : > { %7196 = vmatpush3.msra.mxu0 %v5561_v0  ;;  %7221 = vmatpush3.msra.mxu1 %v5531_v1  ;;  %v5663_v0 = vld [vmem:[%s10008_s3 + $0x360] sm:$0xff] }
 0x3aa   : > { %7197 = vmatprep.subr.mxu0 %v7803_v9  ;;  %7222 = vmatprep.subr.mxu1 %v7803_v9 }
 0x3ab   : > { %7198 = vmatpush3.msra.mxu0 %v5560_v2  ;;  %7199 = vmatprep.mubr.msk.f32.mxu0 %vm7804_vm14, %v7803_v9 }
 0x3ac   : > { %7223 = vmatpush3.msra.mxu1 %v5530_v3  ;;  %7224 = vmatprep.mubr.msk.f32.mxu1 %vm7804_vm14, %v7803_v9 }
 0x3ad   : > { %7200 = vmatmul.mubr.msk.f32.vlgmr.msra.gmra.mxu0 %vm3107_vm2, %v8990_v40  ;;  %7225 = vmatmul.mubr.msk.f32.vlgmr.msra.gmra.mxu1 %vm3107_vm2, %v8970_v37  ;;  %v5611_v37 = vld [vmem:[%s10008_s3 + $0x118] sm:$0xff] }
 0x3ae   : > { %7227 = vmatprep.subr.mxu0 %v7803_v9  ;;  %7252 = vmatprep.subr.mxu1 %v7803_v9 }
 0x3af   : > { %7228 = vmatpush3.msk.msra.mxu0 %vm3111_vm1, %v5589_v6  ;;  %7253 = vmatpush3.msk.msra.mxu1 %vm3111_vm1, %v5589_v6 }
 0x3b0   : > { %7229 = vmatprep.subr.mxu0 %v7803_v9  ;;  %7254 = vmatprep.subr.mxu1 %v7803_v9 }
 0x3b1   : > { %7230 = vmatpush3.msra.mxu0 %v5588_v7  ;;  %7255 = vmatpush3.msra.mxu1 %v5588_v7 }
 0x3b2   : > { %7231 = vmatprep.subr.mxu0 %v7803_v9  ;;  %7256 = vmatprep.subr.mxu1 %v7803_v9 }
 0x3b3   : > { %7232 = vmatpush3.msra.mxu0 %v5587_v8  ;;  %7257 = vmatpush3.msra.mxu1 %v5587_v8  ;;  %v5661_v8 = vld [vmem:[%s10008_s3 + $0x350] sm:$0xff] }
 0x3b4   : > { %7233 = vmatprep.subr.mxu0 %v7803_v9  ;;  %7258 = vmatprep.subr.mxu1 %v7803_v9 }
 0x3b5   : > { %7234 = vmatpush3.msra.mxu0 %v5586_v11  ;;  %7259 = vmatpush3.msra.mxu1 %v5586_v11  ;;  %v5660_v11 = vld [vmem:[%s10008_s3 + $0x348] sm:$0xff] }
 0x3b6   : > { %7235 = vmatprep.subr.mxu0 %v7803_v9  ;;  %7260 = vmatprep.subr.mxu1 %v7803_v9 }
 0x3b7   : > { %7236 = vmatpush3.msra.mxu0 %v5585_v12  ;;  %7261 = vmatpush3.msra.mxu1 %v5585_v12  ;;  %v5659_v12 = vld [vmem:[%s10008_s3 + $0x340] sm:$0xff] }
 0x3b8   : > { %7237 = vmatprep.subr.mxu0 %v7803_v9  ;;  %7262 = vmatprep.subr.mxu1 %v7803_v9 }
 0x3b9   : > { %7238 = vmatpush3.msra.mxu0 %v5584_v13  ;;  %7263 = vmatpush3.msra.mxu1 %v5584_v13  ;;  %v5658_v13 = vld [vmem:[%s10008_s3 + $0x338] sm:$0xff] }
 0x3ba   : > { %7239 = vmatprep.subr.mxu0 %v7803_v9  ;;  %7264 = vmatprep.subr.mxu1 %v7803_v9 }
 0x3bb   : > { %7240 = vmatpush3.msra.mxu0 %v5583_v14  ;;  %7265 = vmatpush3.msra.mxu1 %v5583_v14  ;;  %v5657_v14 = vld [vmem:[%s10008_s3 + $0x330] sm:$0xff] }
 0x3bc   : > { %7241 = vmatprep.subr.mxu0 %v7803_v9  ;;  %7266 = vmatprep.subr.mxu1 %v7803_v9 }
 0x3bd   : > { %7242 = vmatpush3.msra.mxu0 %v5582_v10  ;;  %7267 = vmatpush3.msra.mxu1 %v5582_v10  ;;  %v5656_v10 = vld [vmem:[%s10008_s3 + $0x328] sm:$0xff] }
 0x3be   : > { %7243 = vmatprep.subr.mxu0 %v7803_v9  ;;  %7268 = vmatprep.subr.mxu1 %v7803_v9 }
 0x3bf   : > { %7244 = vmatpush3.msra.mxu0 %v5581_v16  ;;  %7269 = vmatpush3.msra.mxu1 %v5581_v16  ;;  %v5655_v16 = vld [vmem:[%s10008_s3 + $0x320] sm:$0xff] }
 0x3c0   : > { %7245 = vmatprep.subr.mxu0 %v7803_v9  ;;  %7270 = vmatprep.subr.mxu1 %v7803_v9 }
 0x3c1   : > { %7246 = vmatpush3.msra.mxu0 %v5580_v19  ;;  %7271 = vmatpush3.msra.mxu1 %v5580_v19  ;;  %v5654_v19 = vld [vmem:[%s10008_s3 + $0x318] sm:$0xff] }
 0x3c2   : > { %7247 = vmatprep.subr.mxu0 %v7803_v9  ;;  %7272 = vmatprep.subr.mxu1 %v7803_v9 }
 0x3c3   : > { %7248 = vmatpush3.msra.mxu0 %v5579_v23  ;;  %7249 = vmatprep.mubr.msk.f32.mxu0 %vm7804_vm14, %v7803_v9 }
 0x3c4   : > { %7273 = vmatpush3.msra.mxu1 %v5579_v23  ;;  %7274 = vmatprep.mubr.msk.f32.mxu1 %vm7804_vm14, %v7803_v9 }
 0x3c5   : > { %7250 = vmatmul.mubr.msk.f32.vlgmr.msra.gmra.mxu0 %vm3107_vm2, %v8990_v40  ;;  %7275 = vmatmul.mubr.msk.f32.vlgmr.msra.gmra.mxu1 %vm3107_vm2, %v8992_v41 }
 0x3c6   : > { %7277 = vmatprep.subr.mxu0 %v7803_v9  ;;  %7302 = vmatprep.subr.mxu1 %v7803_v9 }
 0x3c7   : > { %7278 = vmatpush3.msk.msra.mxu0 %vm3111_vm1, %v5604_v27  ;;  %7303 = vmatpush3.msk.msra.mxu1 %vm3111_vm1, %v5604_v27 }
 0x3c8   : > { %7279 = vmatprep.subr.mxu0 %v7803_v9  ;;  %7304 = vmatprep.subr.mxu1 %v7803_v9 }
 0x3c9   : > { %7280 = vmatpush3.msra.mxu0 %v5603_v30  ;;  %7305 = vmatpush3.msra.mxu1 %v5603_v30 }
 0x3ca   : > { %7281 = vmatprep.subr.mxu0 %v7803_v9  ;;  %7306 = vmatprep.subr.mxu1 %v7803_v9 }
 0x3cb   : > { %7282 = vmatpush3.msra.mxu0 %v5602_v15  ;;  %7307 = vmatpush3.msra.mxu1 %v5602_v15 }
 0x3cc   : > { %7283 = vmatprep.subr.mxu0 %v7803_v9  ;;  %7308 = vmatprep.subr.mxu1 %v7803_v9 }
 0x3cd   : > { %7284 = vmatpush3.msra.mxu0 %v5601_v17  ;;  %7309 = vmatpush3.msra.mxu1 %v5601_v17 }
 0x3ce   : > { %7285 = vmatprep.subr.mxu0 %v7803_v9  ;;  %7310 = vmatprep.subr.mxu1 %v7803_v9 }
 0x3cf   : > { %7286 = vmatpush3.msra.mxu0 %v5600_v18  ;;  %7311 = vmatpush3.msra.mxu1 %v5600_v18 }
 0x3d0   : > { %7287 = vmatprep.subr.mxu0 %v7803_v9  ;;  %7312 = vmatprep.subr.mxu1 %v7803_v9 }
 0x3d1   : > { %7288 = vmatpush3.msra.mxu0 %v5599_v20  ;;  %7313 = vmatpush3.msra.mxu1 %v5599_v20 }
 0x3d2   : > { %7289 = vmatprep.subr.mxu0 %v7803_v9  ;;  %7314 = vmatprep.subr.mxu1 %v7803_v9 }
 0x3d3   : > { %7290 = vmatpush3.msra.mxu0 %v5598_v21  ;;  %7315 = vmatpush3.msra.mxu1 %v5598_v21 }
 0x3d4   : > { %7291 = vmatprep.subr.mxu0 %v7803_v9  ;;  %7316 = vmatprep.subr.mxu1 %v7803_v9 }
 0x3d5   : > { %7292 = vmatpush3.msra.mxu0 %v5597_v22  ;;  %7317 = vmatpush3.msra.mxu1 %v5597_v22  ;;  %v4674_v22 = vld [vmem:[%s10010_s5 + $0x48] sm:$0xff] }
 0x3d6   : > { %7293 = vmatprep.subr.mxu0 %v7803_v9  ;;  %7318 = vmatprep.subr.mxu1 %v7803_v9 }
 0x3d7   : > { %7294 = vmatpush3.msra.mxu0 %v5596_v24  ;;  %7319 = vmatpush3.msra.mxu1 %v5596_v24  ;;  %v5679_v24 = vld [vmem:[%s10010_s5 + $0x98] sm:$0xff] }
 0x3d8   : > { %7295 = vmatprep.subr.mxu0 %v7803_v9  ;;  %7320 = vmatprep.subr.mxu1 %v7803_v9 }
 0x3d9   : > { %7296 = vmatpush3.msra.mxu0 %v5595_v25  ;;  %7321 = vmatpush3.msra.mxu1 %v5595_v25  ;;  %v4673_v25 = vld [vmem:[%s10010_s5 + $0x40] sm:$0xff] }
 0x3da   : > { %7297 = vmatprep.subr.mxu0 %v7803_v9  ;;  %7322 = vmatprep.subr.mxu1 %v7803_v9 }
 0x3db   : > { %7298 = vmatpush3.msra.mxu0 %v5594_v26  ;;  %7299 = vmatprep.mubr.msk.f32.mxu0 %vm7804_vm14, %v7803_v9 }
 0x3dc   : > { %7323 = vmatpush3.msra.mxu1 %v5594_v26  ;;  %7324 = vmatprep.mubr.msk.f32.mxu1 %vm7804_vm14, %v7803_v9  ;;  %v5678_v26 = vld [vmem:[%s10010_s5 + $0x90] sm:$0xff] }
 0x3dd   : > { %7300 = vmatmul.mubr.msk.f32.vlgmr.msra.gmra.mxu0 %vm3107_vm2, %v8990_v40  ;;  %7325 = vmatmul.mubr.msk.f32.vlgmr.msra.gmra.mxu1 %vm3107_vm2, %v8992_v41  ;;  %v5634_v40 = vld [vmem:[%s10008_s3 + $0x310] sm:$0xf] }
 0x3de   : > { %7327 = vmatprep.subr.mxu0 %v7803_v9  ;;  %7352 = vmatprep.subr.mxu1 %v7803_v9 }
 0x3df   : > { %7328 = vmatpush3.msk.msra.mxu0 %vm3111_vm1, %v5619_v28  ;;  %7353 = vmatpush3.msk.msra.mxu1 %vm3111_vm1, %v5619_v28  ;;  %v4672_v28 = vld [vmem:[%s10010_s5 + $0x38] sm:$0xff] }
 0x3e0   : > { %7329 = vmatprep.subr.mxu0 %v7803_v9  ;;  %7354 = vmatprep.subr.mxu1 %v7803_v9 }
 0x3e1   : > { %7330 = vmatpush3.msra.mxu0 %v5618_v29  ;;  %7355 = vmatpush3.msra.mxu1 %v5618_v29  ;;  %v5677_v29 = vld [vmem:[%s10010_s5 + $0x88] sm:$0xff] }
 0x3e2   : > { %7331 = vmatprep.subr.mxu0 %v7803_v9  ;;  %7356 = vmatprep.subr.mxu1 %v7803_v9 }
 0x3e3   : > { %7332 = vmatpush3.msra.mxu0 %v5617_v31  ;;  %7357 = vmatpush3.msra.mxu1 %v5617_v31  ;;  %v4671_v31 = vld [vmem:[%s10010_s5 + $0x30] sm:$0xff] }
 0x3e4   : > { %7333 = vmatprep.subr.mxu0 %v7803_v9  ;;  %7358 = vmatprep.subr.mxu1 %v7803_v9 }
 0x3e5   : > { %7334 = vmatpush3.msra.mxu0 %v5616_v32  ;;  %7359 = vmatpush3.msra.mxu1 %v5616_v32  ;;  %v5676_v32 = vld [vmem:[%s10010_s5 + $0x80] sm:$0xff] }
 0x3e6   : > { %7335 = vmatprep.subr.mxu0 %v7803_v9  ;;  %7360 = vmatprep.subr.mxu1 %v7803_v9 }
 0x3e7   : > { %7336 = vmatpush3.msra.mxu0 %v5615_v33  ;;  %7361 = vmatpush3.msra.mxu1 %v5615_v33 }
 0x3e8   : > { %7337 = vmatprep.subr.mxu0 %v7803_v9  ;;  %7362 = vmatprep.subr.mxu1 %v7803_v9 }
 0x3e9   : > { %7338 = vmatpush3.msra.mxu0 %v5614_v34  ;;  %7363 = vmatpush3.msra.mxu1 %v5614_v34 }
 0x3ea   : > { %7339 = vmatprep.subr.mxu0 %v7803_v9  ;;  %7364 = vmatprep.subr.mxu1 %v7803_v9 }
 0x3eb   : > { %7340 = vmatpush3.msra.mxu0 %v5613_v35  ;;  %7365 = vmatpush3.msra.mxu1 %v5613_v35  ;;  %v4670_v35 = vld [vmem:[%s10010_s5 + $0x28] sm:$0xff] }
 0x3ec   : > { %7341 = vmatprep.subr.mxu0 %v7803_v9  ;;  %7366 = vmatprep.subr.mxu1 %v7803_v9 }
 0x3ed   : > { %7342 = vmatpush3.msra.mxu0 %v5612_v36  ;;  %7367 = vmatpush3.msra.mxu1 %v5612_v36 }
 0x3ee   : > { %7343 = vmatprep.subr.mxu0 %v7803_v9  ;;  %7368 = vmatprep.subr.mxu1 %v7803_v9 }
 0x3ef   : > { %7344 = vmatpush3.msra.mxu0 %v5611_v37  ;;  %7369 = vmatpush3.msra.mxu1 %v5611_v37 }
 0x3f0   : > { %7345 = vmatprep.subr.mxu0 %v7803_v9  ;;  %7370 = vmatprep.subr.mxu1 %v7803_v9 }
 0x3f1   : > { %7346 = vmatpush3.msra.mxu0 %v5610_v38  ;;  %7371 = vmatpush3.msra.mxu1 %v5610_v38 }
 0x3f2   : > { %7347 = vmatprep.subr.mxu0 %v7803_v9  ;;  %7372 = vmatprep.subr.mxu1 %v7803_v9 }
 0x3f3   : > { %7348 = vmatpush3.msra.mxu0 %v5609_v39  ;;  %7349 = vmatprep.mubr.msk.f32.mxu0 %vm7804_vm14, %v7803_v9 }
 0x3f4   : > { %7373 = vmatpush3.msra.mxu1 %v5609_v39  ;;  %7374 = vmatprep.mubr.msk.f32.mxu1 %vm7804_vm14, %v7803_v9  ;;  %v5675_v39 = vld [vmem:[%s10010_s5 + $0x78] sm:$0xff] }
 0x3f5   : > { %7350 = vmatmul.mubr.msk.f32.vlgmr.msra.gmra.mxu0 %vm3107_vm2, %v8992_v41  ;;  %7375 = vmatmul.mubr.msk.f32.vlgmr.msra.gmra.mxu1 %vm3107_vm2, %v9006_v44 }
 0x3f6   : > { %7377 = vmatprep.subr.mxu0 %v7803_v9  ;;  %7402 = vmatprep.subr.mxu1 %v7803_v9 }
 0x3f7   : > { %7378 = vmatpush3.msk.msra.mxu0 %vm3111_vm1, %v5634_v40  ;;  %7403 = vmatpush3.msk.msra.mxu1 %vm3111_vm1, %v5634_v40  ;;  %v4669_v40 = vld [vmem:[%s10010_s5 + $0x20] sm:$0xff] }
 0x3f8   : > { %7379 = vmatprep.subr.mxu0 %v7803_v9  ;;  %7404 = vmatprep.subr.mxu1 %v7803_v9 }
 0x3f9   : > { %7380 = vmatpush3.msra.mxu0 %v5633_v42  ;;  %7405 = vmatpush3.msra.mxu1 %v5633_v42  ;;  %v5674_v42 = vld [vmem:[%s10010_s5 + $0x70] sm:$0xff] }
 0x3fa   : > { %7381 = vmatprep.subr.mxu0 %v7803_v9  ;;  %7406 = vmatprep.subr.mxu1 %v7803_v9 }
 0x3fb   : > { %7382 = vmatpush3.msra.mxu0 %v5632_v43  ;;  %7407 = vmatpush3.msra.mxu1 %v5632_v43  ;;  %v4668_v43 = vld [vmem:[%s10010_s5 + $0x18] sm:$0xff] }
 0x3fc   : > { %7383 = vmatprep.subr.mxu0 %v7803_v9  ;;  %7408 = vmatprep.subr.mxu1 %v7803_v9 }
 0x3fd   : > { %7384 = vmatpush3.msra.mxu0 %v5631_v45  ;;  %7409 = vmatpush3.msra.mxu1 %v5631_v45  ;;  %v5673_v45 = vld [vmem:[%s10010_s5 + $0x68] sm:$0xff] }
 0x3fe   : > { %7385 = vmatprep.subr.mxu0 %v7803_v9  ;;  %7410 = vmatprep.subr.mxu1 %v7803_v9 }
 0x3ff   : > { %7386 = vmatpush3.msra.mxu0 %v5630_v46  ;;  %7411 = vmatpush3.msra.mxu1 %v5630_v46  ;;  %v4667_v46 = vld [vmem:[%s10010_s5 + $0x10] sm:$0xff] }
 0x400   : > { %7387 = vmatprep.subr.mxu0 %v7803_v9  ;;  %7412 = vmatprep.subr.mxu1 %v7803_v9 }
 0x401   : > { %7388 = vmatpush3.msra.mxu0 %v5629_v47  ;;  %7413 = vmatpush3.msra.mxu1 %v5629_v47  ;;  %v5672_v47 = vld [vmem:[%s10010_s5 + $0x60] sm:$0xff] }
 0x402   : > { %7389 = vmatprep.subr.mxu0 %v7803_v9  ;;  %7414 = vmatprep.subr.mxu1 %v7803_v9 }
 0x403   : > { %7390 = vmatpush3.msra.mxu0 %v5628_v48  ;;  %7415 = vmatpush3.msra.mxu1 %v5628_v48  ;;  %v4666_v48 = vld [vmem:[%s10010_s5 + $0x8] sm:$0xff] }
 0x404   : > { %7391 = vmatprep.subr.mxu0 %v7803_v9  ;;  %7416 = vmatprep.subr.mxu1 %v7803_v9 }
 0x405   : > { %7392 = vmatpush3.msra.mxu0 %v5627_v49  ;;  %7417 = vmatpush3.msra.mxu1 %v5627_v49 }
 0x406   : > { %7393 = vmatprep.subr.mxu0 %v7803_v9  ;;  %7418 = vmatprep.subr.mxu1 %v7803_v9 }
 0x407   : > { %7394 = vmatpush3.msra.mxu0 %v5626_v50  ;;  %7419 = vmatpush3.msra.mxu1 %v5626_v50 }
 0x408   : > { %7395 = vmatprep.subr.mxu0 %v7803_v9  ;;  %7420 = vmatprep.subr.mxu1 %v7803_v9 }
 0x409   : > { %7396 = vmatpush3.msra.mxu0 %v5625_v54  ;;  %7421 = vmatpush3.msra.mxu1 %v5625_v54  ;;  %v5671_v54 = vld [vmem:[%s10010_s5 + $0x58] sm:$0xff] }
 0x40a   : > { %7397 = vmatprep.subr.mxu0 %v7803_v9  ;;  %7422 = vmatprep.subr.mxu1 %v7803_v9 }
 0x40b   : > { %7398 = vmatpush3.msra.mxu0 %v5624_v51  ;;  %7399 = vmatprep.mubr.msk.f32.mxu0 %vm7804_vm14, %v7803_v9 }
 0x40c   : > { %7423 = vmatpush3.msra.mxu1 %v5624_v51  ;;  %7424 = vmatprep.mubr.msk.f32.mxu1 %vm7804_vm14, %v7803_v9  ;;  %v4665_v51 = vld [vmem:[%s10010_s5] sm:$0xff] }
 0x40d   : > { %7400 = vmatmul.mubr.msk.f32.vlgmr.msra.gmra.mxu0 %vm3107_vm2, %v8992_v41  ;;  %7425 = vmatmul.mubr.msk.f32.vlgmr.msra.gmra.mxu1 %vm3107_vm2, %v9006_v44  ;;  %v5647_v41 = vld [vmem:[%s10008_s3 + $0x1a0] sm:$0xff] }
 0x40e   : > { %7427 = vmatprep.subr.mxu0 %v7803_v9  ;;  %7452 = vmatprep.subr.mxu1 %v7803_v9 }
 0x40f   : > { %7428 = vmatpush3.msk.msra.mxu0 %vm3111_vm1, %v5649_v53  ;;  %7453 = vmatpush3.msk.msra.mxu1 %vm3111_vm1, %v5649_v53 }
 0x410   : > { %7429 = vmatprep.subr.mxu0 %v7803_v9  ;;  %7454 = vmatprep.subr.mxu1 %v7803_v9 }
 0x411   : > { %7430 = vmatpush3.msra.mxu0 %v5648_v57  ;;  %7455 = vmatpush3.msra.mxu1 %v5648_v57 }
 0x412   : > { %7431 = vmatprep.subr.mxu0 %v7803_v9  ;;  %7456 = vmatprep.subr.mxu1 %v7803_v9 }
 0x413   : > { %7432 = vmatpush3.msra.mxu0 %v5647_v41  ;;  %7457 = vmatpush3.msra.mxu1 %v5647_v41  ;;  %v5670_v41 = vld [vmem:[%s10010_s5 + $0x50] sm:$0xff] }
 0x414   : > { %7433 = vmatprep.subr.mxu0 %v7803_v9  ;;  %7458 = vmatprep.subr.mxu1 %v7803_v9 }
 0x415   : > { %7434 = vmatpush3.msra.mxu0 %v5646_v58  ;;  %7459 = vmatpush3.msra.mxu1 %v5646_v58 }
 0x416   : > { %7435 = vmatprep.subr.mxu0 %v7803_v9  ;;  %7460 = vmatprep.subr.mxu1 %v7803_v9 }
 0x417   : > { %7436 = vmatpush3.msra.mxu0 %v5645_v52  ;;  %7461 = vmatpush3.msra.mxu1 %v5645_v52 }
 0x418   : > { %7437 = vmatprep.subr.mxu0 %v7803_v9  ;;  %7462 = vmatprep.subr.mxu1 %v7803_v9 }
 0x419   : > { %7438 = vmatpush3.msra.mxu0 %v5644_v55  ;;  %7463 = vmatpush3.msra.mxu1 %v5644_v55 }
 0x41a   : > { %7439 = vmatprep.subr.mxu0 %v7803_v9  ;;  %7464 = vmatprep.subr.mxu1 %v7803_v9 }
 0x41b   : > { %7440 = vmatpush3.msra.mxu0 %v5643_v56  ;;  %7465 = vmatpush3.msra.mxu1 %v5643_v56 }
 0x41c   : > { %7441 = vmatprep.subr.mxu0 %v7803_v9  ;;  %7466 = vmatprep.subr.mxu1 %v7803_v9 }
 0x41d   : > { %7442 = vmatpush3.msra.mxu0 %v5642_v59  ;;  %7467 = vmatpush3.msra.mxu1 %v5642_v59 }
 0x41e   : > { %7443 = vmatprep.subr.mxu0 %v7803_v9  ;;  %7468 = vmatprep.subr.mxu1 %v7803_v9 }
 0x41f   : > { %7444 = vmatpush3.msra.mxu0 %v5641_v60  ;;  %7469 = vmatpush3.msra.mxu1 %v5641_v60 }
 0x420   : > { %7445 = vmatprep.subr.mxu0 %v7803_v9  ;;  %7470 = vmatprep.subr.mxu1 %v7803_v9 }
 0x421   : > { %7446 = vmatpush3.msra.mxu0 %v5640_v61  ;;  %7471 = vmatpush3.msra.mxu1 %v5640_v61 }
 0x422   : > { %7447 = vmatprep.subr.mxu0 %v7803_v9  ;;  %7472 = vmatprep.subr.mxu1 %v7803_v9 }
 0x423   : > { %7448 = vmatpush3.msra.mxu0 %v5639_v62  ;;  %7449 = vmatprep.mubr.msk.f32.mxu0 %vm7804_vm14, %v7803_v9 }
 0x424   : > { %7473 = vmatpush3.msra.mxu1 %v5639_v62  ;;  %7474 = vmatprep.mubr.msk.f32.mxu1 %vm7804_vm14, %v7803_v9 }
 0x425   : > { %7450 = vmatmul.mubr.msk.f32.vlgmr.msra.gmra.mxu0 %vm3107_vm2, %v9006_v44  ;;  %7475 = vmatmul.mubr.msk.f32.vlgmr.msra.gmra.mxu1 %vm3107_vm2, %v9192_v4 }
 0x426   : > { %7477 = vmatprep.subr.mxu0 %v7803_v9  ;;  %7502 = vmatprep.subr.mxu1 %v7803_v9  ;;  %v3181_v1 = vpop.f32.mrf.mxu0  ;;  %v3257_v2 = vpop.f32.mrf.mxu1 }
 0x427   : > { %7478 = vmatpush3.msk.msra.mxu0 %vm3111_vm1, %v5664_v63  ;;  %7503 = vmatpush3.msk.msra.mxu1 %vm3111_vm1, %v5664_v63  ;;  %v9557_v3 = vadd.f32 %v3257_v2, %v3181_v1 }
 0x428   : > { %7479 = vmatprep.subr.mxu0 %v7803_v9  ;;  %7504 = vmatprep.subr.mxu1 %v7803_v9  ;;  %v7051_v6 = vpop.f32.mrf.mxu0  ;;  %v7076_v7 = vpop.f32.mrf.mxu1 }
 0x429   : > { %7480 = vmatpush3.msra.mxu0 %v5663_v0  ;;  %7505 = vmatpush3.msra.mxu1 %v5663_v0 }
 0x42a   : > { %7481 = vmatprep.subr.mxu0 %v7803_v9  ;;  %7506 = vmatprep.subr.mxu1 %v7803_v9 }
 0x42b   : > { %7482 = vmatpush3.msra.mxu0 %v5662_v5  ;;  %7507 = vmatpush3.msra.mxu1 %v5662_v5 }
 0x42c   : > { %7483 = vmatprep.subr.mxu0 %v7803_v9  ;;  %7508 = vmatprep.subr.mxu1 %v7803_v9 }
 0x42d   : > { %7484 = vmatpush3.msra.mxu0 %v5661_v8  ;;  %7509 = vmatpush3.msra.mxu1 %v5661_v8 }
 0x42e   : > { %7485 = vmatprep.subr.mxu0 %v7803_v9  ;;  %7510 = vmatprep.subr.mxu1 %v7803_v9 }
 0x42f   : > { %7486 = vmatpush3.msra.mxu0 %v5660_v11  ;;  %7511 = vmatpush3.msra.mxu1 %v5660_v11 }
 0x430   : > { %7487 = vmatprep.subr.mxu0 %v7803_v9  ;;  %7512 = vmatprep.subr.mxu1 %v7803_v9 }
 0x431   : > { %7488 = vmatpush3.msra.mxu0 %v5659_v12  ;;  %7513 = vmatpush3.msra.mxu1 %v5659_v12 }
 0x432   : > { %7489 = vmatprep.subr.mxu0 %v7803_v9  ;;  %7514 = vmatprep.subr.mxu1 %v7803_v9 }
 0x433   : > { %7490 = vmatpush3.msra.mxu0 %v5658_v13  ;;  %7515 = vmatpush3.msra.mxu1 %v5658_v13 }
 0x434   : > { %7491 = vmatprep.subr.mxu0 %v7803_v9  ;;  %7516 = vmatprep.subr.mxu1 %v7803_v9 }
 0x435   : > { %7492 = vmatpush3.msra.mxu0 %v5657_v14  ;;  %7517 = vmatpush3.msra.mxu1 %v5657_v14 }
 0x436   : > { %7493 = vmatprep.subr.mxu0 %v7803_v9  ;;  %7518 = vmatprep.subr.mxu1 %v7803_v9 }
 0x437   : > { %7494 = vmatpush3.msra.mxu0 %v5656_v10  ;;  %7519 = vmatpush3.msra.mxu1 %v5656_v10 }
 0x438   : > { %7495 = vmatprep.subr.mxu0 %v7803_v9  ;;  %7520 = vmatprep.subr.mxu1 %v7803_v9 }
 0x439   : > { %7496 = vmatpush3.msra.mxu0 %v5655_v16  ;;  %7521 = vmatpush3.msra.mxu1 %v5655_v16 }
 0x43a   : > { %7497 = vmatprep.subr.mxu0 %v7803_v9  ;;  %7522 = vmatprep.subr.mxu1 %v7803_v9 }
 0x43b   : > { %7498 = vmatpush3.msra.mxu0 %v5654_v19  ;;  %7499 = vmatprep.mubr.msk.f32.mxu0 %vm7804_vm14, %v7803_v9 }
 0x43c   : > { %7523 = vmatpush3.msra.mxu1 %v5654_v19  ;;  %7524 = vmatprep.mubr.msk.f32.mxu1 %vm7804_vm14, %v7803_v9 }
 0x43d   : > { %7500 = vmatmul.mubr.msk.f32.vlgmr.msra.gmra.mxu0 %vm3107_vm2, %v9006_v44  ;;  %7525 = vmatmul.mubr.msk.f32.vlgmr.msra.gmra.mxu1 %vm3107_vm2, %v9192_v4  ;;  %v3330_v23 = vpop.f32.mrf.mxu0  ;;  %v3400_v27 = vpop.f32.mrf.mxu1 }
 0x43e   : > { %v9614_v30 = vadd.f32 %v3400_v27, %v3330_v23  ;;  %7550 = vmatprep.subr.mxu1 %v7803_v9  ;;  %7527 = vmatprep.subr.mxu0 %v7803_v9 }
 0x43f   : > { %v7101_v15 = vpop.f32.mrf.mxu0  ;;  %v7126_v17 = vpop.f32.mrf.mxu1  ;;  %7570 = vmatprep.mubr.msk.f32.mxu1 %vm7804_vm14, %v7803_v9  ;;  %7547 = vmatprep.mubr.msk.f32.mxu0 %vm7804_vm14, %v7803_v9 }
 0x440   : > { %7551 = vmatpush3.msra.mxu1 %v4674_v22  ;;  %7528 = vmatpush3.msra.mxu0 %v5679_v24  ;;  %v5669_v22 = vld [vmem:[%s10009_s4] ss:$0 sm:$0xff] }
 0x441   : > { %7552 = vmatprep.subr.mxu1 %v7803_v9  ;;  %7529 = vmatprep.subr.mxu0 %v7803_v9 }
 0x442   : > { %7553 = vmatpush3.msra.mxu1 %v4673_v25  ;;  %7530 = vmatpush3.msra.mxu0 %v5678_v26 }
 0x443   : > { %7554 = vmatprep.subr.mxu1 %v7803_v9  ;;  %7531 = vmatprep.subr.mxu0 %v7803_v9 }
 0x444   : > { %7555 = vmatpush3.msra.mxu1 %v4672_v28  ;;  %7532 = vmatpush3.msra.mxu0 %v5677_v29  ;;  %v5702_v28 = vld [vmem:[%s10010_s5 + $0x138] sm:$0xff] }
 0x445   : > { %7556 = vmatprep.subr.mxu1 %v7803_v9  ;;  %7533 = vmatprep.subr.mxu0 %v7803_v9 }
 0x446   : > { %7557 = vmatpush3.msra.mxu1 %v4671_v31  ;;  %7534 = vmatpush3.msra.mxu0 %v5676_v32  ;;  %v5691_v31 = vld [vmem:[%s10010_s5 + $0xe8] sm:$0xff]  ;;  %v5701_v32 = vld [vmem:[%s10010_s5 + $0x130] sm:$0xff] }
 0x447   : > { %7558 = vmatprep.subr.mxu1 %v7803_v9  ;;  %7535 = vmatprep.subr.mxu0 %v7803_v9 }
 0x448   : > { %7559 = vmatpush3.msra.mxu1 %v4670_v35  ;;  %7536 = vmatpush3.msra.mxu0 %v5675_v39  ;;  %v5689_v35 = vld [vmem:[%s10010_s5 + $0xd8] sm:$0xff]  ;;  %v5687_v39 = vld [vmem:[%s10010_s5 + $0xc8] sm:$0xff] }
 0x449   : > { %7560 = vmatprep.subr.mxu1 %v7803_v9  ;;  %7537 = vmatprep.subr.mxu0 %v7803_v9 }
 0x44a   : > { %7561 = vmatpush3.msra.mxu1 %v4669_v40  ;;  %7538 = vmatpush3.msra.mxu0 %v5674_v42  ;;  %v5697_v40 = vld [vmem:[%s10010_s5 + $0x110] sm:$0xff]  ;;  %v5686_v42 = vld [vmem:[%s10010_s5 + $0xc0] sm:$0xff] }
 0x44b   : > { %7562 = vmatprep.subr.mxu1 %v7803_v9  ;;  %7539 = vmatprep.subr.mxu0 %v7803_v9 }
 0x44c   : > { %7563 = vmatpush3.msra.mxu1 %v4668_v43  ;;  %7540 = vmatpush3.msra.mxu0 %v5673_v45  ;;  %v5696_v43 = vld [vmem:[%s10010_s5 + $0x108] sm:$0xff]  ;;  %v5685_v45 = vld [vmem:[%s10010_s5 + $0xb8] sm:$0xff] }
 0x44d   : > { %7564 = vmatprep.subr.mxu1 %v7803_v9  ;;  %7541 = vmatprep.subr.mxu0 %v7803_v9 }
 0x44e   : > { %7565 = vmatpush3.msra.mxu1 %v4667_v46  ;;  %7542 = vmatpush3.msra.mxu0 %v5672_v47  ;;  %v5695_v46 = vld [vmem:[%s10010_s5 + $0x100] sm:$0xff]  ;;  %v5684_v47 = vld [vmem:[%s10010_s5 + $0xb0] sm:$0xff] }
 0x44f   : > { %7566 = vmatprep.subr.mxu1 %v7803_v9  ;;  %7543 = vmatprep.subr.mxu0 %v7803_v9 }
 0x450   : > { %7567 = vmatpush3.msra.mxu1 %v4666_v48  ;;  %7544 = vmatpush3.msra.mxu0 %v5671_v54  ;;  %v5694_v48 = vld [vmem:[%s10010_s5 + $0xf8] sm:$0xff] }
 0x451   : > { %7568 = vmatprep.subr.mxu1 %v7803_v9  ;;  %7545 = vmatprep.subr.mxu0 %v7803_v9 }
 0x452   : > { %7569 = vmatpush3.msra.mxu1 %v4665_v51  ;;  %7546 = vmatpush3.msra.mxu0 %v5670_v41  ;;  %v5682_v51 = vld [vmem:[%s10010_s5 + $0xa0] sm:$0xff] }
 0x453   : > { %7596 = vmatprep.subr.mxu1 %v7803_v9  ;;  %7573 = vmatprep.subr.mxu0 %v7803_v9  ;;  %v5712_v41 = vld [vmem:[%s10010_s5 + $0x180] sm:$0xff] }
 0x455   : > { %v3485_v44 = vpop.f32.mrf.mxu0  ;;  %v3558_v18 = vpop.f32.mrf.mxu1 }
 0x456   : > { %v9622_v20 = vadd.f32 %v3558_v18, %v3485_v44 }
 0x457   : > { %v7151_v4 = vpop.f32.mrf.mxu0  ;;  %v7176_v21 = vpop.f32.mrf.mxu1 }
 0x46d   : > { %v3628_v33 = vpop.f32.mrf.mxu0  ;;  %v3698_v34 = vpop.f32.mrf.mxu1 }
 0x46e   : > { %v3699_v36 = vadd.f32 %v3698_v34, %v3628_v33  ;;  %v5690_v33 = vld [vmem:[%s10010_s5 + $0xe0] sm:$0xff]  ;;  %v5700_v34 = vld [vmem:[%s10010_s5 + $0x128] sm:$0xff] }
 0x46f   : > { %v7201_v37 = vpop.f32.mrf.mxu0  ;;  %v7226_v38 = vpop.f32.mrf.mxu1 }
 0x470   : > { %v5688_v37 = vld [vmem:[%s10010_s5 + $0xd0] sm:$0xff]  ;;  %v5698_v38 = vld [vmem:[%s10010_s5 + $0x118] sm:$0xff] }
 0x485   : > { %v3783_v49 = vpop.f32.mrf.mxu0  ;;  %v3857_v50 = vpop.f32.mrf.mxu1 }
 0x486   : > { %v3787_v53 = vadd.f32 %v3783_v49, %v9557_v3  ;;  %v3861_v57 = vadd.f32 %v3857_v50, %v9614_v30  ;;  %v5683_v49 = vld [vmem:[%s10010_s5 + $0xa8] sm:$0xff]  ;;  %v5693_v50 = vld [vmem:[%s10010_s5 + $0xf0] sm:$0xff] }
 0x487   : > { %v7251_v58 = vpop.f32.mrf.mxu0  ;;  %v7276_v52 = vpop.f32.mrf.mxu1 }
 0x488   : > { %v5711_v58 = vld [vmem:[%s10010_s5 + $0x178] sm:$0xff]  ;;  %v5710_v52 = vld [vmem:[%s10010_s5 + $0x170] sm:$0xff] }
 0x49d   : > { %v3943_v55 = vpop.f32.mrf.mxu0  ;;  %v4014_v56 = vpop.f32.mrf.mxu1 }
 0x49e   : > { %v3947_v59 = vadd.f32 %v3943_v55, %v9622_v20  ;;  %v4018_v60 = vadd.f32 %v4014_v56, %v3699_v36  ;;  %v5699_v36 = vld [vmem:[%s10010_s5 + $0x120] sm:$0xff]  ;;  %v5709_v55 = vld [vmem:[%s10010_s5 + $0x168] sm:$0xff] }
 0x49f   : > { %v7301_v61 = vpop.f32.mrf.mxu0  ;;  %v7326_v62 = vpop.f32.mrf.mxu1  ;;  %v5708_v56 = vld [vmem:[%s10010_s5 + $0x160] sm:$0xff] }
 0x4a0   : > { %v5705_v61 = vld [vmem:[%s10010_s5 + $0x148] sm:$0xff]  ;;  %v5704_v62 = vld [vmem:[%s10010_s5 + $0x140] sm:$0xff] }
 0x4b5   : > { %v4100_v63 = vpop.f32.mrf.mxu0  ;;  %v4174_v0 = vpop.f32.mrf.mxu1 }
 0x4b6   : > { %v4104_v1 = vadd.f32 %v4100_v63, %v3787_v53  ;;  %v4178_v2 = vadd.f32 %v4174_v0, %v3861_v57  ;;  %v5713_v57 = vld [vmem:[%s10010_s5 + $0x188] sm:$0xff]  ;;  %v5105_v0 = vld [vmem:[%s10012_s7 + $0x70] sm:$0xff] }
 0x4b7   : > { %v7351_v3 = vpop.f32.mrf.mxu0  ;;  %v7376_v5 = vpop.f32.mrf.mxu1 }
 0x4b8   : > { %v5102_v3 = vld [vmem:[%s10012_s7 + $0x58] sm:$0xff]  ;;  %v5101_v5 = vld [vmem:[%s10012_s7 + $0x50] sm:$0xff] }
 0x4cd   : > { %v4260_v6 = vpop.f32.mrf.mxu0  ;;  %v4331_v7 = vpop.f32.mrf.mxu1 }
 0x4ce   : > { %v4264_v16 = vadd.f32 %v4260_v6, %v3947_v59  ;;  %v4335_v19 = vadd.f32 %v4331_v7, %v4018_v60  ;;  %v5707_v59 = vld [vmem:[%s10010_s5 + $0x158] sm:$0xff]  ;;  %v5706_v60 = vld [vmem:[%s10010_s5 + $0x150] sm:$0xff]  ;;  %v5100_v6 = vld [vmem:[%s10012_s7 + $0x48] sm:$0xff] }
 0x4cf   : > { %v7401_v8 = vpop.f32.mrf.mxu0  ;;  %v7426_v11 = vpop.f32.mrf.mxu1  ;;  %v5099_v7 = vld [vmem:[%s10012_s7 + $0x40] sm:$0xff] }
 0x4d0   : > { %v5098_v8 = vld [vmem:[%s10012_s7 + $0x38] sm:$0xff]  ;;  %v5097_v11 = vld [vmem:[%s10012_s7 + $0x30] sm:$0xff] }
 0x4e5   : > { %v4417_v12 = vpop.f32.mrf.mxu0  ;;  %v4491_v13 = vpop.f32.mrf.mxu1 }
 0x4e6   : > { %v4421_v30 = vadd.f32 %v4417_v12, %v4104_v1  ;;  %v4495_v15 = vadd.f32 %v4491_v13, %v4178_v2  ;;  %v5104_v1 = vld [vmem:[%s10012_s7 + $0x68] sm:$0xff]  ;;  %v5103_v2 = vld [vmem:[%s10012_s7 + $0x60] sm:$0xff] }
 0x4e7   : > { %v7451_v14 = vpop.f32.mrf.mxu0  ;;  %v7476_v10 = vpop.f32.mrf.mxu1  ;;  %v5096_v12 = vld [vmem:[%s10012_s7 + $0x28] sm:$0xff]  ;;  %v5095_v13 = vld [vmem:[%s10012_s7 + $0x20] sm:$0xff] }
 0x4e8   : > { %v5094_v14 = vld [vmem:[%s10012_s7 + $0x18] sm:$0xff]  ;;  %v5093_v10 = vld [vmem:[%s10012_s7 + $0x10] sm:$0xff] }
 0x4fd   : > { %v4577_v23 = vpop.f32.mrf.mxu0  ;;  %v4648_v27 = vpop.f32.mrf.mxu1 }
 0x4fe   : > { %v4581_v17 = vadd.f32 %v4577_v23, %v4264_v16  ;;  %v4652_v44 = vadd.f32 %v4648_v27, %v4335_v19  ;;  %v5092_v16 = vld [vmem:[%s10012_s7 + $0x8] sm:$0xff]  ;;  %v5091_v19 = vld [vmem:[%s10012_s7] sm:$0xff]  ;;  %v5192_v23 = vld [vmem:[%s10014_s9 + $0x50] sm:$0xf] }
 0x4ff   : > { %v7501_v18 = vpop.f32.mrf.mxu0  ;;  %v7526_v20 = vpop.f32.mrf.mxu1  ;;  %v5191_v27 = vld [vmem:[%s10014_s9 + $0x48] sm:$0xff] }
 0x500   : > { %v4653_v4 = vmax.f32 %v4421_v30, %v4581_v17  ;;  %v4654_v21 = vmax.f32 %v4495_v15, %v4652_v44  ;;  %v5190_v30 = vld [vmem:[%s10014_s9 + $0x40] sm:$0xff]  ;;  %v5189_v15 = vld [vmem:[%s10014_s9 + $0x38] sm:$0xff]  ;;  %v5188_v17 = vld [vmem:[%s10014_s9 + $0x30] sm:$0xff] }
 0x501   : > { %v5187_v44 = vld [vmem:[%s10014_s9 + $0x28] sm:$0xff]  ;;  %v5186_v18 = vld [vmem:[%s10014_s9 + $0x20] sm:$0xff]  ;;  %v5185_v20 = vld [vmem:[%s10014_s9 + $0x18] sm:$0xff] }
 0x502   : > { %v4655_v24 = vmax.f32 %v4653_v4, %v4654_v21 }
 0x504   : > { %v4663_v25 = vadd.f32 %v5669_v22, %v4655_v24 }
 0x506   : > { %v9710_v26 = vmax.f32 %v4663_v25, 0.0 }
 0x508   : > { %7571 = vmatmul.mubr.msk.f32.vlgmr.msra.gmra.mxu1 %vm4688_vm3, %v9710_v26  ;;  %v4687_v29 = vrot.slane %v9710_v26, 1  ;;  %v4929_v54 = vrot.slane %v9710_v26, 3  ;;  %v4844_v53 = vrot.slane %v9710_v26, 2  ;;  %v5014_v63 = vrot.slane %v9710_v26, 4 }
 0x509   : > { %7597 = vmatpush3.msra.mxu1 %v5702_v28  ;;  %7616 = vmatprep.mubr.msk.f32.mxu1 %vm7804_vm14, %v7803_v9 }
 0x50a   : > { %7598 = vmatprep.subr.mxu1 %v7803_v9  ;;  %7548 = vmatmul.mubr.msk.f32.vlgmr.msra.gmra.mxu0 %vm4688_vm3, %v4687_v29 }
 0x50b   : > { %7574 = vmatpush3.msra.mxu0 %v5691_v31  ;;  %7599 = vmatpush3.msra.mxu1 %v5701_v32 }
 0x50c   : > { %7575 = vmatprep.subr.mxu0 %v7803_v9  ;;  %7600 = vmatprep.subr.mxu1 %v7803_v9 }
 0x50d   : > { %7576 = vmatpush3.msra.mxu0 %v5690_v33  ;;  %7601 = vmatpush3.msra.mxu1 %v5700_v34 }
 0x50e   : > { %7577 = vmatprep.subr.mxu0 %v7803_v9  ;;  %7602 = vmatprep.subr.mxu1 %v7803_v9 }
 0x50f   : > { %7578 = vmatpush3.msra.mxu0 %v5689_v35  ;;  %7603 = vmatpush3.msra.mxu1 %v5699_v36  ;;  %v5088_v35 = vld [vmem:[%s10011_s6] sm:$0x1] }
 0x510   : > { %7579 = vmatprep.subr.mxu0 %v7803_v9  ;;  %7604 = vmatprep.subr.mxu1 %v7803_v9 }
 0x511   : > { %7580 = vmatpush3.msra.mxu0 %v5688_v37  ;;  %7605 = vmatpush3.msra.mxu1 %v5698_v38 }
 0x512   : > { %7581 = vmatprep.subr.mxu0 %v7803_v9  ;;  %7606 = vmatprep.subr.mxu1 %v7803_v9 }
 0x513   : > { %7582 = vmatpush3.msra.mxu0 %v5687_v39  ;;  %7607 = vmatpush3.msra.mxu1 %v5697_v40  ;;  %v5184_v40 = vld [vmem:[%s10014_s9 + $0x10] sm:$0xff] }
 0x514   : > { %7583 = vmatprep.subr.mxu0 %v7803_v9  ;;  %7608 = vmatprep.subr.mxu1 %v7803_v9 }
 0x515   : > { %7584 = vmatpush3.msra.mxu0 %v5686_v42  ;;  %7609 = vmatpush3.msra.mxu1 %v5696_v43  ;;  %v5183_v42 = vld [vmem:[%s10014_s9 + $0x8] sm:$0xff]  ;;  %v5182_v43 = vld [vmem:[%s10014_s9] sm:$0xff] }
 0x516   : > { %7585 = vmatprep.subr.mxu0 %v7803_v9  ;;  %7610 = vmatprep.subr.mxu1 %v7803_v9 }
 0x517   : > { %7586 = vmatpush3.msra.mxu0 %v5685_v45  ;;  %7611 = vmatpush3.msra.mxu1 %v5695_v46  ;;  %v5106_v45 = vld [vmem:[%s10013_s8] sm:$0x1] }
 0x518   : > { %7587 = vmatprep.subr.mxu0 %v7803_v9  ;;  %7612 = vmatprep.subr.mxu1 %v7803_v9 }
 0x519   : > { %7588 = vmatpush3.msra.mxu0 %v5684_v47  ;;  %7613 = vmatpush3.msra.mxu1 %v5694_v48 }
 0x51a   : > { %7589 = vmatprep.subr.mxu0 %v7803_v9  ;;  %7614 = vmatprep.subr.mxu1 %v7803_v9 }
 0x51b   : > { %7590 = vmatpush3.msra.mxu0 %v5683_v49  ;;  %7615 = vmatpush3.msra.mxu1 %v5693_v50 }
 0x51c   : > { %7591 = vmatprep.subr.mxu0 %v7803_v9  ;;  %7617 = vmatmul.mubr.msk.f32.vlgmr.msra.gmra.mxu1 %vm4688_vm3, %v4929_v54 }
 0x51d   : > { %7592 = vmatpush3.msra.mxu0 %v5682_v51  ;;  %7593 = vmatprep.mubr.msk.f32.mxu0 %vm7804_vm14, %v7803_v9 }
 0x51e   : > { %7594 = vmatmul.mubr.msk.f32.vlgmr.msra.gmra.mxu0 %vm4688_vm3, %v4844_v53  ;;  %7619 = vmatprep.subr.mxu0 %v7803_v9 }
 0x51f   : > { %7620 = vmatpush3.msra.mxu0 %v5713_v57  ;;  %7639 = vmatprep.mubr.msk.f32.mxu0 %vm7804_vm14, %v7803_v9 }
 0x520   : > { %7621 = vmatprep.subr.mxu0 %v7803_v9  ;;  %7642 = vmatprep.subr.mxu1 %v7803_v9 }
 0x521   : > { %7622 = vmatpush3.msra.mxu0 %v5712_v41  ;;  %7672 = vmatprep.mubr.msk.f32.mxu1 %vm7804_vm14, %v7803_v9 }
 0x522   : > { %7623 = vmatprep.subr.mxu0 %v7803_v9  ;;  %7643 = vmatpush3.msra.mxu1 %v5105_v0 }
 0x523   : > { %7624 = vmatpush3.msra.mxu0 %v5711_v58  ;;  %7644 = vmatprep.subr.mxu1 %v7803_v9 }
 0x524   : > { %7625 = vmatprep.subr.mxu0 %v7803_v9  ;;  %7645 = vmatpush3.msra.mxu1 %v5104_v1 }
 0x525   : > { %7626 = vmatpush3.msra.mxu0 %v5710_v52  ;;  %7646 = vmatprep.subr.mxu1 %v7803_v9 }
 0x526   : > { %7627 = vmatprep.subr.mxu0 %v7803_v9  ;;  %7647 = vmatpush3.msra.mxu1 %v5103_v2 }
 0x527   : > { %7628 = vmatpush3.msra.mxu0 %v5709_v55  ;;  %7648 = vmatprep.subr.mxu1 %v7803_v9 }
 0x528   : > { %7629 = vmatprep.subr.mxu0 %v7803_v9  ;;  %7649 = vmatpush3.msra.mxu1 %v5102_v3 }
 0x529   : > { %7630 = vmatpush3.msra.mxu0 %v5708_v56  ;;  %7650 = vmatprep.subr.mxu1 %v7803_v9 }
 0x52a   : > { %7631 = vmatprep.subr.mxu0 %v7803_v9  ;;  %7651 = vmatpush3.msra.mxu1 %v5101_v5 }
 0x52b   : > { %7632 = vmatpush3.msra.mxu0 %v5707_v59  ;;  %7652 = vmatprep.subr.mxu1 %v7803_v9 }
 0x52c   : > { %7633 = vmatprep.subr.mxu0 %v7803_v9  ;;  %7653 = vmatpush3.msra.mxu1 %v5100_v6 }
 0x52d   : > { %7634 = vmatpush3.msra.mxu0 %v5706_v60  ;;  %7654 = vmatprep.subr.mxu1 %v7803_v9 }
 0x52e   : > { %7635 = vmatprep.subr.mxu0 %v7803_v9  ;;  %7655 = vmatpush3.msra.mxu1 %v5099_v7 }
 0x52f   : > { %7636 = vmatpush3.msra.mxu0 %v5705_v61  ;;  %7656 = vmatprep.subr.mxu1 %v7803_v9 }
 0x530   : > { %7637 = vmatprep.subr.mxu0 %v7803_v9  ;;  %7657 = vmatpush3.msra.mxu1 %v5098_v8 }
 0x531   : > { %7638 = vmatpush3.msra.mxu0 %v5704_v62  ;;  %7658 = vmatprep.subr.mxu1 %v7803_v9 }
 0x532   : > { %7640 = vmatmul.mubr.msk.f32.vlgmr.msra.gmra.mxu0 %vm4688_vm3, %v5014_v63  ;;  %7675 = vmatprep.subr.mxu0 %v7803_v9 }
 0x533   : > { %7697 = vmatprep.mubr.msk.f32.mxu0 %vm7804_vm14, %v7803_v9  ;;  %7659 = vmatpush3.msra.mxu1 %v5097_v11 }
 0x534   : > { %7660 = vmatprep.subr.mxu1 %v7803_v9  ;;  %7676 = vmatpush3.msk.msra.mxu0 %vm3111_vm1, %v5192_v23 }
 0x535   : > { %7661 = vmatpush3.msra.mxu1 %v5096_v12  ;;  %7677 = vmatprep.subr.mxu0 %v7803_v9 }
 0x536   : > { %7662 = vmatprep.subr.mxu1 %v7803_v9  ;;  %7678 = vmatpush3.msra.mxu0 %v5191_v27 }
 0x537   : > { %7663 = vmatpush3.msra.mxu1 %v5095_v13  ;;  %7679 = vmatprep.subr.mxu0 %v7803_v9 }
 0x538   : > { %7664 = vmatprep.subr.mxu1 %v7803_v9  ;;  %7680 = vmatpush3.msra.mxu0 %v5190_v30 }
 0x539   : > { %7665 = vmatpush3.msra.mxu1 %v5094_v14  ;;  %7681 = vmatprep.subr.mxu0 %v7803_v9 }
 0x53a   : > { %7666 = vmatprep.subr.mxu1 %v7803_v9  ;;  %7682 = vmatpush3.msra.mxu0 %v5189_v15 }
 0x53b   : > { %7667 = vmatpush3.msra.mxu1 %v5093_v10  ;;  %7683 = vmatprep.subr.mxu0 %v7803_v9 }
 0x53c   : > { %7668 = vmatprep.subr.mxu1 %v7803_v9  ;;  %7684 = vmatpush3.msra.mxu0 %v5188_v17 }
 0x53d   : > { %7669 = vmatpush3.msra.mxu1 %v5092_v16  ;;  %7685 = vmatprep.subr.mxu0 %v7803_v9 }
 0x53e   : > { %7670 = vmatprep.subr.mxu1 %v7803_v9  ;;  %7686 = vmatpush3.msra.mxu0 %v5187_v44 }
 0x53f   : > { %7671 = vmatpush3.msra.mxu1 %v5091_v19  ;;  %7687 = vmatprep.subr.mxu0 %v7803_v9 }
 0x540   : > { %7688 = vmatpush3.msra.mxu0 %v5186_v18 }
 0x541   : > { %7689 = vmatprep.subr.mxu0 %v7803_v9 }
 0x542   : > { %7690 = vmatpush3.msra.mxu0 %v5185_v20 }
 0x543   : > { %7691 = vmatprep.subr.mxu0 %v7803_v9 }
 0x544   : > { %7692 = vmatpush3.msra.mxu0 %v5184_v40 }
 0x545   : > { %7693 = vmatprep.subr.mxu0 %v7803_v9 }
 0x546   : > { %7694 = vmatpush3.msra.mxu0 %v5183_v42 }
 0x547   : > { %7695 = vmatprep.subr.mxu0 %v7803_v9  ;;  %v5193_v9 = vld [vmem:[%s10015_s10] sm:$0x1] }
 0x548   : > { %7696 = vmatpush3.msra.mxu0 %v5182_v43 }
 0x5c8   : > { %v4829_v4 = vpop.f32.mrf.mxu1 }
 0x5ca   : > { %v4757_v21 = vpop.f32.mrf.mxu0  ;;  %v7572_v22 = vpop.f32.mrf.mxu1 }
 0x5cb   : > { %v4830_v31 = vadd.f32 %v4829_v4, %v4757_v21 }
 0x5cc   : > { %v7549_v24 = vpop.f32.mrf.mxu0 }
 0x5dc   : > { %v4998_v25 = vpop.f32.mrf.mxu1 }
 0x5de   : > { %v4913_v26 = vpop.f32.mrf.mxu0  ;;  %v7618_v28 = vpop.f32.mrf.mxu1 }
 0x5df   : > { %v4917_v32 = vadd.f32 %v4913_v26, %v4830_v31 }
 0x5e0   : > { %v7595_v29 = vpop.f32.mrf.mxu0 }
 0x5e1   : > { %v5002_v33 = vadd.f32 %v4998_v25, %v4917_v32 }
 0x5f2   : > { %v5083_v34 = vpop.f32.mrf.mxu0 }
 0x5f3   : > { %v5087_v36 = vadd.f32 %v5083_v34, %v5002_v33 }
 0x5f4   : > { %v7641_v37 = vpop.f32.mrf.mxu0 }
 0x5f5   : > { %v5089_v38 = vadd.f32 %v5088_v35, %v5087_v36 }
 0x5f7   : > { %v5090_v39 = vmax.f32 %v5089_v38, 0.0 }
 0x5f9   : > { %7673 = vmatmul.mubr.msk.f32.vlgmr.msra.gmra.mxu1 %vm5107_vm4, %v5090_v39 }
 0x6b9   : > { %v5177_v46 = vpop.f32.mrf.mxu1 }
 0x6ba   : > { %v5178_v47 = vadd.f32 %v5177_v46, %v5106_v45 }
 0x6bb   : > { %v7674_v48 = vpop.f32.mrf.mxu1 }
 0x6bc   : > { %v5181_v49 = vmax.f32 %v5178_v47, 0.0 }
 0x6be   : > { %7698 = vmatmul.mubr.msk.f32.vlgmr.msra.gmra.mxu0 %vm3107_vm2, %v5181_v49 }
 0x77e   : > { %v5266_v50 = vpop.f32.mrf.mxu0 }
 0x77f   : > { %v5267_v54 = vadd.f32 %v5266_v50, %v5193_v9 }
 0x780   : > { %v7699_v51 = vpop.f32.mrf.mxu0 }
 0x781   : > { %5270 = vst [vmem:[%s378_s25] sm:$0x1] %v5267_v54 }
 0x782   : > { %7754 = shalt.err (!%p7751_p3)
}
 0x783   : > { %s7755_s24 = scalar_lea.hbm %s9970_s13, 16  ;;  %s7759_s30 = scalar_lea.hbm %s10016_s11, 32 }
 0x784   : > { %p7756_p4 = scmp.ne.s32.totalorder %s9970_s13, %s7755_s24  ;;  %p7760_p9 = scmp.lt.s32.totalorder %s9970_s13, %s10016_s11 }
 0x785   : > { %p7761_p10 = scmp.lt.s32.totalorder %s7759_s30, %s7755_s24 }
 0x786   : > { %p7757_p7 = pnand %p7756_p4, %p7904_p5 }
 0x787   : > { %p7762_p11 = por %p7761_p10, %p7760_p9 }
 0x788   : > { %p7758_p8 = pneg %p7757_p7 }
 0x78a   : > { %p7763_p12 = pnand %p7762_p11, %p7758_p8 }
 0x78c   : > { %7766 = shalt.err (!%p7763_p12)
}
 0x78d   : > { %7700 = dma.vmem_to_hbm [thread:$0]  (%p7904_p5), %s5285_s29, 16, %s9970_s13, %s5272_s14  }
 0x78e PF: > { %p7706_p13 = scmp.ge.s32.totalorder %s7801_s20, 2  ;;  %s5296_s0 = sand.u32 1, %s7789_s17  }
 0x78f   : > { %s5297_s21 = scalar_lea.sflag [#allocation3], %s5296_s0 }
 0x790   : > { %p7703_p0 = pnand %p7706_p13, %p7908_p6 }
 0x792   : > { %p7704_p1 = pneg %p7703_p0 }
 0x794   : > { %7784 = dma.done.wait (%p7704_p1), %s5297_s21, 16  }
 0x795   : > { %7786 = vsyncadd (%p7704_p1), %s5297_s21, 4294967280  ;;  %p21_p2 = scmp.ge.s32.totalorder %s7891_s23, 4   ;;  %s10021_s17 = smov %s7793_s18 }
 0x796   : > { %s10022_s18 = smov %s7797_s19  ;;  %s10023_s19 = smov %s7902_s26 }
 0x797   : > { %s10024_s20 = smov %s7891_s23  ;;  %23 = sbr.rel (!%p21_p2) target bundleno = 5 (0x5), region = 121 }
 0x79c   :  { %5301 = vsyncpa [#allocation3], 1 }
 0x79d   :  { %5303 = vsyncpa [#allocation3 + $0x1], 1 }

</bundles_post_ra>
